<compile_context>
chip_gen: v6e
topology: v6e:2x2x1
jax: 0.10.0
libtpu: 0.0.40
codegen_flags: <defaults>
</compile_context>

<pallas_src>
import functools

import jax
import jax.numpy as jnp
from jax.experimental import pallas as pl
from jax.experimental.pallas import tpu as pltpu


def _round_up(x, m):
    return ((x + m - 1) // m) * m


def _wrn_last_kernel(x_ref, w_ref, b_ref, o_ref):
    # x_ref: [tn, D]   flattened NCHW input tile (D = C*H*W), pipelined DMA
    # w_ref: [D, Kp]   pool-folded, pre-transposed FC weight (VMEM-resident)
    # b_ref: [1, Kp]   bias (f32)
    # o_ref: [tn, Kp]  f32 output tile (lane-dense, Kp % 128 == 0)
    o_ref[...] = (
        jnp.dot(x_ref[...], w_ref[...], preferred_element_type=jnp.float32)
        + b_ref[...]
    )


def prepare_wrn_last_params(fc_weight, fc_bias, input_chw, *, weight_dtype=jnp.float32):
    """One-time parameter prep (call once, NOT in the per-step path).

    fc_weight: [K, F] with F = C*(H//8)*(W//8); fc_bias: [K]; input_chw = (C, H, W).
    Returns (wfold [D, Kp], bias [1, Kp]) with D = C*H*W, Kp = round_up(K, 128),
    such that  avgpool8(x).flatten() @ fc_weight.T + fc_bias
            == x.reshape(N, D) @ wfold + bias   (up to f32 rounding).
    """
    C, H, W = input_chw
    assert H % 8 == 0 and W % 8 == 0, "avg_pool2d(kernel=8, stride=8) needs H,W % 8 == 0"
    Ph, Pw = H // 8, W // 8
    K, F = fc_weight.shape
    assert F == C * Ph * Pw, "fc weight does not match pooled feature count"
    D = C * H * W
    Kp = _round_up(max(K, 128), 128)          # lane-dense output stores

    # x.reshape(N, D) index order is (c, ph, i, pw, j); build Wfold in exactly
    # that order.  The 1/64 pool factor is a power of two -> exact in f32.
    wt = jnp.asarray(fc_weight, jnp.float32).T.reshape(C, Ph, Pw, K)
    wfold = jnp.broadcast_to(wt[:, :, None, :, None, :], (C, Ph, 8, Pw, 8, K))
    wfold = wfold.reshape(D, K) * jnp.float32(1.0 / 64.0)
    wfold = jnp.pad(wfold, ((0, 0), (0, Kp - K))).astype(weight_dtype)

    bias = jnp.pad(jnp.asarray(fc_bias, jnp.float32), (0, Kp - K)).reshape(1, Kp)
    return wfold, bias


@functools.partial(jax.jit, static_argnames=("num_classes", "tile_n", "target_steps"))
def wrn_last_forward(x, wfold, bias, num_classes, *, tile_n=128, target_steps=4):
    """x: [N, C, H, W] NCHW.  wfold/bias from prepare_wrn_last_params."""
    N, C, H, W = x.shape
    D = C * H * W
    Dw, Kp = wfold.shape
    assert Dw == D, "folded weight does not match input shape"
    assert Kp % 128 == 0 and bias.shape == (1, Kp)

    x_flat = x.reshape(N, D)                  # contiguous NCHW flatten: free
    # x is NOT cast here (an astype would add a full read+write pass over x).

    # Batch tile: multiple of 8 sublanes (or == N when N <= 8), capped so the
    # grid has >= target_steps steps -> DMA/compute pipelining, 2 TCs on v7x.
    if N <= 8:
        tn = N
    else:
        tn = min(tile_n, max(8, _round_up(pl.cdiv(_round_up(N, 8), target_steps), 8)))
    grid_n = pl.cdiv(N, tn)                   # partial last block is masked

    x_item = jnp.dtype(x.dtype).itemsize
    w_item = jnp.dtype(wfold.dtype).itemsize

    # VMEM footprint: double-buffered x tiles + single-buffered weight + bias
    # + double-buffered output tile, plus headroom for compiler scratch.
    footprint = (2 * tn * D * x_item) + (D * Kp * w_item) + (2 * Kp * 4) + (2 * tn * Kp * 4)
    vmem_limit = int(max(16 << 20, min(100 << 20, footprint + (4 << 20))))

    cost = pl.CostEstimate(
        flops=2 * N * D * Kp + N * Kp,
        transcendentals=0,
        bytes_accessed=N * D * x_item + D * Kp * w_item + N * Kp * 4 + Kp * 4,
    )

    out = pl.pallas_call(
        _wrn_last_kernel,
        out_shape=jax.ShapeDtypeStruct((N, Kp), jnp.float32),
        grid=(grid_n,),
        in_specs=[
            # x tile: pipelined across the batch grid.
            pl.BlockSpec((tn, D), lambda n: (n, 0)),
            # Weight/bias: constant block -> VMEM-resident, single buffer.
            pl.BlockSpec((D, Kp), lambda n: (0, 0), pipeline_mode=pl.Buffered(1)),
            pl.BlockSpec((1, Kp), lambda n: (0, 0), pipeline_mode=pl.Buffered(1)),
        ],
        out_specs=pl.BlockSpec((tn, Kp), lambda n: (n, 0)),
        compiler_params=pltpu.CompilerParams(
            dimension_semantics=("parallel",),
            vmem_limit_bytes=vmem_limit,
        ),
        cost_estimate=cost,
    )(x_flat, wfold, bias)

    return out[:, :num_classes]


if __name__ == "__main__":
    # Small WRN-like shapes: last feature map [N, C, 16, 16] -> 2x2 pooled grid,
    # fc: C*2*2 -> num_classes.
    C, H, W = 32, 16, 16
    num_classes = 10
    F_feat = C * (H // 8) * (W // 8)

    key = jax.random.PRNGKey(0)
    kx1, kx2, kw, kb = jax.random.split(key, 4)
    bound = 1.0 / (F_feat ** 0.5)   # PyTorch-style Linear init range
    fc_weight = jax.random.uniform(kw, (num_classes, F_feat), jnp.float32, -bound, bound)
    fc_bias = jax.random.uniform(kb, (num_classes,), jnp.float32, -bound, bound)

    # One-time prep (folded weight + padded bias), outside the per-call path.
    wfold, bias_p = prepare_wrn_last_params(fc_weight, fc_bias, (C, H, W))

    def reference(x):
        n = x.shape[0]
        pooled = jnp.mean(x.reshape(n, C, H // 8, 8, W // 8, 8), axis=(3, 5)).reshape(n, -1)
        return pooled @ fc_weight.T + fc_bias

    # Case 1: tiny batch (grid of 1 full block).
    N1 = 2
    x1 = jax.random.normal(kx1, (N1, C, H, W), dtype=jnp.float32)
    out1 = jax.block_until_ready(wrn_last_forward(x1, wfold, bias_p, num_classes))
    assert out1.shape == (N1, num_classes)
    assert jnp.allclose(out1, reference(x1), atol=1e-4, rtol=1e-4), "mismatch (N=2)"

    # Case 2: batch not divisible by the tile -> multi-step grid with a masked
    # partial last block (validates the no-pad path).
    N2 = 20
    x2 = jax.random.normal(kx2, (N2, C, H, W), dtype=jnp.float32)
    out2 = jax.block_until_ready(wrn_last_forward(x2, wfold, bias_p, num_classes))
    assert out2.shape == (N2, num_classes)
    assert jnp.allclose(out2, reference(x2), atol=1e-4, rtol=1e-4), "mismatch (N=20)"

    print("KERNEL_OK")
</pallas_src>

<mosaic_0001>
module attributes {stable_mosaic.version = 11 : i64} {
  func.func @_wrn_last_kernel(%arg0: i32, %arg1: memref<2x8192xf32, #tpu.memory_space<vmem>>, %arg2: memref<8192x128xf32, #tpu.memory_space<vmem>>, %arg3: memref<1x128xf32, #tpu.memory_space<vmem>>, %arg4: memref<2x128xf32, #tpu.memory_space<vmem>>) attributes {dimension_semantics = [#tpu.dimension_semantics<parallel>], iteration_bounds = array<i64: 1>, scalar_prefetch = 0 : i64, scratch_operands = 0 : i64, tpu.core_type = #tpu.core_type<tc>, window_params = [{transform_indices = @transform_0, window_bounds = array<i64: 2, 8192>}, {pipeline_mode = #tpu.pipeline_mode<synchronous>, transform_indices = @transform_1, window_bounds = array<i64: 8192, 128>}, {pipeline_mode = #tpu.pipeline_mode<synchronous>, transform_indices = @transform_2, window_bounds = array<i64: 1, 128>}, {transform_indices = @transform_3, window_bounds = array<i64: 2, 128>}]} {
    %c0 = arith.constant 0 : index
    %c0_0 = arith.constant 0 : index
    %0 = vector.load %arg1[%c0, %c0_0] : memref<2x8192xf32, #tpu.memory_space<vmem>>, vector<2x8192xf32>
    %c0_1 = arith.constant 0 : index
    %c0_2 = arith.constant 0 : index
    %1 = vector.load %arg2[%c0_1, %c0_2] : memref<8192x128xf32, #tpu.memory_space<vmem>>, vector<8192x128xf32>
    %cst = arith.constant dense<0.000000e+00> : vector<2x128xf32>
    %2 = tpu.matmul %0, %1, %cst {dimension_numbers = #tpu.dot_dimension_numbers<[1], [0], [0], [1], [0, 0, 1, 1], [], []>} : vector<2x8192xf32>, vector<8192x128xf32>, vector<2x128xf32> -> vector<2x128xf32>
    %c0_3 = arith.constant 0 : index
    %c0_4 = arith.constant 0 : index
    %3 = vector.load %arg3[%c0_3, %c0_4] : memref<1x128xf32, #tpu.memory_space<vmem>>, vector<1x128xf32>
    %4 = vector.broadcast %3 : vector<1x128xf32> to vector<2x128xf32>
    %5 = arith.addf %2, %4 : vector<2x128xf32>
    %c0_5 = arith.constant 0 : index
    %c0_6 = arith.constant 0 : index
    %6 = vector.load %arg4[%c0_5, %c0_6] : memref<2x128xf32, #tpu.memory_space<vmem>>, vector<2x128xf32>
    tpu.vector_store %arg4[%c0_5, %c0_6], %5 {strides = array<i32>} : memref<2x128xf32, #tpu.memory_space<vmem>>, vector<2x128xf32>,
    return
  }
  func.func @transform_0(%arg0: i32) -> (i32, i32) {
    %c0_i32 = arith.constant 0 : i32
    %c0_i32_0 = arith.constant 0 : i32
    return %arg0, %c0_i32 : i32, i32
  }
  func.func @transform_1(%arg0: i32) -> (i32, i32) {
    %c0_i32 = arith.constant 0 : i32
    %c0_i32_0 = arith.constant 0 : i32
    %c0_i32_1 = arith.constant 0 : i32
    return %c0_i32, %c0_i32_0 : i32, i32
  }
  func.func @transform_2(%arg0: i32) -> (i32, i32) {
    %c0_i32 = arith.constant 0 : i32
    %c0_i32_0 = arith.constant 0 : i32
    %c0_i32_1 = arith.constant 0 : i32
    return %c0_i32, %c0_i32_0 : i32, i32
  }
  func.func @transform_3(%arg0: i32) -> (i32, i32) {
    %c0_i32 = arith.constant 0 : i32
    %c0_i32_0 = arith.constant 0 : i32
    return %arg0, %c0_i32 : i32, i32
  }
}

</mosaic_0001>

<bundles_post_ra>
// kernel: wrn_last_forward.1
= control target key start
LH: loop header
LB: loop body
LE: loop exit
PB: predicated region body
PF: predicated region fallthrough
CT: control target
= control target key end

     0   :  { %8 = vsyncpa [#allocation3], 0  ;;  %s5023_s0 = inlined_call_operand.vmem [shape: f32[2,8192], index: 0, kind: input, shape index: {}]   ;;  %s5024_s1 = inlined_call_operand.hbm [shape: f32[8192,128], index: 1, kind: input, shape index: {}]   ;;  %s5025_s2 = inlined_call_operand.hbm [shape: f32[1,128], index: 2, kind: input, shape index: {}]   ;;  %s5026_s3 = inlined_call_operand.hbm [shape: f32[2,128], index: 3, kind: output, shape index: {}]  }
   0x1   :  { %9 = vsyncpa [#allocation6], 0 }
   0x2   :  { %10 = vsyncpa [#allocation4], 0  ;;  %s4906_s12 = smov [#allocation2]  }
   0x3   :  { %s18_s13 = sshll.u32 %s4906_s12, 4  ;;  %s19_s13 = int_to_ptr.vmem [resolvable:$true] %s18_s13 }
   0x4   :  { %s4848_s14 = scalar_lea.vmem %s19_s13, 131072  ;;  %p4853_p1 = scmp.lt.s32.totalorder %s19_s13, %s19_s13 }
   0x5   :  { %p4849_p0 = scmp.ne.s32.totalorder %s19_s13, %s4848_s14  ;;  %p4854_p2 = scmp.lt.s32.totalorder %s4848_s14, %s4848_s14 }
   0x7   :  { %p4855_p3 = por %p4854_p2, %p4853_p1 }
   0x9   :  { %p4856_p4 = pnand %p4855_p3, %p4849_p0 }
   0xb   :  { %4859 = shalt.err (!%p4856_p4)
}
   0xc   :  { %s4907_s15 = smov 128   ;;  %s4908_s16 = smov 8  }
   0xd   :  { %24 = dma.hbm_to_vmem [thread:$0]  %s5024_s1, 131072, %s19_s13, [#allocation3], %s4907_s15, %s4907_s15, %s4908_s16  }
   0xe   :  { %s4909_s19 = smov [#allocation5]  }
   0xf   :  { %s31_s20 = sshll.u32 %s4909_s19, 4  ;;  %s32_s20 = int_to_ptr.vmem [resolvable:$true] %s31_s20 }
  0x10   :  { %s4868_s21 = scalar_lea.vmem %s32_s20, 16  ;;  %s4872_s22 = scalar_lea.vmem %s32_s20, 32 }
  0x11   :  { %p4869_p5 = scmp.ne.s32.totalorder %s32_s20, %s4868_s21  ;;  %p4873_p6 = scmp.lt.s32.totalorder %s32_s20, %s32_s20 }
  0x12   :  { %p4874_p7 = scmp.lt.s32.totalorder %s4872_s22, %s4868_s21 }
  0x14   :  { %p4875_p8 = por %p4874_p7, %p4873_p6 }
  0x16   :  { %p4876_p9 = pnand %p4875_p8, %p4869_p5 }
  0x18   :  { %4879 = shalt.err (!%p4876_p9)
}
  0x19   :  { %34 = dma.hbm_to_vmem [thread:$0]  %s5025_s2, 16, %s32_s20, [#allocation6]  }
  0x1a   :  { %4900 = dma.done.wait [#allocation3], 131072  }
  0x1b   :  { %4901 = vsyncadd [#allocation3], 4294836224 }
  0x1c   :  { %4902 = dma.done.wait [#allocation6], 16  }
  0x1d   :  { %4903 = vsyncadd [#allocation6], 4294967280  ;;  %v88_v0 = vld [vmem:[#allocation2 + $0xf8] sm:$0xff]  ;;  %v87_v4 = vld [vmem:[#allocation2 + $0xf0] sm:$0xff]  ;;  %v4910_v30 = vmov 1983009808   ;;  %v1108_v32 = vlaneseq }
  0x1e   :  { %v120_v1 = vld [vmem:[#allocation2 + $0x1f8] sm:$0xff]  ;;  %3698 = vmatprep.subr.mxu0 %v88_v0  ;;  %v119_v5 = vld [vmem:[#allocation2 + $0x1f0] sm:$0xff]  ;;  %v86_v8 = vld [vmem:[#allocation2 + $0xe8] sm:$0xff]  ;;  %v1106_v31 = vunpack.c.l.s4 %v4910_v30 }
  0x1f   :  { %v72_v2 = vld [vmem:[#allocation2 + $0x78] sm:$0xff]  ;;  %3733 = vmatprep.subr.mxu1 %v120_v1  ;;  %v71_v6 = vld [vmem:[#allocation2 + $0x70] sm:$0xff]  ;;  %v118_v9 = vld [vmem:[#allocation2 + $0x1e8] sm:$0xff]  ;;  %v1109_v42 = vshrl.u32 %v1108_v32, 7 }
  0x20   :  { %v104_v3 = vld [vmem:[#allocation2 + $0x178] sm:$0xff]  ;;  %3699 = vmatpush3.msra.mxu0 %v72_v2  ;;  %v103_v7 = vld [vmem:[#allocation2 + $0x170] sm:$0xff]  ;;  %v70_v10 = vld [vmem:[#allocation2 + $0x68] sm:$0xff]  ;;  %v1107_v41 = vunpack.c.0.s8 %v1106_v31 }
  0x21   :  { %3734 = vmatpush3.msra.mxu1 %v104_v3  ;;  %3700 = vmatprep.subr.mxu0 %v87_v4  ;;  %v102_v11 = vld [vmem:[#allocation2 + $0x168] sm:$0xff]  ;;  %v85_v12 = vld [vmem:[#allocation2 + $0xe0] sm:$0xff]  ;;  %v84_v16 = vld [vmem:[#allocation2 + $0xd8] sm:$0xff] }
  0x22   :  { %3735 = vmatprep.subr.mxu1 %v119_v5  ;;  %3701 = vmatpush3.msra.mxu0 %v71_v6  ;;  %v117_v13 = vld [vmem:[#allocation2 + $0x1e0] sm:$0xff]  ;;  %v116_v17 = vld [vmem:[#allocation2 + $0x1d8] sm:$0xff]  ;;  %v83_v20 = vld [vmem:[#allocation2 + $0xd0] sm:$0xff]  ;;  %v4938_v51 = vsub.s32 %v1107_v41, %v1109_v42 }
  0x23   :  { %3736 = vmatpush3.msra.mxu1 %v103_v7  ;;  %3702 = vmatprep.subr.mxu0 %v86_v8  ;;  %v69_v14 = vld [vmem:[#allocation2 + $0x60] sm:$0xff]  ;;  %v68_v18 = vld [vmem:[#allocation2 + $0x58] sm:$0xff]  ;;  %v115_v21 = vld [vmem:[#allocation2 + $0x1d0] sm:$0xff] }
  0x24   :  { %3737 = vmatprep.subr.mxu1 %v118_v9  ;;  %v101_v15 = vld [vmem:[#allocation2 + $0x160] sm:$0xff]  ;;  %3703 = vmatpush3.msra.mxu0 %v70_v10  ;;  %v100_v19 = vld [vmem:[#allocation2 + $0x158] sm:$0xff]  ;;  %v67_v22 = vld [vmem:[#allocation2 + $0x50] sm:$0xff] }
  0x25   :  { %3738 = vmatpush3.msra.mxu1 %v102_v11  ;;  %3704 = vmatprep.subr.mxu0 %v85_v12  ;;  %v99_v23 = vld [vmem:[#allocation2 + $0x150] sm:$0xff]  ;;  %v82_v24 = vld [vmem:[#allocation2 + $0xc8] sm:$0xff]  ;;  %v81_v28 = vld [vmem:[#allocation2 + $0xc0] sm:$0xff] }
  0x26   :  { %3739 = vmatprep.subr.mxu1 %v117_v13  ;;  %3705 = vmatpush3.msra.mxu0 %v69_v14  ;;  %v114_v25 = vld [vmem:[#allocation2 + $0x1c8] sm:$0xff]  ;;  %v113_v29 = vld [vmem:[#allocation2 + $0x1c0] sm:$0xff]  ;;  %v80_v35 = vld [vmem:[#allocation2 + $0xb8] sm:$0xff] }
  0x27   :  { %3740 = vmatpush3.msra.mxu1 %v101_v15  ;;  %3706 = vmatprep.subr.mxu0 %v84_v16  ;;  %v66_v26 = vld [vmem:[#allocation2 + $0x48] sm:$0xff]  ;;  %v65_v33 = vld [vmem:[#allocation2 + $0x40] sm:$0xff]  ;;  %v112_v36 = vld [vmem:[#allocation2 + $0x1b8] sm:$0xff] }
  0x28   :  { %3741 = vmatprep.subr.mxu1 %v116_v17  ;;  %3707 = vmatpush3.msra.mxu0 %v68_v18  ;;  %v98_v27 = vld [vmem:[#allocation2 + $0x148] sm:$0xff]  ;;  %v97_v34 = vld [vmem:[#allocation2 + $0x140] sm:$0xff]  ;;  %v64_v37 = vld [vmem:[#allocation2 + $0x38] sm:$0xff] }
  0x29   :  { %3742 = vmatpush3.msra.mxu1 %v100_v19  ;;  %3708 = vmatprep.subr.mxu0 %v83_v20  ;;  %v96_v38 = vld [vmem:[#allocation2 + $0x138] sm:$0xff]  ;;  %v79_v39 = vld [vmem:[#allocation2 + $0xb0] sm:$0xff]  ;;  %v78_v45 = vld [vmem:[#allocation2 + $0xa8] sm:$0xff] }
  0x2a   :  { %3743 = vmatprep.subr.mxu1 %v115_v21  ;;  %3709 = vmatpush3.msra.mxu0 %v67_v22  ;;  %v111_v40 = vld [vmem:[#allocation2 + $0x1b0] sm:$0xff]  ;;  %v110_v46 = vld [vmem:[#allocation2 + $0x1a8] sm:$0xff]  ;;  %v77_v49 = vld [vmem:[#allocation2 + $0xa0] sm:$0xff] }
  0x2b   :  { %3744 = vmatpush3.msra.mxu1 %v99_v23  ;;  %3710 = vmatprep.subr.mxu0 %v82_v24  ;;  %v63_v43 = vld [vmem:[#allocation2 + $0x30] sm:$0xff]  ;;  %v62_v47 = vld [vmem:[#allocation2 + $0x28] sm:$0xff]  ;;  %v109_v50 = vld [vmem:[#allocation2 + $0x1a0] sm:$0xff] }
  0x2c   :  { %3745 = vmatprep.subr.mxu1 %v114_v25  ;;  %3711 = vmatpush3.msra.mxu0 %v66_v26  ;;  %v95_v44 = vld [vmem:[#allocation2 + $0x130] sm:$0xff]  ;;  %v94_v48 = vld [vmem:[#allocation2 + $0x128] sm:$0xff]  ;;  %v61_v52 = vld [vmem:[#allocation2 + $0x20] sm:$0xff] }
  0x2d   :  { %3746 = vmatpush3.msra.mxu1 %v98_v27  ;;  %3712 = vmatprep.subr.mxu0 %v81_v28  ;;  %v93_v53 = vld [vmem:[#allocation2 + $0x120] sm:$0xff]  ;;  %v76_v55 = vld [vmem:[#allocation2 + $0x98] sm:$0xff]  ;;  %v75_v60 = vld [vmem:[#allocation2 + $0x90] sm:$0xff] }
  0x2e   :  { %3747 = vmatprep.subr.mxu1 %v113_v29  ;;  %3713 = vmatpush3.msra.mxu0 %v65_v33  ;;  %v41_v54 = vld [vmem:[%s5023_s0] sm:$0xff]  ;;  %v108_v56 = vld [vmem:[#allocation2 + $0x198] sm:$0xff]  ;;  %v107_v61 = vld [vmem:[#allocation2 + $0x190] sm:$0xff] }
  0x2f   :  { %3748 = vmatpush3.msra.mxu1 %v97_v34  ;;  %3714 = vmatprep.subr.mxu0 %v80_v35  ;;  %v1104_v57 = vcombine.high %v41_v54, %v41_v54  ;;  %v60_v58 = vld [vmem:[#allocation2 + $0x18] sm:$0xff]  ;;  %v1111_v62 = vrot.slane %v41_v54, %v4938_v51  ;;  %v59_v63 = vld [vmem:[#allocation2 + $0x10] sm:$0xff]  ;;  %v74_v1 = vld [vmem:[#allocation2 + $0x88] sm:$0xff] }
  0x30   :  { %3749 = vmatprep.subr.mxu1 %v112_v36  ;;  %3715 = vmatpush3.msra.mxu0 %v64_v37  ;;  %v92_v59 = vld [vmem:[#allocation2 + $0x118] sm:$0xff]  ;;  %v91_v0 = vld [vmem:[#allocation2 + $0x110] sm:$0xff]  ;;  %v106_v2 = vld [vmem:[#allocation2 + $0x188] sm:$0xff] }
  0x31   :  { %3750 = vmatpush3.msra.mxu1 %v96_v38  ;;  %3716 = vmatprep.subr.mxu0 %v79_v39  ;;  %v1118_v3 = vrot.slane %v1104_v57, %v4938_v51  ;;  %v58_v4 = vld [vmem:[#allocation2 + $0x8] sm:$0xff]  ;;  %v73_v6 = vld [vmem:[#allocation2 + $0x80] sm:$0xff]  ;;  %v1119_v8 = vcombine.high %v1111_v62, %v1111_v62  ;;  %v152_v12 = vld [vmem:[#allocation2 + $0x2f8] sm:$0xff] }
  0x32   :  { %3751 = vmatprep.subr.mxu1 %v111_v40  ;;  %3717 = vmatpush3.msra.mxu0 %v63_v43  ;;  %v90_v5 = vld [vmem:[#allocation2 + $0x108] sm:$0xff]  ;;  %v105_v7 = vld [vmem:[#allocation2 + $0x180] sm:$0xff]  ;;  %v184_v13 = vld [vmem:[#allocation2 + $0x3f8] sm:$0xff] }
  0x33   :  { %3752 = vmatpush3.msra.mxu1 %v95_v44  ;;  %3718 = vmatprep.subr.mxu0 %v78_v45  ;;  %v57_v9 = vld [vmem:[#allocation2] sm:$0xff]  ;;  %v1120_v11 = vcombine.high %v1118_v3, %v1118_v3  ;;  %v136_v14 = vld [vmem:[#allocation2 + $0x278] sm:$0xff]  ;;  %v151_v16 = vld [vmem:[#allocation2 + $0x2f0] sm:$0xff] }
  0x34   :  { %3753 = vmatprep.subr.mxu1 %v110_v46  ;;  %3719 = vmatpush3.msra.mxu0 %v62_v47  ;;  %v89_v10 = vld [vmem:[#allocation2 + $0x100] sm:$0xff]  ;;  %v168_v15 = vld [vmem:[#allocation2 + $0x378] sm:$0xff]  ;;  %v183_v17 = vld [vmem:[#allocation2 + $0x3f0] sm:$0xff] }
  0x35   :  { %3754 = vmatpush3.msra.mxu1 %v94_v48  ;;  %3720 = vmatprep.subr.mxu0 %v77_v49  ;;  %v135_v18 = vld [vmem:[#allocation2 + $0x270] sm:$0xff]  ;;  %v150_v20 = vld [vmem:[#allocation2 + $0x2e8] sm:$0xff]  ;;  %v149_v24 = vld [vmem:[#allocation2 + $0x2e0] sm:$0xff] }
  0x36   :  { %3755 = vmatprep.subr.mxu1 %v109_v50  ;;  %3721 = vmatpush3.msra.mxu0 %v61_v52  ;;  %v167_v19 = vld [vmem:[#allocation2 + $0x370] sm:$0xff]  ;;  %v182_v21 = vld [vmem:[#allocation2 + $0x3e8] sm:$0xff]  ;;  %v181_v25 = vld [vmem:[#allocation2 + $0x3e0] sm:$0xff] }
  0x37   :  { %3756 = vmatpush3.msra.mxu1 %v93_v53  ;;  %3722 = vmatprep.subr.mxu0 %v76_v55  ;;  %v134_v22 = vld [vmem:[#allocation2 + $0x268] sm:$0xff]  ;;  %v133_v26 = vld [vmem:[#allocation2 + $0x260] sm:$0xff]  ;;  %v148_v28 = vld [vmem:[#allocation2 + $0x2d8] sm:$0xff] }
  0x38   :  { %3757 = vmatprep.subr.mxu1 %v108_v56  ;;  %3723 = vmatpush3.msra.mxu0 %v60_v58  ;;  %v166_v23 = vld [vmem:[#allocation2 + $0x368] sm:$0xff]  ;;  %v165_v27 = vld [vmem:[#allocation2 + $0x360] sm:$0xff]  ;;  %v180_v29 = vld [vmem:[#allocation2 + $0x3d8] sm:$0xff] }
  0x39   :  { %3758 = vmatpush3.msra.mxu1 %v92_v59  ;;  %3724 = vmatprep.subr.mxu0 %v75_v60  ;;  %v132_v30 = vld [vmem:[#allocation2 + $0x258] sm:$0xff]  ;;  %v147_v32 = vld [vmem:[#allocation2 + $0x2d0] sm:$0xff]  ;;  %v146_v36 = vld [vmem:[#allocation2 + $0x2c8] sm:$0xff] }
  0x3a   :  { %3759 = vmatprep.subr.mxu1 %v107_v61  ;;  %3725 = vmatpush3.msra.mxu0 %v59_v63  ;;  %v164_v31 = vld [vmem:[#allocation2 + $0x358] sm:$0xff]  ;;  %v179_v33 = vld [vmem:[#allocation2 + $0x3d0] sm:$0xff]  ;;  %v178_v37 = vld [vmem:[#allocation2 + $0x3c8] sm:$0xff] }
  0x3b   :  { %3760 = vmatpush3.msra.mxu1 %v91_v0  ;;  %3726 = vmatprep.subr.mxu0 %v74_v1  ;;  %v131_v34 = vld [vmem:[#allocation2 + $0x250] sm:$0xff]  ;;  %v130_v38 = vld [vmem:[#allocation2 + $0x248] sm:$0xff]  ;;  %v145_v40 = vld [vmem:[#allocation2 + $0x2c0] sm:$0xff] }
  0x3c   :  { %3761 = vmatprep.subr.mxu1 %v106_v2  ;;  %3727 = vmatpush3.msra.mxu0 %v58_v4  ;;  %v163_v35 = vld [vmem:[#allocation2 + $0x350] sm:$0xff]  ;;  %v162_v39 = vld [vmem:[#allocation2 + $0x348] sm:$0xff]  ;;  %v177_v41 = vld [vmem:[#allocation2 + $0x3c0] sm:$0xff] }
  0x3d   :  { %3762 = vmatpush3.msra.mxu1 %v90_v5  ;;  %3728 = vmatprep.subr.mxu0 %v73_v6  ;;  %v129_v42 = vld [vmem:[#allocation2 + $0x240] sm:$0xff]  ;;  %v144_v44 = vld [vmem:[#allocation2 + $0x2b8] sm:$0xff]  ;;  %v143_v48 = vld [vmem:[#allocation2 + $0x2b0] sm:$0xff] }
  0x3e   :  { %3763 = vmatprep.subr.mxu1 %v105_v7  ;;  %3729 = vmatpush3.msra.mxu0 %v57_v9  ;;  %v161_v43 = vld [vmem:[#allocation2 + $0x340] sm:$0xff]  ;;  %v176_v45 = vld [vmem:[#allocation2 + $0x3b8] sm:$0xff]  ;;  %v175_v49 = vld [vmem:[#allocation2 + $0x3b0] sm:$0xff] }
  0x3f   :  { %1504 = vmatprep.mubr.f32.mxu0 %v1119_v8  ;;  %3764 = vmatpush3.msra.mxu1 %v89_v10  ;;  %v128_v46 = vld [vmem:[#allocation2 + $0x238] sm:$0xff]  ;;  %v127_v50 = vld [vmem:[#allocation2 + $0x230] sm:$0xff]  ;;  %v142_v53 = vld [vmem:[#allocation2 + $0x2a8] sm:$0xff] }
  0x40   :  { %1505 = vmatmul.mubr.f32.vlgmr.msra.gmra.mxu0 %v1111_v62  ;;  %1574 = vmatprep.mubr.f32.mxu1 %v1120_v11  ;;  %v160_v47 = vld [vmem:[#allocation2 + $0x338] sm:$0xff]  ;;  %v159_v52 = vld [vmem:[#allocation2 + $0x330] sm:$0xff]  ;;  %v174_v54 = vld [vmem:[#allocation2 + $0x3a8] sm:$0xff] }
  0x41   :  { %3768 = vmatprep.subr.mxu0 %v152_v12  ;;  %3803 = vmatprep.subr.mxu1 %v184_v13  ;;  %v126_v55 = vld [vmem:[#allocation2 + $0x228] sm:$0xff]  ;;  %v141_v58 = vld [vmem:[#allocation2 + $0x2a0] sm:$0xff]  ;;  %v140_v62 = vld [vmem:[#allocation2 + $0x298] sm:$0xff] }
  0x42   :  { %1575 = vmatmul.mubr.f32.vlgmr.msra.gmra.mxu1 %v1118_v3  ;;  %3769 = vmatpush3.msra.mxu0 %v136_v14  ;;  %v158_v56 = vld [vmem:[#allocation2 + $0x328] sm:$0xff]  ;;  %v173_v59 = vld [vmem:[#allocation2 + $0x3a0] sm:$0xff]  ;;  %v172_v63 = vld [vmem:[#allocation2 + $0x398] sm:$0xff] }
  0x43   :  { %3804 = vmatpush3.msra.mxu1 %v168_v15  ;;  %3770 = vmatprep.subr.mxu0 %v151_v16  ;;  %v42_v57 = vld [vmem:[%s5023_s0 + $0x8] sm:$0xff]  ;;  %v125_v60 = vld [vmem:[#allocation2 + $0x220] sm:$0xff]  ;;  %v124_v1 = vld [vmem:[#allocation2 + $0x218] sm:$0xff] }
  0x44   :  { %3805 = vmatprep.subr.mxu1 %v183_v17  ;;  %3771 = vmatpush3.msra.mxu0 %v135_v18  ;;  %v157_v61 = vld [vmem:[#allocation2 + $0x320] sm:$0xff]  ;;  %v1121_v0 = vcombine.high %v42_v57, %v42_v57  ;;  %v156_v2 = vld [vmem:[#allocation2 + $0x318] sm:$0xff]  ;;  %v139_v3 = vld [vmem:[#allocation2 + $0x290] sm:$0xff]  ;;  %v1128_v5 = vrot.slane %v42_v57, %v4938_v51 }
  0x45   :  { %3806 = vmatpush3.msra.mxu1 %v167_v19  ;;  %3772 = vmatprep.subr.mxu0 %v150_v20  ;;  %v171_v4 = vld [vmem:[#allocation2 + $0x390] sm:$0xff]  ;;  %v138_v8 = vld [vmem:[#allocation2 + $0x288] sm:$0xff]  ;;  %v137_v13 = vld [vmem:[#allocation2 + $0x280] sm:$0xff] }
  0x46   :  { %3807 = vmatprep.subr.mxu1 %v182_v21  ;;  %3773 = vmatpush3.msra.mxu0 %v134_v22  ;;  %v123_v6 = vld [vmem:[#allocation2 + $0x210] sm:$0xff]  ;;  %v170_v9 = vld [vmem:[#allocation2 + $0x388] sm:$0xff]  ;;  %v1135_v10 = vrot.slane %v1121_v0, %v4938_v51  ;;  %v169_v14 = vld [vmem:[#allocation2 + $0x380] sm:$0xff]  ;;  %v1136_v15 = vcombine.high %v1128_v5, %v1128_v5 }
  0x47   :  { %3808 = vmatpush3.msra.mxu1 %v166_v23  ;;  %3774 = vmatprep.subr.mxu0 %v149_v24  ;;  %v155_v7 = vld [vmem:[#allocation2 + $0x310] sm:$0xff]  ;;  %v122_v11 = vld [vmem:[#allocation2 + $0x208] sm:$0xff]  ;;  %v121_v16 = vld [vmem:[#allocation2 + $0x200] sm:$0xff] }
  0x48   :  { %3809 = vmatprep.subr.mxu1 %v181_v25  ;;  %3775 = vmatpush3.msra.mxu0 %v133_v26  ;;  %v154_v12 = vld [vmem:[#allocation2 + $0x308] sm:$0xff]  ;;  %v153_v17 = vld [vmem:[#allocation2 + $0x300] sm:$0xff]  ;;  %v1137_v18 = vcombine.high %v1135_v10, %v1135_v10  ;;  %v216_v19 = vld [vmem:[#allocation2 + $0x4f8] sm:$0xff] }
  0x49   :  { %3810 = vmatpush3.msra.mxu1 %v165_v27  ;;  %3776 = vmatprep.subr.mxu0 %v148_v28  ;;  %v248_v20 = vld [vmem:[#allocation2 + $0x5f8] sm:$0xff]  ;;  %v215_v23 = vld [vmem:[#allocation2 + $0x4f0] sm:$0xff]  ;;  %v214_v27 = vld [vmem:[#allocation2 + $0x4e8] sm:$0xff] }
  0x4a   :  { %3811 = vmatprep.subr.mxu1 %v180_v29  ;;  %3777 = vmatpush3.msra.mxu0 %v132_v30  ;;  %v200_v21 = vld [vmem:[#allocation2 + $0x478] sm:$0xff]  ;;  %v247_v24 = vld [vmem:[#allocation2 + $0x5f0] sm:$0xff]  ;;  %v246_v28 = vld [vmem:[#allocation2 + $0x5e8] sm:$0xff] }
  0x4b   :  { %3812 = vmatpush3.msra.mxu1 %v164_v31  ;;  %3778 = vmatprep.subr.mxu0 %v147_v32  ;;  %v232_v22 = vld [vmem:[#allocation2 + $0x578] sm:$0xff]  ;;  %v199_v25 = vld [vmem:[#allocation2 + $0x470] sm:$0xff]  ;;  %v198_v29 = vld [vmem:[#allocation2 + $0x468] sm:$0xff] }
  0x4c   :  { %3813 = vmatprep.subr.mxu1 %v179_v33  ;;  %3779 = vmatpush3.msra.mxu0 %v131_v34  ;;  %v231_v26 = vld [vmem:[#allocation2 + $0x570] sm:$0xff]  ;;  %v230_v30 = vld [vmem:[#allocation2 + $0x568] sm:$0xff]  ;;  %v213_v31 = vld [vmem:[#allocation2 + $0x4e0] sm:$0xff] }
  0x4d   :  { %3814 = vmatpush3.msra.mxu1 %v163_v35  ;;  %3780 = vmatprep.subr.mxu0 %v146_v36  ;;  %v245_v32 = vld [vmem:[#allocation2 + $0x5e0] sm:$0xff]  ;;  %v212_v35 = vld [vmem:[#allocation2 + $0x4d8] sm:$0xff]  ;;  %v239_v57 = vld [vmem:[#allocation2 + $0x5b0] sm:$0xff] }
  0x4e   :  { %3815 = vmatprep.subr.mxu1 %v178_v37  ;;  %3781 = vmatpush3.msra.mxu0 %v130_v38  ;;  %v197_v33 = vld [vmem:[#allocation2 + $0x460] sm:$0xff]  ;;  %v244_v36 = vld [vmem:[#allocation2 + $0x5d8] sm:$0xff]  ;;  %v43_v0 = vld [vmem:[%s5023_s0 + $0x10] sm:$0xff] }
  0x4f   :  { %3816 = vmatpush3.msra.mxu1 %v162_v39  ;;  %3782 = vmatprep.subr.mxu0 %v145_v40  ;;  %v229_v34 = vld [vmem:[#allocation2 + $0x560] sm:$0xff]  ;;  %v196_v37 = vld [vmem:[#allocation2 + $0x458] sm:$0xff]  ;;  %v211_v39 = vld [vmem:[#allocation2 + $0x4d0] sm:$0xff] }
  0x50   :  { %3817 = vmatprep.subr.mxu1 %v177_v41  ;;  %3783 = vmatpush3.msra.mxu0 %v129_v42  ;;  %v228_v38 = vld [vmem:[#allocation2 + $0x558] sm:$0xff]  ;;  %v243_v40 = vld [vmem:[#allocation2 + $0x5d0] sm:$0xff] }
  0x51   :  { %3818 = vmatpush3.msra.mxu1 %v161_v43  ;;  %3784 = vmatprep.subr.mxu0 %v144_v44  ;;  %v195_v41 = vld [vmem:[#allocation2 + $0x450] sm:$0xff]  ;;  %v210_v43 = vld [vmem:[#allocation2 + $0x4c8] sm:$0xff] }
  0x52   :  { %3819 = vmatprep.subr.mxu1 %v176_v45  ;;  %3785 = vmatpush3.msra.mxu0 %v128_v46  ;;  %v227_v42 = vld [vmem:[#allocation2 + $0x550] sm:$0xff]  ;;  %v242_v44 = vld [vmem:[#allocation2 + $0x5c8] sm:$0xff] }
  0x53   :  { %3820 = vmatpush3.msra.mxu1 %v160_v47  ;;  %3786 = vmatprep.subr.mxu0 %v143_v48  ;;  %v194_v45 = vld [vmem:[#allocation2 + $0x448] sm:$0xff]  ;;  %v209_v47 = vld [vmem:[#allocation2 + $0x4c0] sm:$0xff] }
  0x54   :  { %3821 = vmatprep.subr.mxu1 %v175_v49  ;;  %3787 = vmatpush3.msra.mxu0 %v127_v50  ;;  %v226_v46 = vld [vmem:[#allocation2 + $0x548] sm:$0xff]  ;;  %v241_v48 = vld [vmem:[#allocation2 + $0x5c0] sm:$0xff] }
  0x55   :  { %3822 = vmatpush3.msra.mxu1 %v159_v52  ;;  %3788 = vmatprep.subr.mxu0 %v142_v53  ;;  %v193_v49 = vld [vmem:[#allocation2 + $0x440] sm:$0xff]  ;;  %v208_v52 = vld [vmem:[#allocation2 + $0x4b8] sm:$0xff] }
  0x56   :  { %3823 = vmatprep.subr.mxu1 %v174_v54  ;;  %3789 = vmatpush3.msra.mxu0 %v126_v55  ;;  %v225_v50 = vld [vmem:[#allocation2 + $0x540] sm:$0xff]  ;;  %v240_v53 = vld [vmem:[#allocation2 + $0x5b8] sm:$0xff] }
  0x57   :  { %3824 = vmatpush3.msra.mxu1 %v158_v56  ;;  %3790 = vmatprep.subr.mxu0 %v141_v58  ;;  %v192_v54 = vld [vmem:[#allocation2 + $0x438] sm:$0xff]  ;;  %v207_v56 = vld [vmem:[#allocation2 + $0x4b0] sm:$0xff] }
  0x58   :  { %3825 = vmatprep.subr.mxu1 %v173_v59  ;;  %3791 = vmatpush3.msra.mxu0 %v125_v60  ;;  %v224_v55 = vld [vmem:[#allocation2 + $0x538] sm:$0xff]  ;;  %v191_v58 = vld [vmem:[#allocation2 + $0x430] sm:$0xff]  ;;  %v206_v60 = vld [vmem:[#allocation2 + $0x4a8] sm:$0xff] }
  0x59   :  { %3826 = vmatpush3.msra.mxu1 %v157_v61  ;;  %3792 = vmatprep.subr.mxu0 %v140_v62  ;;  %v223_v59 = vld [vmem:[#allocation2 + $0x530] sm:$0xff]  ;;  %v238_v61 = vld [vmem:[#allocation2 + $0x5a8] sm:$0xff] }
  0x5a   :  { %3827 = vmatprep.subr.mxu1 %v172_v63  ;;  %3793 = vmatpush3.msra.mxu0 %v124_v1  ;;  %v190_v62 = vld [vmem:[#allocation2 + $0x428] sm:$0xff]  ;;  %v205_v1 = vld [vmem:[#allocation2 + $0x4a0] sm:$0xff] }
  0x5b   :  { %3828 = vmatpush3.msra.mxu1 %v156_v2  ;;  %3794 = vmatprep.subr.mxu0 %v139_v3  ;;  %v222_v63 = vld [vmem:[#allocation2 + $0x528] sm:$0xff]  ;;  %v237_v2 = vld [vmem:[#allocation2 + $0x5a0] sm:$0xff] }
  0x5c   :  { %3829 = vmatprep.subr.mxu1 %v171_v4  ;;  %3795 = vmatpush3.msra.mxu0 %v123_v6  ;;  %v189_v3 = vld [vmem:[#allocation2 + $0x420] sm:$0xff]  ;;  %v236_v6 = vld [vmem:[#allocation2 + $0x598] sm:$0xff] }
  0x5d   :  { %3830 = vmatpush3.msra.mxu1 %v155_v7  ;;  %3796 = vmatprep.subr.mxu0 %v138_v8  ;;  %v221_v4 = vld [vmem:[#allocation2 + $0x520] sm:$0xff]  ;;  %v1138_v7 = vcombine.high %v43_v0, %v43_v0  ;;  %v188_v8 = vld [vmem:[#allocation2 + $0x418] sm:$0xff] }
  0x5e   :  { %3831 = vmatprep.subr.mxu1 %v170_v9  ;;  %3797 = vmatpush3.msra.mxu0 %v122_v11  ;;  %v220_v9 = vld [vmem:[#allocation2 + $0x518] sm:$0xff]  ;;  %v235_v11 = vld [vmem:[#allocation2 + $0x590] sm:$0xff] }
  0x5f   :  { %3832 = vmatpush3.msra.mxu1 %v154_v12  ;;  %3798 = vmatprep.subr.mxu0 %v137_v13  ;;  %v1145_v12 = vrot.slane %v43_v0, %v4938_v51  ;;  %v187_v13 = vld [vmem:[#allocation2 + $0x410] sm:$0xff] }
  0x60   :  { %3833 = vmatprep.subr.mxu1 %v169_v14  ;;  %3799 = vmatpush3.msra.mxu0 %v121_v16  ;;  %v219_v14 = vld [vmem:[#allocation2 + $0x510] sm:$0xff]  ;;  %v234_v16 = vld [vmem:[#allocation2 + $0x588] sm:$0xff] }
  0x61   :  { %1644 = vmatprep.mubr.f32.mxu0 %v1136_v15  ;;  %3834 = vmatpush3.msra.mxu1 %v153_v17  ;;  %v202_v15 = vld [vmem:[#allocation2 + $0x488] sm:$0xff]  ;;  %v1152_v17 = vrot.slane %v1138_v7, %v4938_v51  ;;  %v303_v0 = vld [vmem:[#allocation2 + $0x7b0] sm:$0xff]  ;;  %v44_v7 = vld [vmem:[%s5023_s0 + $0x18] sm:$0xff] }
  0x62   :  { %1645 = vmatmul.mubr.f32.vlgmr.msra.gmra.mxu0 %v1128_v5  ;;  %1714 = vmatprep.mubr.f32.mxu1 %v1137_v18  ;;  %v204_v5 = vld [vmem:[#allocation2 + $0x498] sm:$0xff]  ;;  %v186_v18 = vld [vmem:[#allocation2 + $0x408] sm:$0xff] }
  0x63   :  { %3838 = vmatprep.subr.mxu0 %v216_v19  ;;  %3873 = vmatprep.subr.mxu1 %v248_v20  ;;  %v218_v19 = vld [vmem:[#allocation2 + $0x508] sm:$0xff]  ;;  %v201_v20 = vld [vmem:[#allocation2 + $0x480] sm:$0xff] }
  0x64   :  { %1715 = vmatmul.mubr.f32.vlgmr.msra.gmra.mxu1 %v1135_v10  ;;  %3839 = vmatpush3.msra.mxu0 %v200_v21  ;;  %v203_v10 = vld [vmem:[#allocation2 + $0x490] sm:$0xff]  ;;  %v233_v21 = vld [vmem:[#allocation2 + $0x580] sm:$0xff] }
  0x65   :  { %3874 = vmatpush3.msra.mxu1 %v232_v22  ;;  %3840 = vmatprep.subr.mxu0 %v215_v23  ;;  %v1153_v22 = vcombine.high %v1145_v12, %v1145_v12  ;;  %v185_v23 = vld [vmem:[#allocation2 + $0x400] sm:$0xff] }
  0x66   :  { %3875 = vmatprep.subr.mxu1 %v247_v24  ;;  %3841 = vmatpush3.msra.mxu0 %v199_v25  ;;  %v217_v24 = vld [vmem:[#allocation2 + $0x500] sm:$0xff]  ;;  %v1154_v25 = vcombine.high %v1152_v17, %v1152_v17 }
  0x67   :  { %3876 = vmatpush3.msra.mxu1 %v231_v26  ;;  %3842 = vmatprep.subr.mxu0 %v214_v27  ;;  %v280_v26 = vld [vmem:[#allocation2 + $0x6f8] sm:$0xff] }
  0x68   :  { %3877 = vmatprep.subr.mxu1 %v246_v28  ;;  %3843 = vmatpush3.msra.mxu0 %v198_v29  ;;  %v312_v27 = vld [vmem:[#allocation2 + $0x7f8] sm:$0xff] }
  0x69   :  { %3878 = vmatpush3.msra.mxu1 %v230_v30  ;;  %3844 = vmatprep.subr.mxu0 %v213_v31  ;;  %v264_v28 = vld [vmem:[#allocation2 + $0x678] sm:$0xff]  ;;  %v279_v30 = vld [vmem:[#allocation2 + $0x6f0] sm:$0xff] }
  0x6a   :  { %3879 = vmatprep.subr.mxu1 %v245_v32  ;;  %3845 = vmatpush3.msra.mxu0 %v197_v33  ;;  %v296_v29 = vld [vmem:[#allocation2 + $0x778] sm:$0xff]  ;;  %v311_v31 = vld [vmem:[#allocation2 + $0x7f0] sm:$0xff] }
  0x6b   :  { %3880 = vmatpush3.msra.mxu1 %v229_v34  ;;  %3846 = vmatprep.subr.mxu0 %v212_v35  ;;  %v263_v32 = vld [vmem:[#allocation2 + $0x670] sm:$0xff]  ;;  %v278_v34 = vld [vmem:[#allocation2 + $0x6e8] sm:$0xff] }
  0x6c   :  { %3881 = vmatprep.subr.mxu1 %v244_v36  ;;  %3847 = vmatpush3.msra.mxu0 %v196_v37  ;;  %v295_v33 = vld [vmem:[#allocation2 + $0x770] sm:$0xff]  ;;  %v310_v35 = vld [vmem:[#allocation2 + $0x7e8] sm:$0xff] }
  0x6d   :  { %3882 = vmatpush3.msra.mxu1 %v228_v38  ;;  %3848 = vmatprep.subr.mxu0 %v211_v39  ;;  %v262_v36 = vld [vmem:[#allocation2 + $0x668] sm:$0xff]  ;;  %v277_v38 = vld [vmem:[#allocation2 + $0x6e0] sm:$0xff] }
  0x6e   :  { %3883 = vmatprep.subr.mxu1 %v243_v40  ;;  %3849 = vmatpush3.msra.mxu0 %v195_v41  ;;  %v294_v37 = vld [vmem:[#allocation2 + $0x768] sm:$0xff]  ;;  %v309_v39 = vld [vmem:[#allocation2 + $0x7e0] sm:$0xff] }
  0x6f   :  { %3884 = vmatpush3.msra.mxu1 %v227_v42  ;;  %3850 = vmatprep.subr.mxu0 %v210_v43  ;;  %v261_v40 = vld [vmem:[#allocation2 + $0x660] sm:$0xff]  ;;  %v276_v42 = vld [vmem:[#allocation2 + $0x6d8] sm:$0xff] }
  0x70   :  { %3885 = vmatprep.subr.mxu1 %v242_v44  ;;  %3851 = vmatpush3.msra.mxu0 %v194_v45  ;;  %v293_v41 = vld [vmem:[#allocation2 + $0x760] sm:$0xff]  ;;  %v308_v43 = vld [vmem:[#allocation2 + $0x7d8] sm:$0xff] }
  0x71   :  { %3886 = vmatpush3.msra.mxu1 %v226_v46  ;;  %3852 = vmatprep.subr.mxu0 %v209_v47  ;;  %v260_v44 = vld [vmem:[#allocation2 + $0x658] sm:$0xff]  ;;  %v275_v46 = vld [vmem:[#allocation2 + $0x6d0] sm:$0xff] }
  0x72   :  { %3887 = vmatprep.subr.mxu1 %v241_v48  ;;  %3853 = vmatpush3.msra.mxu0 %v193_v49  ;;  %v292_v45 = vld [vmem:[#allocation2 + $0x758] sm:$0xff]  ;;  %v307_v47 = vld [vmem:[#allocation2 + $0x7d0] sm:$0xff] }
  0x73   :  { %3888 = vmatpush3.msra.mxu1 %v225_v50  ;;  %3854 = vmatprep.subr.mxu0 %v208_v52  ;;  %v259_v48 = vld [vmem:[#allocation2 + $0x650] sm:$0xff]  ;;  %v274_v50 = vld [vmem:[#allocation2 + $0x6c8] sm:$0xff] }
  0x74   :  { %3889 = vmatprep.subr.mxu1 %v240_v53  ;;  %3855 = vmatpush3.msra.mxu0 %v192_v54  ;;  %v291_v49 = vld [vmem:[#allocation2 + $0x750] sm:$0xff]  ;;  %v306_v52 = vld [vmem:[#allocation2 + $0x7c8] sm:$0xff] }
  0x75   :  { %3890 = vmatpush3.msra.mxu1 %v224_v55  ;;  %3856 = vmatprep.subr.mxu0 %v207_v56  ;;  %v258_v53 = vld [vmem:[#allocation2 + $0x648] sm:$0xff]  ;;  %v273_v55 = vld [vmem:[#allocation2 + $0x6c0] sm:$0xff] }
  0x76   :  { %3891 = vmatprep.subr.mxu1 %v239_v57  ;;  %3857 = vmatpush3.msra.mxu0 %v191_v58  ;;  %v290_v54 = vld [vmem:[#allocation2 + $0x748] sm:$0xff]  ;;  %v305_v56 = vld [vmem:[#allocation2 + $0x7c0] sm:$0xff] }
  0x77   :  { %3892 = vmatpush3.msra.mxu1 %v223_v59  ;;  %3858 = vmatprep.subr.mxu0 %v206_v60  ;;  %v257_v57 = vld [vmem:[#allocation2 + $0x640] sm:$0xff]  ;;  %v272_v59 = vld [vmem:[#allocation2 + $0x6b8] sm:$0xff] }
  0x78   :  { %3893 = vmatprep.subr.mxu1 %v238_v61  ;;  %3859 = vmatpush3.msra.mxu0 %v190_v62  ;;  %v289_v58 = vld [vmem:[#allocation2 + $0x740] sm:$0xff]  ;;  %v304_v60 = vld [vmem:[#allocation2 + $0x7b8] sm:$0xff] }
  0x79   :  { %3894 = vmatpush3.msra.mxu1 %v222_v63  ;;  %3860 = vmatprep.subr.mxu0 %v205_v1  ;;  %v256_v61 = vld [vmem:[#allocation2 + $0x638] sm:$0xff]  ;;  %v271_v63 = vld [vmem:[#allocation2 + $0x6b0] sm:$0xff] }
  0x7a   :  { %3895 = vmatprep.subr.mxu1 %v237_v2  ;;  %3861 = vmatpush3.msra.mxu0 %v189_v3  ;;  %v288_v62 = vld [vmem:[#allocation2 + $0x738] sm:$0xff]  ;;  %v255_v1 = vld [vmem:[#allocation2 + $0x630] sm:$0xff]  ;;  %v270_v3 = vld [vmem:[#allocation2 + $0x6a8] sm:$0xff] }
  0x7b   :  { %3896 = vmatpush3.msra.mxu1 %v221_v4  ;;  %3862 = vmatprep.subr.mxu0 %v204_v5  ;;  %v287_v2 = vld [vmem:[#allocation2 + $0x730] sm:$0xff]  ;;  %v302_v4 = vld [vmem:[#allocation2 + $0x7a8] sm:$0xff] }
  0x7c   :  { %3897 = vmatprep.subr.mxu1 %v236_v6  ;;  %3863 = vmatpush3.msra.mxu0 %v188_v8  ;;  %v254_v5 = vld [vmem:[#allocation2 + $0x628] sm:$0xff]  ;;  %v269_v8 = vld [vmem:[#allocation2 + $0x6a0] sm:$0xff] }
  0x7d   :  { %3898 = vmatpush3.msra.mxu1 %v220_v9  ;;  %3864 = vmatprep.subr.mxu0 %v203_v10  ;;  %v286_v6 = vld [vmem:[#allocation2 + $0x728] sm:$0xff]  ;;  %v301_v9 = vld [vmem:[#allocation2 + $0x7a0] sm:$0xff] }
  0x7e   :  { %3899 = vmatprep.subr.mxu1 %v235_v11  ;;  %3865 = vmatpush3.msra.mxu0 %v187_v13  ;;  %v253_v10 = vld [vmem:[#allocation2 + $0x620] sm:$0xff]  ;;  %v300_v13 = vld [vmem:[#allocation2 + $0x798] sm:$0xff] }
  0x7f   :  { %3900 = vmatpush3.msra.mxu1 %v219_v14  ;;  %3866 = vmatprep.subr.mxu0 %v202_v15  ;;  %v285_v11 = vld [vmem:[#allocation2 + $0x720] sm:$0xff]  ;;  %v1155_v14 = vcombine.high %v44_v7, %v44_v7  ;;  %v252_v15 = vld [vmem:[#allocation2 + $0x618] sm:$0xff] }
  0x80   :  { %3901 = vmatprep.subr.mxu1 %v234_v16  ;;  %3867 = vmatpush3.msra.mxu0 %v186_v18  ;;  %v284_v16 = vld [vmem:[#allocation2 + $0x718] sm:$0xff]  ;;  %v299_v18 = vld [vmem:[#allocation2 + $0x790] sm:$0xff] }
  0x81   :  { %3902 = vmatpush3.msra.mxu1 %v218_v19  ;;  %3868 = vmatprep.subr.mxu0 %v201_v20  ;;  %v1162_v19 = vrot.slane %v44_v7, %v4938_v51  ;;  %v251_v20 = vld [vmem:[#allocation2 + $0x610] sm:$0xff] }
  0x82   :  { %3903 = vmatprep.subr.mxu1 %v233_v21  ;;  %3869 = vmatpush3.msra.mxu0 %v185_v23  ;;  %v283_v21 = vld [vmem:[#allocation2 + $0x710] sm:$0xff]  ;;  %v298_v23 = vld [vmem:[#allocation2 + $0x788] sm:$0xff] }
  0x83   :  { %1784 = vmatprep.mubr.f32.mxu0 %v1153_v22  ;;  %3904 = vmatpush3.msra.mxu1 %v217_v24  ;;  %v266_v22 = vld [vmem:[#allocation2 + $0x688] sm:$0xff]  ;;  %v1169_v24 = vrot.slane %v1155_v14, %v4938_v51  ;;  %v367_v7 = vld [vmem:[#allocation2 + $0x9b0] sm:$0xff]  ;;  %v45_v14 = vld [vmem:[%s5023_s0 + $0x20] sm:$0xff] }
  0x84   :  { %1785 = vmatmul.mubr.f32.vlgmr.msra.gmra.mxu0 %v1145_v12  ;;  %1854 = vmatprep.mubr.f32.mxu1 %v1154_v25  ;;  %v268_v12 = vld [vmem:[#allocation2 + $0x698] sm:$0xff]  ;;  %v250_v25 = vld [vmem:[#allocation2 + $0x608] sm:$0xff] }
  0x85   :  { %3908 = vmatprep.subr.mxu0 %v280_v26  ;;  %3943 = vmatprep.subr.mxu1 %v312_v27  ;;  %v282_v26 = vld [vmem:[#allocation2 + $0x708] sm:$0xff]  ;;  %v265_v27 = vld [vmem:[#allocation2 + $0x680] sm:$0xff] }
  0x86   :  { %1855 = vmatmul.mubr.f32.vlgmr.msra.gmra.mxu1 %v1152_v17  ;;  %3909 = vmatpush3.msra.mxu0 %v264_v28  ;;  %v267_v17 = vld [vmem:[#allocation2 + $0x690] sm:$0xff]  ;;  %v297_v28 = vld [vmem:[#allocation2 + $0x780] sm:$0xff] }
  0x87   :  { %3944 = vmatpush3.msra.mxu1 %v296_v29  ;;  %3910 = vmatprep.subr.mxu0 %v279_v30  ;;  %v1170_v29 = vcombine.high %v1162_v19, %v1162_v19  ;;  %v249_v30 = vld [vmem:[#allocation2 + $0x600] sm:$0xff] }
  0x88   :  { %3945 = vmatprep.subr.mxu1 %v311_v31  ;;  %3911 = vmatpush3.msra.mxu0 %v263_v32  ;;  %v281_v31 = vld [vmem:[#allocation2 + $0x700] sm:$0xff]  ;;  %v1171_v32 = vcombine.high %v1169_v24, %v1169_v24 }
  0x89   :  { %3946 = vmatpush3.msra.mxu1 %v295_v33  ;;  %3912 = vmatprep.subr.mxu0 %v278_v34  ;;  %v344_v33 = vld [vmem:[#allocation2 + $0x8f8] sm:$0xff] }
  0x8a   :  { %3947 = vmatprep.subr.mxu1 %v310_v35  ;;  %3913 = vmatpush3.msra.mxu0 %v262_v36  ;;  %v376_v34 = vld [vmem:[#allocation2 + $0x9f8] sm:$0xff] }
  0x8b   :  { %3948 = vmatpush3.msra.mxu1 %v294_v37  ;;  %3914 = vmatprep.subr.mxu0 %v277_v38  ;;  %v328_v35 = vld [vmem:[#allocation2 + $0x878] sm:$0xff]  ;;  %v343_v37 = vld [vmem:[#allocation2 + $0x8f0] sm:$0xff] }
  0x8c   :  { %3949 = vmatprep.subr.mxu1 %v309_v39  ;;  %3915 = vmatpush3.msra.mxu0 %v261_v40  ;;  %v360_v36 = vld [vmem:[#allocation2 + $0x978] sm:$0xff]  ;;  %v375_v38 = vld [vmem:[#allocation2 + $0x9f0] sm:$0xff] }
  0x8d   :  { %3950 = vmatpush3.msra.mxu1 %v293_v41  ;;  %3916 = vmatprep.subr.mxu0 %v276_v42  ;;  %v327_v39 = vld [vmem:[#allocation2 + $0x870] sm:$0xff]  ;;  %v342_v41 = vld [vmem:[#allocation2 + $0x8e8] sm:$0xff] }
  0x8e   :  { %3951 = vmatprep.subr.mxu1 %v308_v43  ;;  %3917 = vmatpush3.msra.mxu0 %v260_v44  ;;  %v359_v40 = vld [vmem:[#allocation2 + $0x970] sm:$0xff]  ;;  %v374_v42 = vld [vmem:[#allocation2 + $0x9e8] sm:$0xff] }
  0x8f   :  { %3952 = vmatpush3.msra.mxu1 %v292_v45  ;;  %3918 = vmatprep.subr.mxu0 %v275_v46  ;;  %v326_v43 = vld [vmem:[#allocation2 + $0x868] sm:$0xff]  ;;  %v341_v45 = vld [vmem:[#allocation2 + $0x8e0] sm:$0xff] }
  0x90   :  { %3953 = vmatprep.subr.mxu1 %v307_v47  ;;  %3919 = vmatpush3.msra.mxu0 %v259_v48  ;;  %v358_v44 = vld [vmem:[#allocation2 + $0x968] sm:$0xff]  ;;  %v373_v46 = vld [vmem:[#allocation2 + $0x9e0] sm:$0xff] }
  0x91   :  { %3954 = vmatpush3.msra.mxu1 %v291_v49  ;;  %3920 = vmatprep.subr.mxu0 %v274_v50  ;;  %v325_v47 = vld [vmem:[#allocation2 + $0x860] sm:$0xff]  ;;  %v340_v49 = vld [vmem:[#allocation2 + $0x8d8] sm:$0xff] }
  0x92   :  { %3955 = vmatprep.subr.mxu1 %v306_v52  ;;  %3921 = vmatpush3.msra.mxu0 %v258_v53  ;;  %v357_v48 = vld [vmem:[#allocation2 + $0x960] sm:$0xff]  ;;  %v372_v50 = vld [vmem:[#allocation2 + $0x9d8] sm:$0xff] }
  0x93   :  { %3956 = vmatpush3.msra.mxu1 %v290_v54  ;;  %3922 = vmatprep.subr.mxu0 %v273_v55  ;;  %v324_v52 = vld [vmem:[#allocation2 + $0x858] sm:$0xff]  ;;  %v339_v54 = vld [vmem:[#allocation2 + $0x8d0] sm:$0xff] }
  0x94   :  { %3957 = vmatprep.subr.mxu1 %v305_v56  ;;  %3923 = vmatpush3.msra.mxu0 %v257_v57  ;;  %v356_v53 = vld [vmem:[#allocation2 + $0x958] sm:$0xff]  ;;  %v371_v55 = vld [vmem:[#allocation2 + $0x9d0] sm:$0xff] }
  0x95   :  { %3958 = vmatpush3.msra.mxu1 %v289_v58  ;;  %3924 = vmatprep.subr.mxu0 %v272_v59  ;;  %v323_v56 = vld [vmem:[#allocation2 + $0x850] sm:$0xff]  ;;  %v338_v58 = vld [vmem:[#allocation2 + $0x8c8] sm:$0xff] }
  0x96   :  { %3959 = vmatprep.subr.mxu1 %v304_v60  ;;  %3925 = vmatpush3.msra.mxu0 %v256_v61  ;;  %v355_v57 = vld [vmem:[#allocation2 + $0x950] sm:$0xff]  ;;  %v370_v59 = vld [vmem:[#allocation2 + $0x9c8] sm:$0xff] }
  0x97   :  { %3960 = vmatpush3.msra.mxu1 %v288_v62  ;;  %3926 = vmatprep.subr.mxu0 %v271_v63  ;;  %v322_v60 = vld [vmem:[#allocation2 + $0x848] sm:$0xff]  ;;  %v337_v62 = vld [vmem:[#allocation2 + $0x8c0] sm:$0xff] }
  0x98   :  { %3961 = vmatprep.subr.mxu1 %v303_v0  ;;  %3927 = vmatpush3.msra.mxu0 %v255_v1  ;;  %v354_v61 = vld [vmem:[#allocation2 + $0x948] sm:$0xff]  ;;  %v369_v63 = vld [vmem:[#allocation2 + $0x9c0] sm:$0xff] }
  0x99   :  { %3962 = vmatpush3.msra.mxu1 %v287_v2  ;;  %3928 = vmatprep.subr.mxu0 %v270_v3  ;;  %v321_v0 = vld [vmem:[#allocation2 + $0x840] sm:$0xff]  ;;  %v336_v2 = vld [vmem:[#allocation2 + $0x8b8] sm:$0xff] }
  0x9a   :  { %3963 = vmatprep.subr.mxu1 %v302_v4  ;;  %3929 = vmatpush3.msra.mxu0 %v254_v5  ;;  %v353_v1 = vld [vmem:[#allocation2 + $0x940] sm:$0xff]  ;;  %v368_v3 = vld [vmem:[#allocation2 + $0x9b8] sm:$0xff] }
  0x9b   :  { %3964 = vmatpush3.msra.mxu1 %v286_v6  ;;  %3930 = vmatprep.subr.mxu0 %v269_v8  ;;  %v320_v4 = vld [vmem:[#allocation2 + $0x838] sm:$0xff]  ;;  %v335_v6 = vld [vmem:[#allocation2 + $0x8b0] sm:$0xff] }
  0x9c   :  { %3965 = vmatprep.subr.mxu1 %v301_v9  ;;  %3931 = vmatpush3.msra.mxu0 %v253_v10  ;;  %v352_v5 = vld [vmem:[#allocation2 + $0x938] sm:$0xff]  ;;  %v319_v8 = vld [vmem:[#allocation2 + $0x830] sm:$0xff]  ;;  %v334_v10 = vld [vmem:[#allocation2 + $0x8a8] sm:$0xff] }
  0x9d   :  { %3966 = vmatpush3.msra.mxu1 %v285_v11  ;;  %3932 = vmatprep.subr.mxu0 %v268_v12  ;;  %v351_v9 = vld [vmem:[#allocation2 + $0x930] sm:$0xff]  ;;  %v366_v11 = vld [vmem:[#allocation2 + $0x9a8] sm:$0xff] }
  0x9e   :  { %3967 = vmatprep.subr.mxu1 %v300_v13  ;;  %3933 = vmatpush3.msra.mxu0 %v252_v15  ;;  %v318_v12 = vld [vmem:[#allocation2 + $0x828] sm:$0xff]  ;;  %v333_v15 = vld [vmem:[#allocation2 + $0x8a0] sm:$0xff] }
  0x9f   :  { %3968 = vmatpush3.msra.mxu1 %v284_v16  ;;  %3934 = vmatprep.subr.mxu0 %v267_v17  ;;  %v350_v13 = vld [vmem:[#allocation2 + $0x928] sm:$0xff]  ;;  %v365_v16 = vld [vmem:[#allocation2 + $0x9a0] sm:$0xff] }
  0xa0   :  { %3969 = vmatprep.subr.mxu1 %v299_v18  ;;  %3935 = vmatpush3.msra.mxu0 %v251_v20  ;;  %v317_v17 = vld [vmem:[#allocation2 + $0x820] sm:$0xff]  ;;  %v364_v20 = vld [vmem:[#allocation2 + $0x998] sm:$0xff] }
  0xa1   :  { %3970 = vmatpush3.msra.mxu1 %v283_v21  ;;  %3936 = vmatprep.subr.mxu0 %v266_v22  ;;  %v349_v18 = vld [vmem:[#allocation2 + $0x920] sm:$0xff]  ;;  %v1172_v21 = vcombine.high %v45_v14, %v45_v14  ;;  %v316_v22 = vld [vmem:[#allocation2 + $0x818] sm:$0xff] }
  0xa2   :  { %3971 = vmatprep.subr.mxu1 %v298_v23  ;;  %3937 = vmatpush3.msra.mxu0 %v250_v25  ;;  %v348_v23 = vld [vmem:[#allocation2 + $0x918] sm:$0xff]  ;;  %v363_v25 = vld [vmem:[#allocation2 + $0x990] sm:$0xff] }
  0xa3   :  { %3972 = vmatpush3.msra.mxu1 %v282_v26  ;;  %3938 = vmatprep.subr.mxu0 %v265_v27  ;;  %v1179_v26 = vrot.slane %v45_v14, %v4938_v51  ;;  %v315_v27 = vld [vmem:[#allocation2 + $0x810] sm:$0xff] }
  0xa4   :  { %3973 = vmatprep.subr.mxu1 %v297_v28  ;;  %3939 = vmatpush3.msra.mxu0 %v249_v30  ;;  %v347_v28 = vld [vmem:[#allocation2 + $0x910] sm:$0xff]  ;;  %v362_v30 = vld [vmem:[#allocation2 + $0x988] sm:$0xff] }
  0xa5   :  { %1924 = vmatprep.mubr.f32.mxu0 %v1170_v29  ;;  %3974 = vmatpush3.msra.mxu1 %v281_v31  ;;  %v330_v29 = vld [vmem:[#allocation2 + $0x888] sm:$0xff]  ;;  %v1186_v31 = vrot.slane %v1172_v21, %v4938_v51  ;;  %v431_v14 = vld [vmem:[#allocation2 + $0xbb0] sm:$0xff] }
  0xa6   :  { %1925 = vmatmul.mubr.f32.vlgmr.msra.gmra.mxu0 %v1162_v19  ;;  %1994 = vmatprep.mubr.f32.mxu1 %v1171_v32  ;;  %v332_v19 = vld [vmem:[#allocation2 + $0x898] sm:$0xff]  ;;  %v314_v32 = vld [vmem:[#allocation2 + $0x808] sm:$0xff] }
  0xa7   :  { %3978 = vmatprep.subr.mxu0 %v344_v33  ;;  %4013 = vmatprep.subr.mxu1 %v376_v34  ;;  %v346_v33 = vld [vmem:[#allocation2 + $0x908] sm:$0xff]  ;;  %v329_v34 = vld [vmem:[#allocation2 + $0x880] sm:$0xff] }
  0xa8   :  { %1995 = vmatmul.mubr.f32.vlgmr.msra.gmra.mxu1 %v1169_v24  ;;  %3979 = vmatpush3.msra.mxu0 %v328_v35  ;;  %v331_v24 = vld [vmem:[#allocation2 + $0x890] sm:$0xff]  ;;  %v361_v35 = vld [vmem:[#allocation2 + $0x980] sm:$0xff]  ;;  %v46_v21 = vld [vmem:[%s5023_s0 + $0x28] sm:$0xff] }
  0xa9   :  { %4014 = vmatpush3.msra.mxu1 %v360_v36  ;;  %3980 = vmatprep.subr.mxu0 %v343_v37  ;;  %v1187_v36 = vcombine.high %v1179_v26, %v1179_v26  ;;  %v313_v37 = vld [vmem:[#allocation2 + $0x800] sm:$0xff] }
  0xaa   :  { %4015 = vmatprep.subr.mxu1 %v375_v38  ;;  %3981 = vmatpush3.msra.mxu0 %v327_v39  ;;  %v345_v38 = vld [vmem:[#allocation2 + $0x900] sm:$0xff]  ;;  %v1188_v39 = vcombine.high %v1186_v31, %v1186_v31 }
  0xab   :  { %4016 = vmatpush3.msra.mxu1 %v359_v40  ;;  %3982 = vmatprep.subr.mxu0 %v342_v41  ;;  %v408_v40 = vld [vmem:[#allocation2 + $0xaf8] sm:$0xff] }
  0xac   :  { %4017 = vmatprep.subr.mxu1 %v374_v42  ;;  %3983 = vmatpush3.msra.mxu0 %v326_v43  ;;  %v440_v41 = vld [vmem:[#allocation2 + $0xbf8] sm:$0xff] }
  0xad   :  { %4018 = vmatpush3.msra.mxu1 %v358_v44  ;;  %3984 = vmatprep.subr.mxu0 %v341_v45  ;;  %v392_v42 = vld [vmem:[#allocation2 + $0xa78] sm:$0xff]  ;;  %v407_v44 = vld [vmem:[#allocation2 + $0xaf0] sm:$0xff] }
  0xae   :  { %4019 = vmatprep.subr.mxu1 %v373_v46  ;;  %3985 = vmatpush3.msra.mxu0 %v325_v47  ;;  %v424_v43 = vld [vmem:[#allocation2 + $0xb78] sm:$0xff]  ;;  %v439_v45 = vld [vmem:[#allocation2 + $0xbf0] sm:$0xff] }
  0xaf   :  { %4020 = vmatpush3.msra.mxu1 %v357_v48  ;;  %3986 = vmatprep.subr.mxu0 %v340_v49  ;;  %v391_v46 = vld [vmem:[#allocation2 + $0xa70] sm:$0xff]  ;;  %v406_v48 = vld [vmem:[#allocation2 + $0xae8] sm:$0xff] }
  0xb0   :  { %4021 = vmatprep.subr.mxu1 %v372_v50  ;;  %3987 = vmatpush3.msra.mxu0 %v324_v52  ;;  %v423_v47 = vld [vmem:[#allocation2 + $0xb70] sm:$0xff]  ;;  %v438_v49 = vld [vmem:[#allocation2 + $0xbe8] sm:$0xff] }
  0xb1   :  { %4022 = vmatpush3.msra.mxu1 %v356_v53  ;;  %3988 = vmatprep.subr.mxu0 %v339_v54  ;;  %v390_v50 = vld [vmem:[#allocation2 + $0xa68] sm:$0xff]  ;;  %v405_v53 = vld [vmem:[#allocation2 + $0xae0] sm:$0xff] }
  0xb2   :  { %4023 = vmatprep.subr.mxu1 %v371_v55  ;;  %3989 = vmatpush3.msra.mxu0 %v323_v56  ;;  %v422_v52 = vld [vmem:[#allocation2 + $0xb68] sm:$0xff]  ;;  %v437_v54 = vld [vmem:[#allocation2 + $0xbe0] sm:$0xff] }
  0xb3   :  { %4024 = vmatpush3.msra.mxu1 %v355_v57  ;;  %3990 = vmatprep.subr.mxu0 %v338_v58  ;;  %v389_v55 = vld [vmem:[#allocation2 + $0xa60] sm:$0xff]  ;;  %v404_v57 = vld [vmem:[#allocation2 + $0xad8] sm:$0xff] }
  0xb4   :  { %4025 = vmatprep.subr.mxu1 %v370_v59  ;;  %3991 = vmatpush3.msra.mxu0 %v322_v60  ;;  %v421_v56 = vld [vmem:[#allocation2 + $0xb60] sm:$0xff]  ;;  %v436_v58 = vld [vmem:[#allocation2 + $0xbd8] sm:$0xff] }
  0xb5   :  { %4026 = vmatpush3.msra.mxu1 %v354_v61  ;;  %3992 = vmatprep.subr.mxu0 %v337_v62  ;;  %v388_v59 = vld [vmem:[#allocation2 + $0xa58] sm:$0xff]  ;;  %v403_v61 = vld [vmem:[#allocation2 + $0xad0] sm:$0xff] }
  0xb6   :  { %4027 = vmatprep.subr.mxu1 %v369_v63  ;;  %3993 = vmatpush3.msra.mxu0 %v321_v0  ;;  %v420_v60 = vld [vmem:[#allocation2 + $0xb58] sm:$0xff]  ;;  %v435_v62 = vld [vmem:[#allocation2 + $0xbd0] sm:$0xff] }
  0xb7   :  { %4028 = vmatpush3.msra.mxu1 %v353_v1  ;;  %3994 = vmatprep.subr.mxu0 %v336_v2  ;;  %v387_v63 = vld [vmem:[#allocation2 + $0xa50] sm:$0xff]  ;;  %v402_v1 = vld [vmem:[#allocation2 + $0xac8] sm:$0xff] }
  0xb8   :  { %4029 = vmatprep.subr.mxu1 %v368_v3  ;;  %3995 = vmatpush3.msra.mxu0 %v320_v4  ;;  %v419_v0 = vld [vmem:[#allocation2 + $0xb50] sm:$0xff]  ;;  %v434_v2 = vld [vmem:[#allocation2 + $0xbc8] sm:$0xff] }
  0xb9   :  { %4030 = vmatpush3.msra.mxu1 %v352_v5  ;;  %3996 = vmatprep.subr.mxu0 %v335_v6  ;;  %v386_v3 = vld [vmem:[#allocation2 + $0xa48] sm:$0xff]  ;;  %v401_v5 = vld [vmem:[#allocation2 + $0xac0] sm:$0xff] }
  0xba   :  { %4031 = vmatprep.subr.mxu1 %v367_v7  ;;  %3997 = vmatpush3.msra.mxu0 %v319_v8  ;;  %v418_v4 = vld [vmem:[#allocation2 + $0xb48] sm:$0xff]  ;;  %v433_v6 = vld [vmem:[#allocation2 + $0xbc0] sm:$0xff] }
  0xbb   :  { %4032 = vmatpush3.msra.mxu1 %v351_v9  ;;  %3998 = vmatprep.subr.mxu0 %v334_v10  ;;  %v385_v7 = vld [vmem:[#allocation2 + $0xa40] sm:$0xff]  ;;  %v400_v9 = vld [vmem:[#allocation2 + $0xab8] sm:$0xff] }
  0xbc   :  { %4033 = vmatprep.subr.mxu1 %v366_v11  ;;  %3999 = vmatpush3.msra.mxu0 %v318_v12  ;;  %v417_v8 = vld [vmem:[#allocation2 + $0xb40] sm:$0xff]  ;;  %v432_v10 = vld [vmem:[#allocation2 + $0xbb8] sm:$0xff] }
  0xbd   :  { %4034 = vmatpush3.msra.mxu1 %v350_v13  ;;  %4000 = vmatprep.subr.mxu0 %v333_v15  ;;  %v384_v11 = vld [vmem:[#allocation2 + $0xa38] sm:$0xff]  ;;  %v399_v13 = vld [vmem:[#allocation2 + $0xab0] sm:$0xff] }
  0xbe   :  { %4035 = vmatprep.subr.mxu1 %v365_v16  ;;  %4001 = vmatpush3.msra.mxu0 %v317_v17  ;;  %v416_v12 = vld [vmem:[#allocation2 + $0xb38] sm:$0xff]  ;;  %v383_v15 = vld [vmem:[#allocation2 + $0xa30] sm:$0xff]  ;;  %v398_v17 = vld [vmem:[#allocation2 + $0xaa8] sm:$0xff] }
  0xbf   :  { %4036 = vmatpush3.msra.mxu1 %v349_v18  ;;  %4002 = vmatprep.subr.mxu0 %v332_v19  ;;  %v415_v16 = vld [vmem:[#allocation2 + $0xb30] sm:$0xff]  ;;  %v430_v18 = vld [vmem:[#allocation2 + $0xba8] sm:$0xff] }
  0xc0   :  { %4037 = vmatprep.subr.mxu1 %v364_v20  ;;  %4003 = vmatpush3.msra.mxu0 %v316_v22  ;;  %v382_v19 = vld [vmem:[#allocation2 + $0xa28] sm:$0xff]  ;;  %v397_v22 = vld [vmem:[#allocation2 + $0xaa0] sm:$0xff] }
  0xc1   :  { %4038 = vmatpush3.msra.mxu1 %v348_v23  ;;  %4004 = vmatprep.subr.mxu0 %v331_v24  ;;  %v414_v20 = vld [vmem:[#allocation2 + $0xb28] sm:$0xff]  ;;  %v429_v23 = vld [vmem:[#allocation2 + $0xba0] sm:$0xff] }
  0xc2   :  { %4039 = vmatprep.subr.mxu1 %v363_v25  ;;  %4005 = vmatpush3.msra.mxu0 %v315_v27  ;;  %v381_v24 = vld [vmem:[#allocation2 + $0xa20] sm:$0xff]  ;;  %v428_v27 = vld [vmem:[#allocation2 + $0xb98] sm:$0xff] }
  0xc3   :  { %4040 = vmatpush3.msra.mxu1 %v347_v28  ;;  %4006 = vmatprep.subr.mxu0 %v330_v29  ;;  %v413_v25 = vld [vmem:[#allocation2 + $0xb20] sm:$0xff]  ;;  %v1189_v28 = vcombine.high %v46_v21, %v46_v21  ;;  %v380_v29 = vld [vmem:[#allocation2 + $0xa18] sm:$0xff] }
  0xc4   :  { %4041 = vmatprep.subr.mxu1 %v362_v30  ;;  %4007 = vmatpush3.msra.mxu0 %v314_v32  ;;  %v412_v30 = vld [vmem:[#allocation2 + $0xb18] sm:$0xff]  ;;  %v427_v32 = vld [vmem:[#allocation2 + $0xb90] sm:$0xff] }
  0xc5   :  { %4042 = vmatpush3.msra.mxu1 %v346_v33  ;;  %4008 = vmatprep.subr.mxu0 %v329_v34  ;;  %v1196_v33 = vrot.slane %v46_v21, %v4938_v51  ;;  %v379_v34 = vld [vmem:[#allocation2 + $0xa10] sm:$0xff] }
  0xc6   :  { %4043 = vmatprep.subr.mxu1 %v361_v35  ;;  %4009 = vmatpush3.msra.mxu0 %v313_v37  ;;  %v411_v35 = vld [vmem:[#allocation2 + $0xb10] sm:$0xff]  ;;  %v426_v37 = vld [vmem:[#allocation2 + $0xb88] sm:$0xff] }
  0xc7   :  { %2064 = vmatprep.mubr.f32.mxu0 %v1187_v36  ;;  %4044 = vmatpush3.msra.mxu1 %v345_v38  ;;  %v394_v36 = vld [vmem:[#allocation2 + $0xa88] sm:$0xff]  ;;  %v1203_v38 = vrot.slane %v1189_v28, %v4938_v51  ;;  %v495_v21 = vld [vmem:[#allocation2 + $0xdb0] sm:$0xff] }
  0xc8   :  { %2065 = vmatmul.mubr.f32.vlgmr.msra.gmra.mxu0 %v1179_v26  ;;  %2134 = vmatprep.mubr.f32.mxu1 %v1188_v39  ;;  %v396_v26 = vld [vmem:[#allocation2 + $0xa98] sm:$0xff]  ;;  %v378_v39 = vld [vmem:[#allocation2 + $0xa08] sm:$0xff]  ;;  %v47_v28 = vld [vmem:[%s5023_s0 + $0x30] sm:$0xff] }
  0xc9   :  { %4048 = vmatprep.subr.mxu0 %v408_v40  ;;  %4083 = vmatprep.subr.mxu1 %v440_v41  ;;  %v410_v40 = vld [vmem:[#allocation2 + $0xb08] sm:$0xff]  ;;  %v393_v41 = vld [vmem:[#allocation2 + $0xa80] sm:$0xff] }
  0xca   :  { %2135 = vmatmul.mubr.f32.vlgmr.msra.gmra.mxu1 %v1186_v31  ;;  %4049 = vmatpush3.msra.mxu0 %v392_v42  ;;  %v395_v31 = vld [vmem:[#allocation2 + $0xa90] sm:$0xff]  ;;  %v425_v42 = vld [vmem:[#allocation2 + $0xb80] sm:$0xff] }
  0xcb   :  { %4084 = vmatpush3.msra.mxu1 %v424_v43  ;;  %4050 = vmatprep.subr.mxu0 %v407_v44  ;;  %v1204_v43 = vcombine.high %v1196_v33, %v1196_v33  ;;  %v377_v44 = vld [vmem:[#allocation2 + $0xa00] sm:$0xff] }
  0xcc   :  { %4085 = vmatprep.subr.mxu1 %v439_v45  ;;  %4051 = vmatpush3.msra.mxu0 %v391_v46  ;;  %v409_v45 = vld [vmem:[#allocation2 + $0xb00] sm:$0xff]  ;;  %v1205_v46 = vcombine.high %v1203_v38, %v1203_v38 }
  0xcd   :  { %4086 = vmatpush3.msra.mxu1 %v423_v47  ;;  %4052 = vmatprep.subr.mxu0 %v406_v48  ;;  %v472_v47 = vld [vmem:[#allocation2 + $0xcf8] sm:$0xff] }
  0xce   :  { %4087 = vmatprep.subr.mxu1 %v438_v49  ;;  %4053 = vmatpush3.msra.mxu0 %v390_v50  ;;  %v504_v48 = vld [vmem:[#allocation2 + $0xdf8] sm:$0xff] }
  0xcf   :  { %4088 = vmatpush3.msra.mxu1 %v422_v52  ;;  %4054 = vmatprep.subr.mxu0 %v405_v53  ;;  %v456_v49 = vld [vmem:[#allocation2 + $0xc78] sm:$0xff]  ;;  %v471_v52 = vld [vmem:[#allocation2 + $0xcf0] sm:$0xff] }
  0xd0   :  { %4089 = vmatprep.subr.mxu1 %v437_v54  ;;  %4055 = vmatpush3.msra.mxu0 %v389_v55  ;;  %v488_v50 = vld [vmem:[#allocation2 + $0xd78] sm:$0xff]  ;;  %v503_v53 = vld [vmem:[#allocation2 + $0xdf0] sm:$0xff] }
  0xd1   :  { %4090 = vmatpush3.msra.mxu1 %v421_v56  ;;  %4056 = vmatprep.subr.mxu0 %v404_v57  ;;  %v455_v54 = vld [vmem:[#allocation2 + $0xc70] sm:$0xff]  ;;  %v470_v56 = vld [vmem:[#allocation2 + $0xce8] sm:$0xff] }
  0xd2   :  { %4091 = vmatprep.subr.mxu1 %v436_v58  ;;  %4057 = vmatpush3.msra.mxu0 %v388_v59  ;;  %v487_v55 = vld [vmem:[#allocation2 + $0xd70] sm:$0xff]  ;;  %v502_v57 = vld [vmem:[#allocation2 + $0xde8] sm:$0xff] }
  0xd3   :  { %4092 = vmatpush3.msra.mxu1 %v420_v60  ;;  %4058 = vmatprep.subr.mxu0 %v403_v61  ;;  %v454_v58 = vld [vmem:[#allocation2 + $0xc68] sm:$0xff]  ;;  %v469_v60 = vld [vmem:[#allocation2 + $0xce0] sm:$0xff] }
  0xd4   :  { %4093 = vmatprep.subr.mxu1 %v435_v62  ;;  %4059 = vmatpush3.msra.mxu0 %v387_v63  ;;  %v486_v59 = vld [vmem:[#allocation2 + $0xd68] sm:$0xff]  ;;  %v501_v61 = vld [vmem:[#allocation2 + $0xde0] sm:$0xff] }
  0xd5   :  { %4094 = vmatpush3.msra.mxu1 %v419_v0  ;;  %4060 = vmatprep.subr.mxu0 %v402_v1  ;;  %v453_v62 = vld [vmem:[#allocation2 + $0xc60] sm:$0xff]  ;;  %v468_v0 = vld [vmem:[#allocation2 + $0xcd8] sm:$0xff] }
  0xd6   :  { %4095 = vmatprep.subr.mxu1 %v434_v2  ;;  %4061 = vmatpush3.msra.mxu0 %v386_v3  ;;  %v485_v63 = vld [vmem:[#allocation2 + $0xd60] sm:$0xff]  ;;  %v500_v1 = vld [vmem:[#allocation2 + $0xdd8] sm:$0xff] }
  0xd7   :  { %4096 = vmatpush3.msra.mxu1 %v418_v4  ;;  %4062 = vmatprep.subr.mxu0 %v401_v5  ;;  %v452_v2 = vld [vmem:[#allocation2 + $0xc58] sm:$0xff]  ;;  %v467_v4 = vld [vmem:[#allocation2 + $0xcd0] sm:$0xff] }
  0xd8   :  { %4097 = vmatprep.subr.mxu1 %v433_v6  ;;  %4063 = vmatpush3.msra.mxu0 %v385_v7  ;;  %v484_v3 = vld [vmem:[#allocation2 + $0xd58] sm:$0xff]  ;;  %v499_v5 = vld [vmem:[#allocation2 + $0xdd0] sm:$0xff] }
  0xd9   :  { %4098 = vmatpush3.msra.mxu1 %v417_v8  ;;  %4064 = vmatprep.subr.mxu0 %v400_v9  ;;  %v451_v6 = vld [vmem:[#allocation2 + $0xc50] sm:$0xff]  ;;  %v466_v8 = vld [vmem:[#allocation2 + $0xcc8] sm:$0xff] }
  0xda   :  { %4099 = vmatprep.subr.mxu1 %v432_v10  ;;  %4065 = vmatpush3.msra.mxu0 %v384_v11  ;;  %v483_v7 = vld [vmem:[#allocation2 + $0xd50] sm:$0xff]  ;;  %v498_v9 = vld [vmem:[#allocation2 + $0xdc8] sm:$0xff] }
  0xdb   :  { %4100 = vmatpush3.msra.mxu1 %v416_v12  ;;  %4066 = vmatprep.subr.mxu0 %v399_v13  ;;  %v450_v10 = vld [vmem:[#allocation2 + $0xc48] sm:$0xff]  ;;  %v465_v12 = vld [vmem:[#allocation2 + $0xcc0] sm:$0xff] }
  0xdc   :  { %4101 = vmatprep.subr.mxu1 %v431_v14  ;;  %4067 = vmatpush3.msra.mxu0 %v383_v15  ;;  %v482_v11 = vld [vmem:[#allocation2 + $0xd48] sm:$0xff]  ;;  %v497_v13 = vld [vmem:[#allocation2 + $0xdc0] sm:$0xff] }
  0xdd   :  { %4102 = vmatpush3.msra.mxu1 %v415_v16  ;;  %4068 = vmatprep.subr.mxu0 %v398_v17  ;;  %v449_v14 = vld [vmem:[#allocation2 + $0xc40] sm:$0xff]  ;;  %v464_v16 = vld [vmem:[#allocation2 + $0xcb8] sm:$0xff] }
  0xde   :  { %4103 = vmatprep.subr.mxu1 %v430_v18  ;;  %4069 = vmatpush3.msra.mxu0 %v382_v19  ;;  %v481_v15 = vld [vmem:[#allocation2 + $0xd40] sm:$0xff]  ;;  %v496_v17 = vld [vmem:[#allocation2 + $0xdb8] sm:$0xff] }
  0xdf   :  { %4104 = vmatpush3.msra.mxu1 %v414_v20  ;;  %4070 = vmatprep.subr.mxu0 %v397_v22  ;;  %v448_v18 = vld [vmem:[#allocation2 + $0xc38] sm:$0xff]  ;;  %v463_v20 = vld [vmem:[#allocation2 + $0xcb0] sm:$0xff] }
  0xe0   :  { %4105 = vmatprep.subr.mxu1 %v429_v23  ;;  %4071 = vmatpush3.msra.mxu0 %v381_v24  ;;  %v480_v19 = vld [vmem:[#allocation2 + $0xd38] sm:$0xff]  ;;  %v447_v22 = vld [vmem:[#allocation2 + $0xc30] sm:$0xff]  ;;  %v462_v24 = vld [vmem:[#allocation2 + $0xca8] sm:$0xff] }
  0xe1   :  { %4106 = vmatpush3.msra.mxu1 %v413_v25  ;;  %4072 = vmatprep.subr.mxu0 %v396_v26  ;;  %v479_v23 = vld [vmem:[#allocation2 + $0xd30] sm:$0xff]  ;;  %v494_v25 = vld [vmem:[#allocation2 + $0xda8] sm:$0xff] }
  0xe2   :  { %4107 = vmatprep.subr.mxu1 %v428_v27  ;;  %4073 = vmatpush3.msra.mxu0 %v380_v29  ;;  %v446_v26 = vld [vmem:[#allocation2 + $0xc28] sm:$0xff]  ;;  %v461_v29 = vld [vmem:[#allocation2 + $0xca0] sm:$0xff] }
  0xe3   :  { %4108 = vmatpush3.msra.mxu1 %v412_v30  ;;  %4074 = vmatprep.subr.mxu0 %v395_v31  ;;  %v478_v27 = vld [vmem:[#allocation2 + $0xd28] sm:$0xff]  ;;  %v493_v30 = vld [vmem:[#allocation2 + $0xda0] sm:$0xff] }
  0xe4   :  { %4109 = vmatprep.subr.mxu1 %v427_v32  ;;  %4075 = vmatpush3.msra.mxu0 %v379_v34  ;;  %v445_v31 = vld [vmem:[#allocation2 + $0xc20] sm:$0xff]  ;;  %v492_v34 = vld [vmem:[#allocation2 + $0xd98] sm:$0xff] }
  0xe5   :  { %4110 = vmatpush3.msra.mxu1 %v411_v35  ;;  %4076 = vmatprep.subr.mxu0 %v394_v36  ;;  %v477_v32 = vld [vmem:[#allocation2 + $0xd20] sm:$0xff]  ;;  %v1206_v35 = vcombine.high %v47_v28, %v47_v28  ;;  %v444_v36 = vld [vmem:[#allocation2 + $0xc18] sm:$0xff] }
  0xe6   :  { %4111 = vmatprep.subr.mxu1 %v426_v37  ;;  %4077 = vmatpush3.msra.mxu0 %v378_v39  ;;  %v476_v37 = vld [vmem:[#allocation2 + $0xd18] sm:$0xff]  ;;  %v491_v39 = vld [vmem:[#allocation2 + $0xd90] sm:$0xff] }
  0xe7   :  { %4112 = vmatpush3.msra.mxu1 %v410_v40  ;;  %4078 = vmatprep.subr.mxu0 %v393_v41  ;;  %v1213_v40 = vrot.slane %v47_v28, %v4938_v51  ;;  %v443_v41 = vld [vmem:[#allocation2 + $0xc10] sm:$0xff] }
  0xe8   :  { %4113 = vmatprep.subr.mxu1 %v425_v42  ;;  %4079 = vmatpush3.msra.mxu0 %v377_v44  ;;  %v475_v42 = vld [vmem:[#allocation2 + $0xd10] sm:$0xff]  ;;  %v490_v44 = vld [vmem:[#allocation2 + $0xd88] sm:$0xff] }
  0xe9   :  { %2204 = vmatprep.mubr.f32.mxu0 %v1204_v43  ;;  %4114 = vmatpush3.msra.mxu1 %v409_v45  ;;  %v458_v43 = vld [vmem:[#allocation2 + $0xc88] sm:$0xff]  ;;  %v1220_v45 = vrot.slane %v1206_v35, %v4938_v51  ;;  %v559_v28 = vld [vmem:[#allocation2 + $0xfb0] sm:$0xff]  ;;  %v48_v35 = vld [vmem:[%s5023_s0 + $0x38] sm:$0xff] }
  0xea   :  { %2205 = vmatmul.mubr.f32.vlgmr.msra.gmra.mxu0 %v1196_v33  ;;  %2274 = vmatprep.mubr.f32.mxu1 %v1205_v46  ;;  %v460_v33 = vld [vmem:[#allocation2 + $0xc98] sm:$0xff]  ;;  %v442_v46 = vld [vmem:[#allocation2 + $0xc08] sm:$0xff] }
  0xeb   :  { %4118 = vmatprep.subr.mxu0 %v472_v47  ;;  %4153 = vmatprep.subr.mxu1 %v504_v48  ;;  %v474_v47 = vld [vmem:[#allocation2 + $0xd08] sm:$0xff]  ;;  %v457_v48 = vld [vmem:[#allocation2 + $0xc80] sm:$0xff] }
  0xec   :  { %2275 = vmatmul.mubr.f32.vlgmr.msra.gmra.mxu1 %v1203_v38  ;;  %4119 = vmatpush3.msra.mxu0 %v456_v49  ;;  %v459_v38 = vld [vmem:[#allocation2 + $0xc90] sm:$0xff]  ;;  %v489_v49 = vld [vmem:[#allocation2 + $0xd80] sm:$0xff] }
  0xed   :  { %4154 = vmatpush3.msra.mxu1 %v488_v50  ;;  %4120 = vmatprep.subr.mxu0 %v471_v52  ;;  %v1221_v50 = vcombine.high %v1213_v40, %v1213_v40  ;;  %v441_v52 = vld [vmem:[#allocation2 + $0xc00] sm:$0xff] }
  0xee   :  { %4155 = vmatprep.subr.mxu1 %v503_v53  ;;  %4121 = vmatpush3.msra.mxu0 %v455_v54  ;;  %v473_v53 = vld [vmem:[#allocation2 + $0xd00] sm:$0xff]  ;;  %v1222_v54 = vcombine.high %v1220_v45, %v1220_v45 }
  0xef   :  { %4156 = vmatpush3.msra.mxu1 %v487_v55  ;;  %4122 = vmatprep.subr.mxu0 %v470_v56  ;;  %v536_v55 = vld [vmem:[#allocation2 + $0xef8] sm:$0xff] }
  0xf0   :  { %4157 = vmatprep.subr.mxu1 %v502_v57  ;;  %4123 = vmatpush3.msra.mxu0 %v454_v58  ;;  %v568_v56 = vld [vmem:[#allocation2 + $0xff8] sm:$0xff] }
  0xf1   :  { %4158 = vmatpush3.msra.mxu1 %v486_v59  ;;  %4124 = vmatprep.subr.mxu0 %v469_v60  ;;  %v520_v57 = vld [vmem:[#allocation2 + $0xe78] sm:$0xff]  ;;  %v535_v59 = vld [vmem:[#allocation2 + $0xef0] sm:$0xff] }
  0xf2   :  { %4159 = vmatprep.subr.mxu1 %v501_v61  ;;  %4125 = vmatpush3.msra.mxu0 %v453_v62  ;;  %v552_v58 = vld [vmem:[#allocation2 + $0xf78] sm:$0xff]  ;;  %v567_v60 = vld [vmem:[#allocation2 + $0xff0] sm:$0xff] }
  0xf3   :  { %4160 = vmatpush3.msra.mxu1 %v485_v63  ;;  %4126 = vmatprep.subr.mxu0 %v468_v0  ;;  %v519_v61 = vld [vmem:[#allocation2 + $0xe70] sm:$0xff]  ;;  %v534_v63 = vld [vmem:[#allocation2 + $0xee8] sm:$0xff] }
  0xf4   :  { %4161 = vmatprep.subr.mxu1 %v500_v1  ;;  %4127 = vmatpush3.msra.mxu0 %v452_v2  ;;  %v551_v62 = vld [vmem:[#allocation2 + $0xf70] sm:$0xff]  ;;  %v566_v0 = vld [vmem:[#allocation2 + $0xfe8] sm:$0xff] }
  0xf5   :  { %4162 = vmatpush3.msra.mxu1 %v484_v3  ;;  %4128 = vmatprep.subr.mxu0 %v467_v4  ;;  %v518_v1 = vld [vmem:[#allocation2 + $0xe68] sm:$0xff]  ;;  %v533_v3 = vld [vmem:[#allocation2 + $0xee0] sm:$0xff] }
  0xf6   :  { %4163 = vmatprep.subr.mxu1 %v499_v5  ;;  %4129 = vmatpush3.msra.mxu0 %v451_v6  ;;  %v550_v2 = vld [vmem:[#allocation2 + $0xf68] sm:$0xff]  ;;  %v565_v4 = vld [vmem:[#allocation2 + $0xfe0] sm:$0xff] }
  0xf7   :  { %4164 = vmatpush3.msra.mxu1 %v483_v7  ;;  %4130 = vmatprep.subr.mxu0 %v466_v8  ;;  %v517_v5 = vld [vmem:[#allocation2 + $0xe60] sm:$0xff]  ;;  %v532_v7 = vld [vmem:[#allocation2 + $0xed8] sm:$0xff] }
  0xf8   :  { %4165 = vmatprep.subr.mxu1 %v498_v9  ;;  %4131 = vmatpush3.msra.mxu0 %v450_v10  ;;  %v549_v6 = vld [vmem:[#allocation2 + $0xf60] sm:$0xff]  ;;  %v564_v8 = vld [vmem:[#allocation2 + $0xfd8] sm:$0xff] }
  0xf9   :  { %4166 = vmatpush3.msra.mxu1 %v482_v11  ;;  %4132 = vmatprep.subr.mxu0 %v465_v12  ;;  %v516_v9 = vld [vmem:[#allocation2 + $0xe58] sm:$0xff]  ;;  %v531_v11 = vld [vmem:[#allocation2 + $0xed0] sm:$0xff] }
  0xfa   :  { %4167 = vmatprep.subr.mxu1 %v497_v13  ;;  %4133 = vmatpush3.msra.mxu0 %v449_v14  ;;  %v548_v10 = vld [vmem:[#allocation2 + $0xf58] sm:$0xff]  ;;  %v563_v12 = vld [vmem:[#allocation2 + $0xfd0] sm:$0xff] }
  0xfb   :  { %4168 = vmatpush3.msra.mxu1 %v481_v15  ;;  %4134 = vmatprep.subr.mxu0 %v464_v16  ;;  %v515_v13 = vld [vmem:[#allocation2 + $0xe50] sm:$0xff]  ;;  %v530_v15 = vld [vmem:[#allocation2 + $0xec8] sm:$0xff] }
  0xfc   :  { %4169 = vmatprep.subr.mxu1 %v496_v17  ;;  %4135 = vmatpush3.msra.mxu0 %v448_v18  ;;  %v547_v14 = vld [vmem:[#allocation2 + $0xf50] sm:$0xff]  ;;  %v562_v16 = vld [vmem:[#allocation2 + $0xfc8] sm:$0xff] }
  0xfd   :  { %4170 = vmatpush3.msra.mxu1 %v480_v19  ;;  %4136 = vmatprep.subr.mxu0 %v463_v20  ;;  %v514_v17 = vld [vmem:[#allocation2 + $0xe48] sm:$0xff]  ;;  %v529_v19 = vld [vmem:[#allocation2 + $0xec0] sm:$0xff] }
  0xfe   :  { %4171 = vmatprep.subr.mxu1 %v495_v21  ;;  %4137 = vmatpush3.msra.mxu0 %v447_v22  ;;  %v546_v18 = vld [vmem:[#allocation2 + $0xf48] sm:$0xff]  ;;  %v561_v20 = vld [vmem:[#allocation2 + $0xfc0] sm:$0xff] }
  0xff   :  { %4172 = vmatpush3.msra.mxu1 %v479_v23  ;;  %4138 = vmatprep.subr.mxu0 %v462_v24  ;;  %v513_v21 = vld [vmem:[#allocation2 + $0xe40] sm:$0xff]  ;;  %v528_v23 = vld [vmem:[#allocation2 + $0xeb8] sm:$0xff] }
 0x100   :  { %4173 = vmatprep.subr.mxu1 %v494_v25  ;;  %4139 = vmatpush3.msra.mxu0 %v446_v26  ;;  %v545_v22 = vld [vmem:[#allocation2 + $0xf40] sm:$0xff]  ;;  %v560_v24 = vld [vmem:[#allocation2 + $0xfb8] sm:$0xff] }
 0x101   :  { %4174 = vmatpush3.msra.mxu1 %v478_v27  ;;  %4140 = vmatprep.subr.mxu0 %v461_v29  ;;  %v512_v25 = vld [vmem:[#allocation2 + $0xe38] sm:$0xff]  ;;  %v527_v27 = vld [vmem:[#allocation2 + $0xeb0] sm:$0xff] }
 0x102   :  { %4175 = vmatprep.subr.mxu1 %v493_v30  ;;  %4141 = vmatpush3.msra.mxu0 %v445_v31  ;;  %v544_v26 = vld [vmem:[#allocation2 + $0xf38] sm:$0xff]  ;;  %v511_v29 = vld [vmem:[#allocation2 + $0xe30] sm:$0xff]  ;;  %v526_v31 = vld [vmem:[#allocation2 + $0xea8] sm:$0xff] }
 0x103   :  { %4176 = vmatpush3.msra.mxu1 %v477_v32  ;;  %4142 = vmatprep.subr.mxu0 %v460_v33  ;;  %v543_v30 = vld [vmem:[#allocation2 + $0xf30] sm:$0xff]  ;;  %v558_v32 = vld [vmem:[#allocation2 + $0xfa8] sm:$0xff] }
 0x104   :  { %4177 = vmatprep.subr.mxu1 %v492_v34  ;;  %4143 = vmatpush3.msra.mxu0 %v444_v36  ;;  %v510_v33 = vld [vmem:[#allocation2 + $0xe28] sm:$0xff]  ;;  %v525_v36 = vld [vmem:[#allocation2 + $0xea0] sm:$0xff] }
 0x105   :  { %4178 = vmatpush3.msra.mxu1 %v476_v37  ;;  %4144 = vmatprep.subr.mxu0 %v459_v38  ;;  %v542_v34 = vld [vmem:[#allocation2 + $0xf28] sm:$0xff]  ;;  %v557_v37 = vld [vmem:[#allocation2 + $0xfa0] sm:$0xff] }
 0x106   :  { %4179 = vmatprep.subr.mxu1 %v491_v39  ;;  %4145 = vmatpush3.msra.mxu0 %v443_v41  ;;  %v509_v38 = vld [vmem:[#allocation2 + $0xe20] sm:$0xff]  ;;  %v556_v41 = vld [vmem:[#allocation2 + $0xf98] sm:$0xff] }
 0x107   :  { %4180 = vmatpush3.msra.mxu1 %v475_v42  ;;  %4146 = vmatprep.subr.mxu0 %v458_v43  ;;  %v541_v39 = vld [vmem:[#allocation2 + $0xf20] sm:$0xff]  ;;  %v1223_v42 = vcombine.high %v48_v35, %v48_v35  ;;  %v508_v43 = vld [vmem:[#allocation2 + $0xe18] sm:$0xff] }
 0x108   :  { %4181 = vmatprep.subr.mxu1 %v490_v44  ;;  %4147 = vmatpush3.msra.mxu0 %v442_v46  ;;  %v540_v44 = vld [vmem:[#allocation2 + $0xf18] sm:$0xff]  ;;  %v555_v46 = vld [vmem:[#allocation2 + $0xf90] sm:$0xff] }
 0x109   :  { %4182 = vmatpush3.msra.mxu1 %v474_v47  ;;  %4148 = vmatprep.subr.mxu0 %v457_v48  ;;  %v1230_v47 = vrot.slane %v48_v35, %v4938_v51  ;;  %v507_v48 = vld [vmem:[#allocation2 + $0xe10] sm:$0xff] }
 0x10a   :  { %4183 = vmatprep.subr.mxu1 %v489_v49  ;;  %4149 = vmatpush3.msra.mxu0 %v441_v52  ;;  %v539_v49 = vld [vmem:[#allocation2 + $0xf10] sm:$0xff]  ;;  %v554_v52 = vld [vmem:[#allocation2 + $0xf88] sm:$0xff] }
 0x10b   :  { %2344 = vmatprep.mubr.f32.mxu0 %v1221_v50  ;;  %4184 = vmatpush3.msra.mxu1 %v473_v53  ;;  %v522_v50 = vld [vmem:[#allocation2 + $0xe88] sm:$0xff]  ;;  %v1237_v53 = vrot.slane %v1223_v42, %v4938_v51  ;;  %v623_v35 = vld [vmem:[#allocation2 + $0x11b0] sm:$0xff]  ;;  %v49_v42 = vld [vmem:[%s5023_s0 + $0x40] sm:$0xff] }
 0x10c   :  { %2345 = vmatmul.mubr.f32.vlgmr.msra.gmra.mxu0 %v1213_v40  ;;  %2414 = vmatprep.mubr.f32.mxu1 %v1222_v54  ;;  %v524_v40 = vld [vmem:[#allocation2 + $0xe98] sm:$0xff]  ;;  %v506_v54 = vld [vmem:[#allocation2 + $0xe08] sm:$0xff] }
 0x10d   :  { %4188 = vmatprep.subr.mxu0 %v536_v55  ;;  %4223 = vmatprep.subr.mxu1 %v568_v56  ;;  %v538_v55 = vld [vmem:[#allocation2 + $0xf08] sm:$0xff]  ;;  %v521_v56 = vld [vmem:[#allocation2 + $0xe80] sm:$0xff] }
 0x10e   :  { %2415 = vmatmul.mubr.f32.vlgmr.msra.gmra.mxu1 %v1220_v45  ;;  %4189 = vmatpush3.msra.mxu0 %v520_v57  ;;  %v523_v45 = vld [vmem:[#allocation2 + $0xe90] sm:$0xff]  ;;  %v553_v57 = vld [vmem:[#allocation2 + $0xf80] sm:$0xff] }
 0x10f   :  { %4224 = vmatpush3.msra.mxu1 %v552_v58  ;;  %4190 = vmatprep.subr.mxu0 %v535_v59  ;;  %v1238_v58 = vcombine.high %v1230_v47, %v1230_v47  ;;  %v505_v59 = vld [vmem:[#allocation2 + $0xe00] sm:$0xff] }
 0x110   :  { %4225 = vmatprep.subr.mxu1 %v567_v60  ;;  %4191 = vmatpush3.msra.mxu0 %v519_v61  ;;  %v537_v60 = vld [vmem:[#allocation2 + $0xf00] sm:$0xff]  ;;  %v1239_v61 = vcombine.high %v1237_v53, %v1237_v53 }
 0x111   :  { %4226 = vmatpush3.msra.mxu1 %v551_v62  ;;  %4192 = vmatprep.subr.mxu0 %v534_v63  ;;  %v600_v62 = vld [vmem:[#allocation2 + $0x10f8] sm:$0xff] }
 0x112   :  { %4227 = vmatprep.subr.mxu1 %v566_v0  ;;  %4193 = vmatpush3.msra.mxu0 %v518_v1  ;;  %v632_v63 = vld [vmem:[#allocation2 + $0x11f8] sm:$0xff] }
 0x113   :  { %4228 = vmatpush3.msra.mxu1 %v550_v2  ;;  %4194 = vmatprep.subr.mxu0 %v533_v3  ;;  %v584_v0 = vld [vmem:[#allocation2 + $0x1078] sm:$0xff]  ;;  %v599_v2 = vld [vmem:[#allocation2 + $0x10f0] sm:$0xff] }
 0x114   :  { %4229 = vmatprep.subr.mxu1 %v565_v4  ;;  %4195 = vmatpush3.msra.mxu0 %v517_v5  ;;  %v616_v1 = vld [vmem:[#allocation2 + $0x1178] sm:$0xff]  ;;  %v631_v3 = vld [vmem:[#allocation2 + $0x11f0] sm:$0xff] }
 0x115   :  { %4230 = vmatpush3.msra.mxu1 %v549_v6  ;;  %4196 = vmatprep.subr.mxu0 %v532_v7  ;;  %v583_v4 = vld [vmem:[#allocation2 + $0x1070] sm:$0xff]  ;;  %v598_v6 = vld [vmem:[#allocation2 + $0x10e8] sm:$0xff] }
 0x116   :  { %4231 = vmatprep.subr.mxu1 %v564_v8  ;;  %4197 = vmatpush3.msra.mxu0 %v516_v9  ;;  %v615_v5 = vld [vmem:[#allocation2 + $0x1170] sm:$0xff]  ;;  %v630_v7 = vld [vmem:[#allocation2 + $0x11e8] sm:$0xff] }
 0x117   :  { %4232 = vmatpush3.msra.mxu1 %v548_v10  ;;  %4198 = vmatprep.subr.mxu0 %v531_v11  ;;  %v582_v8 = vld [vmem:[#allocation2 + $0x1068] sm:$0xff]  ;;  %v597_v10 = vld [vmem:[#allocation2 + $0x10e0] sm:$0xff] }
 0x118   :  { %4233 = vmatprep.subr.mxu1 %v563_v12  ;;  %4199 = vmatpush3.msra.mxu0 %v515_v13  ;;  %v614_v9 = vld [vmem:[#allocation2 + $0x1168] sm:$0xff]  ;;  %v629_v11 = vld [vmem:[#allocation2 + $0x11e0] sm:$0xff] }
 0x119   :  { %4234 = vmatpush3.msra.mxu1 %v547_v14  ;;  %4200 = vmatprep.subr.mxu0 %v530_v15  ;;  %v581_v12 = vld [vmem:[#allocation2 + $0x1060] sm:$0xff]  ;;  %v596_v14 = vld [vmem:[#allocation2 + $0x10d8] sm:$0xff] }
 0x11a   :  { %4235 = vmatprep.subr.mxu1 %v562_v16  ;;  %4201 = vmatpush3.msra.mxu0 %v514_v17  ;;  %v613_v13 = vld [vmem:[#allocation2 + $0x1160] sm:$0xff]  ;;  %v628_v15 = vld [vmem:[#allocation2 + $0x11d8] sm:$0xff] }
 0x11b   :  { %4236 = vmatpush3.msra.mxu1 %v546_v18  ;;  %4202 = vmatprep.subr.mxu0 %v529_v19  ;;  %v580_v16 = vld [vmem:[#allocation2 + $0x1058] sm:$0xff]  ;;  %v595_v18 = vld [vmem:[#allocation2 + $0x10d0] sm:$0xff] }
 0x11c   :  { %4237 = vmatprep.subr.mxu1 %v561_v20  ;;  %4203 = vmatpush3.msra.mxu0 %v513_v21  ;;  %v612_v17 = vld [vmem:[#allocation2 + $0x1158] sm:$0xff]  ;;  %v627_v19 = vld [vmem:[#allocation2 + $0x11d0] sm:$0xff] }
 0x11d   :  { %4238 = vmatpush3.msra.mxu1 %v545_v22  ;;  %4204 = vmatprep.subr.mxu0 %v528_v23  ;;  %v579_v20 = vld [vmem:[#allocation2 + $0x1050] sm:$0xff]  ;;  %v594_v22 = vld [vmem:[#allocation2 + $0x10c8] sm:$0xff] }
 0x11e   :  { %4239 = vmatprep.subr.mxu1 %v560_v24  ;;  %4205 = vmatpush3.msra.mxu0 %v512_v25  ;;  %v611_v21 = vld [vmem:[#allocation2 + $0x1150] sm:$0xff]  ;;  %v626_v23 = vld [vmem:[#allocation2 + $0x11c8] sm:$0xff] }
 0x11f   :  { %4240 = vmatpush3.msra.mxu1 %v544_v26  ;;  %4206 = vmatprep.subr.mxu0 %v527_v27  ;;  %v578_v24 = vld [vmem:[#allocation2 + $0x1048] sm:$0xff]  ;;  %v593_v26 = vld [vmem:[#allocation2 + $0x10c0] sm:$0xff] }
 0x120   :  { %4241 = vmatprep.subr.mxu1 %v559_v28  ;;  %4207 = vmatpush3.msra.mxu0 %v511_v29  ;;  %v610_v25 = vld [vmem:[#allocation2 + $0x1148] sm:$0xff]  ;;  %v625_v27 = vld [vmem:[#allocation2 + $0x11c0] sm:$0xff] }
 0x121   :  { %4242 = vmatpush3.msra.mxu1 %v543_v30  ;;  %4208 = vmatprep.subr.mxu0 %v526_v31  ;;  %v577_v28 = vld [vmem:[#allocation2 + $0x1040] sm:$0xff]  ;;  %v592_v30 = vld [vmem:[#allocation2 + $0x10b8] sm:$0xff] }
 0x122   :  { %4243 = vmatprep.subr.mxu1 %v558_v32  ;;  %4209 = vmatpush3.msra.mxu0 %v510_v33  ;;  %v609_v29 = vld [vmem:[#allocation2 + $0x1140] sm:$0xff]  ;;  %v624_v31 = vld [vmem:[#allocation2 + $0x11b8] sm:$0xff] }
 0x123   :  { %4244 = vmatpush3.msra.mxu1 %v542_v34  ;;  %4210 = vmatprep.subr.mxu0 %v525_v36  ;;  %v576_v32 = vld [vmem:[#allocation2 + $0x1038] sm:$0xff]  ;;  %v591_v34 = vld [vmem:[#allocation2 + $0x10b0] sm:$0xff] }
 0x124   :  { %4245 = vmatprep.subr.mxu1 %v557_v37  ;;  %4211 = vmatpush3.msra.mxu0 %v509_v38  ;;  %v608_v33 = vld [vmem:[#allocation2 + $0x1138] sm:$0xff]  ;;  %v575_v36 = vld [vmem:[#allocation2 + $0x1030] sm:$0xff]  ;;  %v590_v38 = vld [vmem:[#allocation2 + $0x10a8] sm:$0xff] }
 0x125   :  { %4246 = vmatpush3.msra.mxu1 %v541_v39  ;;  %4212 = vmatprep.subr.mxu0 %v524_v40  ;;  %v607_v37 = vld [vmem:[#allocation2 + $0x1130] sm:$0xff]  ;;  %v622_v39 = vld [vmem:[#allocation2 + $0x11a8] sm:$0xff] }
 0x126   :  { %4247 = vmatprep.subr.mxu1 %v556_v41  ;;  %4213 = vmatpush3.msra.mxu0 %v508_v43  ;;  %v574_v40 = vld [vmem:[#allocation2 + $0x1028] sm:$0xff]  ;;  %v589_v43 = vld [vmem:[#allocation2 + $0x10a0] sm:$0xff] }
 0x127   :  { %4248 = vmatpush3.msra.mxu1 %v540_v44  ;;  %4214 = vmatprep.subr.mxu0 %v523_v45  ;;  %v606_v41 = vld [vmem:[#allocation2 + $0x1128] sm:$0xff]  ;;  %v621_v44 = vld [vmem:[#allocation2 + $0x11a0] sm:$0xff] }
 0x128   :  { %4249 = vmatprep.subr.mxu1 %v555_v46  ;;  %4215 = vmatpush3.msra.mxu0 %v507_v48  ;;  %v573_v45 = vld [vmem:[#allocation2 + $0x1020] sm:$0xff]  ;;  %v620_v48 = vld [vmem:[#allocation2 + $0x1198] sm:$0xff] }
 0x129   :  { %4250 = vmatpush3.msra.mxu1 %v539_v49  ;;  %4216 = vmatprep.subr.mxu0 %v522_v50  ;;  %v605_v46 = vld [vmem:[#allocation2 + $0x1120] sm:$0xff]  ;;  %v1240_v49 = vcombine.high %v49_v42, %v49_v42  ;;  %v572_v50 = vld [vmem:[#allocation2 + $0x1018] sm:$0xff] }
 0x12a   :  { %4251 = vmatprep.subr.mxu1 %v554_v52  ;;  %4217 = vmatpush3.msra.mxu0 %v506_v54  ;;  %v604_v52 = vld [vmem:[#allocation2 + $0x1118] sm:$0xff]  ;;  %v619_v54 = vld [vmem:[#allocation2 + $0x1190] sm:$0xff] }
 0x12b   :  { %4252 = vmatpush3.msra.mxu1 %v538_v55  ;;  %4218 = vmatprep.subr.mxu0 %v521_v56  ;;  %v1247_v55 = vrot.slane %v49_v42, %v4938_v51  ;;  %v571_v56 = vld [vmem:[#allocation2 + $0x1010] sm:$0xff] }
 0x12c   :  { %4253 = vmatprep.subr.mxu1 %v553_v57  ;;  %4219 = vmatpush3.msra.mxu0 %v505_v59  ;;  %v603_v57 = vld [vmem:[#allocation2 + $0x1110] sm:$0xff]  ;;  %v618_v59 = vld [vmem:[#allocation2 + $0x1188] sm:$0xff] }
 0x12d   :  { %2484 = vmatprep.mubr.f32.mxu0 %v1238_v58  ;;  %4254 = vmatpush3.msra.mxu1 %v537_v60  ;;  %v586_v58 = vld [vmem:[#allocation2 + $0x1088] sm:$0xff]  ;;  %v1254_v60 = vrot.slane %v1240_v49, %v4938_v51  ;;  %v687_v42 = vld [vmem:[#allocation2 + $0x13b0] sm:$0xff] }
 0x12e   :  { %2485 = vmatmul.mubr.f32.vlgmr.msra.gmra.mxu0 %v1230_v47  ;;  %2554 = vmatprep.mubr.f32.mxu1 %v1239_v61  ;;  %v588_v47 = vld [vmem:[#allocation2 + $0x1098] sm:$0xff]  ;;  %v570_v61 = vld [vmem:[#allocation2 + $0x1008] sm:$0xff] }
 0x12f   :  { %4258 = vmatprep.subr.mxu0 %v600_v62  ;;  %4293 = vmatprep.subr.mxu1 %v632_v63  ;;  %v602_v62 = vld [vmem:[#allocation2 + $0x1108] sm:$0xff]  ;;  %v585_v63 = vld [vmem:[#allocation2 + $0x1080] sm:$0xff] }
 0x130   :  { %2555 = vmatmul.mubr.f32.vlgmr.msra.gmra.mxu1 %v1237_v53  ;;  %4259 = vmatpush3.msra.mxu0 %v584_v0  ;;  %v587_v53 = vld [vmem:[#allocation2 + $0x1090] sm:$0xff]  ;;  %v617_v0 = vld [vmem:[#allocation2 + $0x1180] sm:$0xff]  ;;  %v50_v49 = vld [vmem:[%s5023_s0 + $0x48] sm:$0xff] }
 0x131   :  { %4294 = vmatpush3.msra.mxu1 %v616_v1  ;;  %4260 = vmatprep.subr.mxu0 %v599_v2  ;;  %v1255_v1 = vcombine.high %v1247_v55, %v1247_v55  ;;  %v569_v2 = vld [vmem:[#allocation2 + $0x1000] sm:$0xff] }
 0x132   :  { %4295 = vmatprep.subr.mxu1 %v631_v3  ;;  %4261 = vmatpush3.msra.mxu0 %v583_v4  ;;  %v601_v3 = vld [vmem:[#allocation2 + $0x1100] sm:$0xff]  ;;  %v1256_v4 = vcombine.high %v1254_v60, %v1254_v60 }
 0x133   :  { %4296 = vmatpush3.msra.mxu1 %v615_v5  ;;  %4262 = vmatprep.subr.mxu0 %v598_v6  ;;  %v664_v5 = vld [vmem:[#allocation2 + $0x12f8] sm:$0xff] }
 0x134   :  { %4297 = vmatprep.subr.mxu1 %v630_v7  ;;  %4263 = vmatpush3.msra.mxu0 %v582_v8  ;;  %v696_v6 = vld [vmem:[#allocation2 + $0x13f8] sm:$0xff] }
 0x135   :  { %4298 = vmatpush3.msra.mxu1 %v614_v9  ;;  %4264 = vmatprep.subr.mxu0 %v597_v10  ;;  %v648_v7 = vld [vmem:[#allocation2 + $0x1278] sm:$0xff]  ;;  %v663_v9 = vld [vmem:[#allocation2 + $0x12f0] sm:$0xff] }
 0x136   :  { %4299 = vmatprep.subr.mxu1 %v629_v11  ;;  %4265 = vmatpush3.msra.mxu0 %v581_v12  ;;  %v680_v8 = vld [vmem:[#allocation2 + $0x1378] sm:$0xff]  ;;  %v695_v10 = vld [vmem:[#allocation2 + $0x13f0] sm:$0xff] }
 0x137   :  { %4300 = vmatpush3.msra.mxu1 %v613_v13  ;;  %4266 = vmatprep.subr.mxu0 %v596_v14  ;;  %v647_v11 = vld [vmem:[#allocation2 + $0x1270] sm:$0xff]  ;;  %v662_v13 = vld [vmem:[#allocation2 + $0x12e8] sm:$0xff] }
 0x138   :  { %4301 = vmatprep.subr.mxu1 %v628_v15  ;;  %4267 = vmatpush3.msra.mxu0 %v580_v16  ;;  %v679_v12 = vld [vmem:[#allocation2 + $0x1370] sm:$0xff]  ;;  %v694_v14 = vld [vmem:[#allocation2 + $0x13e8] sm:$0xff] }
 0x139   :  { %4302 = vmatpush3.msra.mxu1 %v612_v17  ;;  %4268 = vmatprep.subr.mxu0 %v595_v18  ;;  %v646_v15 = vld [vmem:[#allocation2 + $0x1268] sm:$0xff]  ;;  %v661_v17 = vld [vmem:[#allocation2 + $0x12e0] sm:$0xff] }
 0x13a   :  { %4303 = vmatprep.subr.mxu1 %v627_v19  ;;  %4269 = vmatpush3.msra.mxu0 %v579_v20  ;;  %v678_v16 = vld [vmem:[#allocation2 + $0x1368] sm:$0xff]  ;;  %v693_v18 = vld [vmem:[#allocation2 + $0x13e0] sm:$0xff] }
 0x13b   :  { %4304 = vmatpush3.msra.mxu1 %v611_v21  ;;  %4270 = vmatprep.subr.mxu0 %v594_v22  ;;  %v645_v19 = vld [vmem:[#allocation2 + $0x1260] sm:$0xff]  ;;  %v660_v21 = vld [vmem:[#allocation2 + $0x12d8] sm:$0xff] }
 0x13c   :  { %4305 = vmatprep.subr.mxu1 %v626_v23  ;;  %4271 = vmatpush3.msra.mxu0 %v578_v24  ;;  %v677_v20 = vld [vmem:[#allocation2 + $0x1360] sm:$0xff]  ;;  %v692_v22 = vld [vmem:[#allocation2 + $0x13d8] sm:$0xff] }
 0x13d   :  { %4306 = vmatpush3.msra.mxu1 %v610_v25  ;;  %4272 = vmatprep.subr.mxu0 %v593_v26  ;;  %v644_v23 = vld [vmem:[#allocation2 + $0x1258] sm:$0xff]  ;;  %v659_v25 = vld [vmem:[#allocation2 + $0x12d0] sm:$0xff] }
 0x13e   :  { %4307 = vmatprep.subr.mxu1 %v625_v27  ;;  %4273 = vmatpush3.msra.mxu0 %v577_v28  ;;  %v676_v24 = vld [vmem:[#allocation2 + $0x1358] sm:$0xff]  ;;  %v691_v26 = vld [vmem:[#allocation2 + $0x13d0] sm:$0xff] }
 0x13f   :  { %4308 = vmatpush3.msra.mxu1 %v609_v29  ;;  %4274 = vmatprep.subr.mxu0 %v592_v30  ;;  %v643_v27 = vld [vmem:[#allocation2 + $0x1250] sm:$0xff]  ;;  %v658_v29 = vld [vmem:[#allocation2 + $0x12c8] sm:$0xff] }
 0x140   :  { %4309 = vmatprep.subr.mxu1 %v624_v31  ;;  %4275 = vmatpush3.msra.mxu0 %v576_v32  ;;  %v675_v28 = vld [vmem:[#allocation2 + $0x1350] sm:$0xff]  ;;  %v690_v30 = vld [vmem:[#allocation2 + $0x13c8] sm:$0xff] }
 0x141   :  { %4310 = vmatpush3.msra.mxu1 %v608_v33  ;;  %4276 = vmatprep.subr.mxu0 %v591_v34  ;;  %v642_v31 = vld [vmem:[#allocation2 + $0x1248] sm:$0xff]  ;;  %v657_v33 = vld [vmem:[#allocation2 + $0x12c0] sm:$0xff] }
 0x142   :  { %4311 = vmatprep.subr.mxu1 %v623_v35  ;;  %4277 = vmatpush3.msra.mxu0 %v575_v36  ;;  %v674_v32 = vld [vmem:[#allocation2 + $0x1348] sm:$0xff]  ;;  %v689_v34 = vld [vmem:[#allocation2 + $0x13c0] sm:$0xff] }
 0x143   :  { %4312 = vmatpush3.msra.mxu1 %v607_v37  ;;  %4278 = vmatprep.subr.mxu0 %v590_v38  ;;  %v641_v35 = vld [vmem:[#allocation2 + $0x1240] sm:$0xff]  ;;  %v656_v37 = vld [vmem:[#allocation2 + $0x12b8] sm:$0xff] }
 0x144   :  { %4313 = vmatprep.subr.mxu1 %v622_v39  ;;  %4279 = vmatpush3.msra.mxu0 %v574_v40  ;;  %v673_v36 = vld [vmem:[#allocation2 + $0x1340] sm:$0xff]  ;;  %v688_v38 = vld [vmem:[#allocation2 + $0x13b8] sm:$0xff] }
 0x145   :  { %4314 = vmatpush3.msra.mxu1 %v606_v41  ;;  %4280 = vmatprep.subr.mxu0 %v589_v43  ;;  %v640_v39 = vld [vmem:[#allocation2 + $0x1238] sm:$0xff]  ;;  %v655_v41 = vld [vmem:[#allocation2 + $0x12b0] sm:$0xff] }
 0x146   :  { %4315 = vmatprep.subr.mxu1 %v621_v44  ;;  %4281 = vmatpush3.msra.mxu0 %v573_v45  ;;  %v672_v40 = vld [vmem:[#allocation2 + $0x1338] sm:$0xff]  ;;  %v639_v43 = vld [vmem:[#allocation2 + $0x1230] sm:$0xff]  ;;  %v654_v45 = vld [vmem:[#allocation2 + $0x12a8] sm:$0xff] }
 0x147   :  { %4316 = vmatpush3.msra.mxu1 %v605_v46  ;;  %4282 = vmatprep.subr.mxu0 %v588_v47  ;;  %v671_v44 = vld [vmem:[#allocation2 + $0x1330] sm:$0xff]  ;;  %v686_v46 = vld [vmem:[#allocation2 + $0x13a8] sm:$0xff] }
 0x148   :  { %4317 = vmatprep.subr.mxu1 %v620_v48  ;;  %4283 = vmatpush3.msra.mxu0 %v572_v50  ;;  %v638_v47 = vld [vmem:[#allocation2 + $0x1228] sm:$0xff]  ;;  %v653_v50 = vld [vmem:[#allocation2 + $0x12a0] sm:$0xff] }
 0x149   :  { %4318 = vmatpush3.msra.mxu1 %v604_v52  ;;  %4284 = vmatprep.subr.mxu0 %v587_v53  ;;  %v670_v48 = vld [vmem:[#allocation2 + $0x1328] sm:$0xff]  ;;  %v685_v52 = vld [vmem:[#allocation2 + $0x13a0] sm:$0xff] }
 0x14a   :  { %4319 = vmatprep.subr.mxu1 %v619_v54  ;;  %4285 = vmatpush3.msra.mxu0 %v571_v56  ;;  %v637_v53 = vld [vmem:[#allocation2 + $0x1220] sm:$0xff]  ;;  %v684_v56 = vld [vmem:[#allocation2 + $0x1398] sm:$0xff] }
 0x14b   :  { %4320 = vmatpush3.msra.mxu1 %v603_v57  ;;  %4286 = vmatprep.subr.mxu0 %v586_v58  ;;  %v669_v54 = vld [vmem:[#allocation2 + $0x1320] sm:$0xff]  ;;  %v1257_v57 = vcombine.high %v50_v49, %v50_v49  ;;  %v636_v58 = vld [vmem:[#allocation2 + $0x1218] sm:$0xff] }
 0x14c   :  { %4321 = vmatprep.subr.mxu1 %v618_v59  ;;  %4287 = vmatpush3.msra.mxu0 %v570_v61  ;;  %v668_v59 = vld [vmem:[#allocation2 + $0x1318] sm:$0xff]  ;;  %v683_v61 = vld [vmem:[#allocation2 + $0x1390] sm:$0xff] }
 0x14d   :  { %4322 = vmatpush3.msra.mxu1 %v602_v62  ;;  %4288 = vmatprep.subr.mxu0 %v585_v63  ;;  %v1264_v62 = vrot.slane %v50_v49, %v4938_v51  ;;  %v635_v63 = vld [vmem:[#allocation2 + $0x1210] sm:$0xff] }
 0x14e   :  { %4323 = vmatprep.subr.mxu1 %v617_v0  ;;  %4289 = vmatpush3.msra.mxu0 %v569_v2  ;;  %v667_v0 = vld [vmem:[#allocation2 + $0x1310] sm:$0xff]  ;;  %v682_v2 = vld [vmem:[#allocation2 + $0x1388] sm:$0xff] }
 0x14f   :  { %2624 = vmatprep.mubr.f32.mxu0 %v1255_v1  ;;  %4324 = vmatpush3.msra.mxu1 %v601_v3  ;;  %v650_v1 = vld [vmem:[#allocation2 + $0x1288] sm:$0xff]  ;;  %v1271_v3 = vrot.slane %v1257_v57, %v4938_v51  ;;  %v751_v49 = vld [vmem:[#allocation2 + $0x15b0] sm:$0xff] }
 0x150   :  { %2625 = vmatmul.mubr.f32.vlgmr.msra.gmra.mxu0 %v1247_v55  ;;  %2694 = vmatprep.mubr.f32.mxu1 %v1256_v4  ;;  %v652_v55 = vld [vmem:[#allocation2 + $0x1298] sm:$0xff]  ;;  %v634_v4 = vld [vmem:[#allocation2 + $0x1208] sm:$0xff]  ;;  %v51_v57 = vld [vmem:[%s5023_s0 + $0x50] sm:$0xff] }
 0x151   :  { %4328 = vmatprep.subr.mxu0 %v664_v5  ;;  %4363 = vmatprep.subr.mxu1 %v696_v6  ;;  %v666_v5 = vld [vmem:[#allocation2 + $0x1308] sm:$0xff]  ;;  %v649_v6 = vld [vmem:[#allocation2 + $0x1280] sm:$0xff] }
 0x152   :  { %2695 = vmatmul.mubr.f32.vlgmr.msra.gmra.mxu1 %v1254_v60  ;;  %4329 = vmatpush3.msra.mxu0 %v648_v7  ;;  %v651_v60 = vld [vmem:[#allocation2 + $0x1290] sm:$0xff]  ;;  %v681_v7 = vld [vmem:[#allocation2 + $0x1380] sm:$0xff] }
 0x153   :  { %4364 = vmatpush3.msra.mxu1 %v680_v8  ;;  %4330 = vmatprep.subr.mxu0 %v663_v9  ;;  %v1272_v8 = vcombine.high %v1264_v62, %v1264_v62  ;;  %v633_v9 = vld [vmem:[#allocation2 + $0x1200] sm:$0xff] }
 0x154   :  { %4365 = vmatprep.subr.mxu1 %v695_v10  ;;  %4331 = vmatpush3.msra.mxu0 %v647_v11  ;;  %v665_v10 = vld [vmem:[#allocation2 + $0x1300] sm:$0xff]  ;;  %v1273_v11 = vcombine.high %v1271_v3, %v1271_v3 }
 0x155   :  { %4366 = vmatpush3.msra.mxu1 %v679_v12  ;;  %4332 = vmatprep.subr.mxu0 %v662_v13  ;;  %v728_v12 = vld [vmem:[#allocation2 + $0x14f8] sm:$0xff] }
 0x156   :  { %4367 = vmatprep.subr.mxu1 %v694_v14  ;;  %4333 = vmatpush3.msra.mxu0 %v646_v15  ;;  %v760_v13 = vld [vmem:[#allocation2 + $0x15f8] sm:$0xff] }
 0x157   :  { %4368 = vmatpush3.msra.mxu1 %v678_v16  ;;  %4334 = vmatprep.subr.mxu0 %v661_v17  ;;  %v712_v14 = vld [vmem:[#allocation2 + $0x1478] sm:$0xff]  ;;  %v727_v16 = vld [vmem:[#allocation2 + $0x14f0] sm:$0xff] }
 0x158   :  { %4369 = vmatprep.subr.mxu1 %v693_v18  ;;  %4335 = vmatpush3.msra.mxu0 %v645_v19  ;;  %v744_v15 = vld [vmem:[#allocation2 + $0x1578] sm:$0xff]  ;;  %v759_v17 = vld [vmem:[#allocation2 + $0x15f0] sm:$0xff] }
 0x159   :  { %4370 = vmatpush3.msra.mxu1 %v677_v20  ;;  %4336 = vmatprep.subr.mxu0 %v660_v21  ;;  %v711_v18 = vld [vmem:[#allocation2 + $0x1470] sm:$0xff]  ;;  %v726_v20 = vld [vmem:[#allocation2 + $0x14e8] sm:$0xff] }
 0x15a   :  { %4371 = vmatprep.subr.mxu1 %v692_v22  ;;  %4337 = vmatpush3.msra.mxu0 %v644_v23  ;;  %v743_v19 = vld [vmem:[#allocation2 + $0x1570] sm:$0xff]  ;;  %v758_v21 = vld [vmem:[#allocation2 + $0x15e8] sm:$0xff] }
 0x15b   :  { %4372 = vmatpush3.msra.mxu1 %v676_v24  ;;  %4338 = vmatprep.subr.mxu0 %v659_v25  ;;  %v710_v22 = vld [vmem:[#allocation2 + $0x1468] sm:$0xff]  ;;  %v725_v24 = vld [vmem:[#allocation2 + $0x14e0] sm:$0xff] }
 0x15c   :  { %4373 = vmatprep.subr.mxu1 %v691_v26  ;;  %4339 = vmatpush3.msra.mxu0 %v643_v27  ;;  %v742_v23 = vld [vmem:[#allocation2 + $0x1568] sm:$0xff]  ;;  %v757_v25 = vld [vmem:[#allocation2 + $0x15e0] sm:$0xff] }
 0x15d   :  { %4374 = vmatpush3.msra.mxu1 %v675_v28  ;;  %4340 = vmatprep.subr.mxu0 %v658_v29  ;;  %v709_v26 = vld [vmem:[#allocation2 + $0x1460] sm:$0xff]  ;;  %v724_v28 = vld [vmem:[#allocation2 + $0x14d8] sm:$0xff] }
 0x15e   :  { %4375 = vmatprep.subr.mxu1 %v690_v30  ;;  %4341 = vmatpush3.msra.mxu0 %v642_v31  ;;  %v741_v27 = vld [vmem:[#allocation2 + $0x1560] sm:$0xff]  ;;  %v756_v29 = vld [vmem:[#allocation2 + $0x15d8] sm:$0xff] }
 0x15f   :  { %4376 = vmatpush3.msra.mxu1 %v674_v32  ;;  %4342 = vmatprep.subr.mxu0 %v657_v33  ;;  %v708_v30 = vld [vmem:[#allocation2 + $0x1458] sm:$0xff]  ;;  %v723_v32 = vld [vmem:[#allocation2 + $0x14d0] sm:$0xff] }
 0x160   :  { %4377 = vmatprep.subr.mxu1 %v689_v34  ;;  %4343 = vmatpush3.msra.mxu0 %v641_v35  ;;  %v740_v31 = vld [vmem:[#allocation2 + $0x1558] sm:$0xff]  ;;  %v755_v33 = vld [vmem:[#allocation2 + $0x15d0] sm:$0xff] }
 0x161   :  { %4378 = vmatpush3.msra.mxu1 %v673_v36  ;;  %4344 = vmatprep.subr.mxu0 %v656_v37  ;;  %v707_v34 = vld [vmem:[#allocation2 + $0x1450] sm:$0xff]  ;;  %v722_v36 = vld [vmem:[#allocation2 + $0x14c8] sm:$0xff] }
 0x162   :  { %4379 = vmatprep.subr.mxu1 %v688_v38  ;;  %4345 = vmatpush3.msra.mxu0 %v640_v39  ;;  %v739_v35 = vld [vmem:[#allocation2 + $0x1550] sm:$0xff]  ;;  %v754_v37 = vld [vmem:[#allocation2 + $0x15c8] sm:$0xff] }
 0x163   :  { %4380 = vmatpush3.msra.mxu1 %v672_v40  ;;  %4346 = vmatprep.subr.mxu0 %v655_v41  ;;  %v706_v38 = vld [vmem:[#allocation2 + $0x1448] sm:$0xff]  ;;  %v721_v40 = vld [vmem:[#allocation2 + $0x14c0] sm:$0xff] }
 0x164   :  { %4381 = vmatprep.subr.mxu1 %v687_v42  ;;  %4347 = vmatpush3.msra.mxu0 %v639_v43  ;;  %v738_v39 = vld [vmem:[#allocation2 + $0x1548] sm:$0xff]  ;;  %v753_v41 = vld [vmem:[#allocation2 + $0x15c0] sm:$0xff] }
 0x165   :  { %4382 = vmatpush3.msra.mxu1 %v671_v44  ;;  %4348 = vmatprep.subr.mxu0 %v654_v45  ;;  %v705_v42 = vld [vmem:[#allocation2 + $0x1440] sm:$0xff]  ;;  %v720_v44 = vld [vmem:[#allocation2 + $0x14b8] sm:$0xff] }
 0x166   :  { %4383 = vmatprep.subr.mxu1 %v686_v46  ;;  %4349 = vmatpush3.msra.mxu0 %v638_v47  ;;  %v737_v43 = vld [vmem:[#allocation2 + $0x1540] sm:$0xff]  ;;  %v752_v45 = vld [vmem:[#allocation2 + $0x15b8] sm:$0xff] }
 0x167   :  { %4384 = vmatpush3.msra.mxu1 %v670_v48  ;;  %4350 = vmatprep.subr.mxu0 %v653_v50  ;;  %v704_v46 = vld [vmem:[#allocation2 + $0x1438] sm:$0xff]  ;;  %v719_v48 = vld [vmem:[#allocation2 + $0x14b0] sm:$0xff] }
 0x168   :  { %4385 = vmatprep.subr.mxu1 %v685_v52  ;;  %4351 = vmatpush3.msra.mxu0 %v637_v53  ;;  %v736_v47 = vld [vmem:[#allocation2 + $0x1538] sm:$0xff]  ;;  %v703_v50 = vld [vmem:[#allocation2 + $0x1430] sm:$0xff]  ;;  %v718_v53 = vld [vmem:[#allocation2 + $0x14a8] sm:$0xff] }
 0x169   :  { %4386 = vmatpush3.msra.mxu1 %v669_v54  ;;  %4352 = vmatprep.subr.mxu0 %v652_v55  ;;  %v735_v52 = vld [vmem:[#allocation2 + $0x1530] sm:$0xff]  ;;  %v750_v54 = vld [vmem:[#allocation2 + $0x15a8] sm:$0xff] }
 0x16a   :  { %4387 = vmatprep.subr.mxu1 %v684_v56  ;;  %4353 = vmatpush3.msra.mxu0 %v636_v58  ;;  %v702_v55 = vld [vmem:[#allocation2 + $0x1428] sm:$0xff]  ;;  %v717_v58 = vld [vmem:[#allocation2 + $0x14a0] sm:$0xff] }
 0x16b   :  { %4388 = vmatpush3.msra.mxu1 %v668_v59  ;;  %4354 = vmatprep.subr.mxu0 %v651_v60  ;;  %v734_v56 = vld [vmem:[#allocation2 + $0x1528] sm:$0xff]  ;;  %v749_v59 = vld [vmem:[#allocation2 + $0x15a0] sm:$0xff] }
 0x16c   :  { %4389 = vmatprep.subr.mxu1 %v683_v61  ;;  %4355 = vmatpush3.msra.mxu0 %v635_v63  ;;  %v701_v60 = vld [vmem:[#allocation2 + $0x1420] sm:$0xff]  ;;  %v748_v63 = vld [vmem:[#allocation2 + $0x1598] sm:$0xff] }
 0x16d   :  { %4390 = vmatpush3.msra.mxu1 %v667_v0  ;;  %4356 = vmatprep.subr.mxu0 %v650_v1  ;;  %v733_v61 = vld [vmem:[#allocation2 + $0x1520] sm:$0xff]  ;;  %v1274_v0 = vcombine.high %v51_v57, %v51_v57  ;;  %v700_v1 = vld [vmem:[#allocation2 + $0x1418] sm:$0xff] }
 0x16e   :  { %4391 = vmatprep.subr.mxu1 %v682_v2  ;;  %4357 = vmatpush3.msra.mxu0 %v634_v4  ;;  %v732_v2 = vld [vmem:[#allocation2 + $0x1518] sm:$0xff]  ;;  %v747_v4 = vld [vmem:[#allocation2 + $0x1590] sm:$0xff] }
 0x16f   :  { %4392 = vmatpush3.msra.mxu1 %v666_v5  ;;  %4358 = vmatprep.subr.mxu0 %v649_v6  ;;  %v1281_v5 = vrot.slane %v51_v57, %v4938_v51  ;;  %v699_v6 = vld [vmem:[#allocation2 + $0x1410] sm:$0xff] }
 0x170   :  { %4393 = vmatprep.subr.mxu1 %v681_v7  ;;  %4359 = vmatpush3.msra.mxu0 %v633_v9  ;;  %v731_v7 = vld [vmem:[#allocation2 + $0x1510] sm:$0xff]  ;;  %v746_v9 = vld [vmem:[#allocation2 + $0x1588] sm:$0xff] }
 0x171   :  { %2764 = vmatprep.mubr.f32.mxu0 %v1272_v8  ;;  %4394 = vmatpush3.msra.mxu1 %v665_v10  ;;  %v714_v8 = vld [vmem:[#allocation2 + $0x1488] sm:$0xff]  ;;  %v1288_v10 = vrot.slane %v1274_v0, %v4938_v51  ;;  %v815_v57 = vld [vmem:[#allocation2 + $0x17b0] sm:$0xff]  ;;  %v52_v0 = vld [vmem:[%s5023_s0 + $0x58] sm:$0xff] }
 0x172   :  { %2765 = vmatmul.mubr.f32.vlgmr.msra.gmra.mxu0 %v1264_v62  ;;  %2834 = vmatprep.mubr.f32.mxu1 %v1273_v11  ;;  %v716_v62 = vld [vmem:[#allocation2 + $0x1498] sm:$0xff]  ;;  %v698_v11 = vld [vmem:[#allocation2 + $0x1408] sm:$0xff] }
 0x173   :  { %4398 = vmatprep.subr.mxu0 %v728_v12  ;;  %4433 = vmatprep.subr.mxu1 %v760_v13  ;;  %v730_v12 = vld [vmem:[#allocation2 + $0x1508] sm:$0xff]  ;;  %v713_v13 = vld [vmem:[#allocation2 + $0x1480] sm:$0xff] }
 0x174   :  { %2835 = vmatmul.mubr.f32.vlgmr.msra.gmra.mxu1 %v1271_v3  ;;  %4399 = vmatpush3.msra.mxu0 %v712_v14  ;;  %v715_v3 = vld [vmem:[#allocation2 + $0x1490] sm:$0xff]  ;;  %v745_v14 = vld [vmem:[#allocation2 + $0x1580] sm:$0xff] }
 0x175   :  { %4434 = vmatpush3.msra.mxu1 %v744_v15  ;;  %4400 = vmatprep.subr.mxu0 %v727_v16  ;;  %v1289_v15 = vcombine.high %v1281_v5, %v1281_v5  ;;  %v697_v16 = vld [vmem:[#allocation2 + $0x1400] sm:$0xff] }
 0x176   :  { %4435 = vmatprep.subr.mxu1 %v759_v17  ;;  %4401 = vmatpush3.msra.mxu0 %v711_v18  ;;  %v729_v17 = vld [vmem:[#allocation2 + $0x1500] sm:$0xff]  ;;  %v1290_v18 = vcombine.high %v1288_v10, %v1288_v10 }
 0x177   :  { %4436 = vmatpush3.msra.mxu1 %v743_v19  ;;  %4402 = vmatprep.subr.mxu0 %v726_v20  ;;  %v792_v19 = vld [vmem:[#allocation2 + $0x16f8] sm:$0xff] }
 0x178   :  { %4437 = vmatprep.subr.mxu1 %v758_v21  ;;  %4403 = vmatpush3.msra.mxu0 %v710_v22  ;;  %v824_v20 = vld [vmem:[#allocation2 + $0x17f8] sm:$0xff] }
 0x179   :  { %4438 = vmatpush3.msra.mxu1 %v742_v23  ;;  %4404 = vmatprep.subr.mxu0 %v725_v24  ;;  %v776_v21 = vld [vmem:[#allocation2 + $0x1678] sm:$0xff]  ;;  %v791_v23 = vld [vmem:[#allocation2 + $0x16f0] sm:$0xff] }
 0x17a   :  { %4439 = vmatprep.subr.mxu1 %v757_v25  ;;  %4405 = vmatpush3.msra.mxu0 %v709_v26  ;;  %v808_v22 = vld [vmem:[#allocation2 + $0x1778] sm:$0xff]  ;;  %v823_v24 = vld [vmem:[#allocation2 + $0x17f0] sm:$0xff] }
 0x17b   :  { %4440 = vmatpush3.msra.mxu1 %v741_v27  ;;  %4406 = vmatprep.subr.mxu0 %v724_v28  ;;  %v775_v25 = vld [vmem:[#allocation2 + $0x1670] sm:$0xff]  ;;  %v790_v27 = vld [vmem:[#allocation2 + $0x16e8] sm:$0xff] }
 0x17c   :  { %4441 = vmatprep.subr.mxu1 %v756_v29  ;;  %4407 = vmatpush3.msra.mxu0 %v708_v30  ;;  %v807_v26 = vld [vmem:[#allocation2 + $0x1770] sm:$0xff]  ;;  %v822_v28 = vld [vmem:[#allocation2 + $0x17e8] sm:$0xff] }
 0x17d   :  { %4442 = vmatpush3.msra.mxu1 %v740_v31  ;;  %4408 = vmatprep.subr.mxu0 %v723_v32  ;;  %v774_v29 = vld [vmem:[#allocation2 + $0x1668] sm:$0xff]  ;;  %v789_v31 = vld [vmem:[#allocation2 + $0x16e0] sm:$0xff] }
 0x17e   :  { %4443 = vmatprep.subr.mxu1 %v755_v33  ;;  %4409 = vmatpush3.msra.mxu0 %v707_v34  ;;  %v806_v30 = vld [vmem:[#allocation2 + $0x1768] sm:$0xff]  ;;  %v821_v32 = vld [vmem:[#allocation2 + $0x17e0] sm:$0xff] }
 0x17f   :  { %4444 = vmatpush3.msra.mxu1 %v739_v35  ;;  %4410 = vmatprep.subr.mxu0 %v722_v36  ;;  %v773_v33 = vld [vmem:[#allocation2 + $0x1660] sm:$0xff]  ;;  %v788_v35 = vld [vmem:[#allocation2 + $0x16d8] sm:$0xff] }
 0x180   :  { %4445 = vmatprep.subr.mxu1 %v754_v37  ;;  %4411 = vmatpush3.msra.mxu0 %v706_v38  ;;  %v805_v34 = vld [vmem:[#allocation2 + $0x1760] sm:$0xff]  ;;  %v820_v36 = vld [vmem:[#allocation2 + $0x17d8] sm:$0xff] }
 0x181   :  { %4446 = vmatpush3.msra.mxu1 %v738_v39  ;;  %4412 = vmatprep.subr.mxu0 %v721_v40  ;;  %v772_v37 = vld [vmem:[#allocation2 + $0x1658] sm:$0xff]  ;;  %v787_v39 = vld [vmem:[#allocation2 + $0x16d0] sm:$0xff] }
 0x182   :  { %4447 = vmatprep.subr.mxu1 %v753_v41  ;;  %4413 = vmatpush3.msra.mxu0 %v705_v42  ;;  %v804_v38 = vld [vmem:[#allocation2 + $0x1758] sm:$0xff]  ;;  %v819_v40 = vld [vmem:[#allocation2 + $0x17d0] sm:$0xff] }
 0x183   :  { %4448 = vmatpush3.msra.mxu1 %v737_v43  ;;  %4414 = vmatprep.subr.mxu0 %v720_v44  ;;  %v771_v41 = vld [vmem:[#allocation2 + $0x1650] sm:$0xff]  ;;  %v786_v43 = vld [vmem:[#allocation2 + $0x16c8] sm:$0xff] }
 0x184   :  { %4449 = vmatprep.subr.mxu1 %v752_v45  ;;  %4415 = vmatpush3.msra.mxu0 %v704_v46  ;;  %v803_v42 = vld [vmem:[#allocation2 + $0x1750] sm:$0xff]  ;;  %v818_v44 = vld [vmem:[#allocation2 + $0x17c8] sm:$0xff] }
 0x185   :  { %4450 = vmatpush3.msra.mxu1 %v736_v47  ;;  %4416 = vmatprep.subr.mxu0 %v719_v48  ;;  %v770_v45 = vld [vmem:[#allocation2 + $0x1648] sm:$0xff]  ;;  %v785_v47 = vld [vmem:[#allocation2 + $0x16c0] sm:$0xff] }
 0x186   :  { %4451 = vmatprep.subr.mxu1 %v751_v49  ;;  %4417 = vmatpush3.msra.mxu0 %v703_v50  ;;  %v802_v46 = vld [vmem:[#allocation2 + $0x1748] sm:$0xff]  ;;  %v817_v48 = vld [vmem:[#allocation2 + $0x17c0] sm:$0xff] }
 0x187   :  { %4452 = vmatpush3.msra.mxu1 %v735_v52  ;;  %4418 = vmatprep.subr.mxu0 %v718_v53  ;;  %v769_v49 = vld [vmem:[#allocation2 + $0x1640] sm:$0xff]  ;;  %v784_v52 = vld [vmem:[#allocation2 + $0x16b8] sm:$0xff] }
 0x188   :  { %4453 = vmatprep.subr.mxu1 %v750_v54  ;;  %4419 = vmatpush3.msra.mxu0 %v702_v55  ;;  %v801_v50 = vld [vmem:[#allocation2 + $0x1740] sm:$0xff]  ;;  %v816_v53 = vld [vmem:[#allocation2 + $0x17b8] sm:$0xff] }
 0x189   :  { %4454 = vmatpush3.msra.mxu1 %v734_v56  ;;  %4420 = vmatprep.subr.mxu0 %v717_v58  ;;  %v768_v54 = vld [vmem:[#allocation2 + $0x1638] sm:$0xff]  ;;  %v783_v56 = vld [vmem:[#allocation2 + $0x16b0] sm:$0xff] }
 0x18a   :  { %4455 = vmatprep.subr.mxu1 %v749_v59  ;;  %4421 = vmatpush3.msra.mxu0 %v701_v60  ;;  %v800_v55 = vld [vmem:[#allocation2 + $0x1738] sm:$0xff]  ;;  %v767_v58 = vld [vmem:[#allocation2 + $0x1630] sm:$0xff]  ;;  %v782_v60 = vld [vmem:[#allocation2 + $0x16a8] sm:$0xff] }
 0x18b   :  { %4456 = vmatpush3.msra.mxu1 %v733_v61  ;;  %4422 = vmatprep.subr.mxu0 %v716_v62  ;;  %v799_v59 = vld [vmem:[#allocation2 + $0x1730] sm:$0xff]  ;;  %v814_v61 = vld [vmem:[#allocation2 + $0x17a8] sm:$0xff] }
 0x18c   :  { %4457 = vmatprep.subr.mxu1 %v748_v63  ;;  %4423 = vmatpush3.msra.mxu0 %v700_v1  ;;  %v766_v62 = vld [vmem:[#allocation2 + $0x1628] sm:$0xff]  ;;  %v781_v1 = vld [vmem:[#allocation2 + $0x16a0] sm:$0xff] }
 0x18d   :  { %4458 = vmatpush3.msra.mxu1 %v732_v2  ;;  %4424 = vmatprep.subr.mxu0 %v715_v3  ;;  %v798_v63 = vld [vmem:[#allocation2 + $0x1728] sm:$0xff]  ;;  %v813_v2 = vld [vmem:[#allocation2 + $0x17a0] sm:$0xff] }
 0x18e   :  { %4459 = vmatprep.subr.mxu1 %v747_v4  ;;  %4425 = vmatpush3.msra.mxu0 %v699_v6  ;;  %v765_v3 = vld [vmem:[#allocation2 + $0x1620] sm:$0xff]  ;;  %v812_v6 = vld [vmem:[#allocation2 + $0x1798] sm:$0xff] }
 0x18f   :  { %4460 = vmatpush3.msra.mxu1 %v731_v7  ;;  %4426 = vmatprep.subr.mxu0 %v714_v8  ;;  %v797_v4 = vld [vmem:[#allocation2 + $0x1720] sm:$0xff]  ;;  %v1291_v7 = vcombine.high %v52_v0, %v52_v0  ;;  %v764_v8 = vld [vmem:[#allocation2 + $0x1618] sm:$0xff] }
 0x190   :  { %4461 = vmatprep.subr.mxu1 %v746_v9  ;;  %4427 = vmatpush3.msra.mxu0 %v698_v11  ;;  %v796_v9 = vld [vmem:[#allocation2 + $0x1718] sm:$0xff]  ;;  %v811_v11 = vld [vmem:[#allocation2 + $0x1790] sm:$0xff] }
 0x191   :  { %4462 = vmatpush3.msra.mxu1 %v730_v12  ;;  %4428 = vmatprep.subr.mxu0 %v713_v13  ;;  %v1298_v12 = vrot.slane %v52_v0, %v4938_v51  ;;  %v763_v13 = vld [vmem:[#allocation2 + $0x1610] sm:$0xff] }
 0x192   :  { %4463 = vmatprep.subr.mxu1 %v745_v14  ;;  %4429 = vmatpush3.msra.mxu0 %v697_v16  ;;  %v795_v14 = vld [vmem:[#allocation2 + $0x1710] sm:$0xff]  ;;  %v810_v16 = vld [vmem:[#allocation2 + $0x1788] sm:$0xff] }
 0x193   :  { %2904 = vmatprep.mubr.f32.mxu0 %v1289_v15  ;;  %4464 = vmatpush3.msra.mxu1 %v729_v17  ;;  %v778_v15 = vld [vmem:[#allocation2 + $0x1688] sm:$0xff]  ;;  %v1305_v17 = vrot.slane %v1291_v7, %v4938_v51  ;;  %v879_v0 = vld [vmem:[#allocation2 + $0x19b0] sm:$0xff]  ;;  %v53_v7 = vld [vmem:[%s5023_s0 + $0x60] sm:$0xff] }
 0x194   :  { %2905 = vmatmul.mubr.f32.vlgmr.msra.gmra.mxu0 %v1281_v5  ;;  %2974 = vmatprep.mubr.f32.mxu1 %v1290_v18  ;;  %v780_v5 = vld [vmem:[#allocation2 + $0x1698] sm:$0xff]  ;;  %v762_v18 = vld [vmem:[#allocation2 + $0x1608] sm:$0xff] }
 0x195   :  { %4468 = vmatprep.subr.mxu0 %v792_v19  ;;  %4503 = vmatprep.subr.mxu1 %v824_v20  ;;  %v794_v19 = vld [vmem:[#allocation2 + $0x1708] sm:$0xff]  ;;  %v777_v20 = vld [vmem:[#allocation2 + $0x1680] sm:$0xff] }
 0x196   :  { %2975 = vmatmul.mubr.f32.vlgmr.msra.gmra.mxu1 %v1288_v10  ;;  %4469 = vmatpush3.msra.mxu0 %v776_v21  ;;  %v779_v10 = vld [vmem:[#allocation2 + $0x1690] sm:$0xff]  ;;  %v809_v21 = vld [vmem:[#allocation2 + $0x1780] sm:$0xff] }
 0x197   :  { %4504 = vmatpush3.msra.mxu1 %v808_v22  ;;  %4470 = vmatprep.subr.mxu0 %v791_v23  ;;  %v1306_v22 = vcombine.high %v1298_v12, %v1298_v12  ;;  %v761_v23 = vld [vmem:[#allocation2 + $0x1600] sm:$0xff] }
 0x198   :  { %4505 = vmatprep.subr.mxu1 %v823_v24  ;;  %4471 = vmatpush3.msra.mxu0 %v775_v25  ;;  %v793_v24 = vld [vmem:[#allocation2 + $0x1700] sm:$0xff]  ;;  %v1307_v25 = vcombine.high %v1305_v17, %v1305_v17 }
 0x199   :  { %4506 = vmatpush3.msra.mxu1 %v807_v26  ;;  %4472 = vmatprep.subr.mxu0 %v790_v27  ;;  %v856_v26 = vld [vmem:[#allocation2 + $0x18f8] sm:$0xff] }
 0x19a   :  { %4507 = vmatprep.subr.mxu1 %v822_v28  ;;  %4473 = vmatpush3.msra.mxu0 %v774_v29  ;;  %v888_v27 = vld [vmem:[#allocation2 + $0x19f8] sm:$0xff] }
 0x19b   :  { %4508 = vmatpush3.msra.mxu1 %v806_v30  ;;  %4474 = vmatprep.subr.mxu0 %v789_v31  ;;  %v840_v28 = vld [vmem:[#allocation2 + $0x1878] sm:$0xff]  ;;  %v855_v30 = vld [vmem:[#allocation2 + $0x18f0] sm:$0xff] }
 0x19c   :  { %4509 = vmatprep.subr.mxu1 %v821_v32  ;;  %4475 = vmatpush3.msra.mxu0 %v773_v33  ;;  %v872_v29 = vld [vmem:[#allocation2 + $0x1978] sm:$0xff]  ;;  %v887_v31 = vld [vmem:[#allocation2 + $0x19f0] sm:$0xff] }
 0x19d   :  { %4510 = vmatpush3.msra.mxu1 %v805_v34  ;;  %4476 = vmatprep.subr.mxu0 %v788_v35  ;;  %v839_v32 = vld [vmem:[#allocation2 + $0x1870] sm:$0xff]  ;;  %v854_v34 = vld [vmem:[#allocation2 + $0x18e8] sm:$0xff] }
 0x19e   :  { %4511 = vmatprep.subr.mxu1 %v820_v36  ;;  %4477 = vmatpush3.msra.mxu0 %v772_v37  ;;  %v871_v33 = vld [vmem:[#allocation2 + $0x1970] sm:$0xff]  ;;  %v886_v35 = vld [vmem:[#allocation2 + $0x19e8] sm:$0xff] }
 0x19f   :  { %4512 = vmatpush3.msra.mxu1 %v804_v38  ;;  %4478 = vmatprep.subr.mxu0 %v787_v39  ;;  %v838_v36 = vld [vmem:[#allocation2 + $0x1868] sm:$0xff]  ;;  %v853_v38 = vld [vmem:[#allocation2 + $0x18e0] sm:$0xff] }
 0x1a0   :  { %4513 = vmatprep.subr.mxu1 %v819_v40  ;;  %4479 = vmatpush3.msra.mxu0 %v771_v41  ;;  %v870_v37 = vld [vmem:[#allocation2 + $0x1968] sm:$0xff]  ;;  %v885_v39 = vld [vmem:[#allocation2 + $0x19e0] sm:$0xff] }
 0x1a1   :  { %4514 = vmatpush3.msra.mxu1 %v803_v42  ;;  %4480 = vmatprep.subr.mxu0 %v786_v43  ;;  %v837_v40 = vld [vmem:[#allocation2 + $0x1860] sm:$0xff]  ;;  %v852_v42 = vld [vmem:[#allocation2 + $0x18d8] sm:$0xff] }
 0x1a2   :  { %4515 = vmatprep.subr.mxu1 %v818_v44  ;;  %4481 = vmatpush3.msra.mxu0 %v770_v45  ;;  %v869_v41 = vld [vmem:[#allocation2 + $0x1960] sm:$0xff]  ;;  %v884_v43 = vld [vmem:[#allocation2 + $0x19d8] sm:$0xff] }
 0x1a3   :  { %4516 = vmatpush3.msra.mxu1 %v802_v46  ;;  %4482 = vmatprep.subr.mxu0 %v785_v47  ;;  %v836_v44 = vld [vmem:[#allocation2 + $0x1858] sm:$0xff]  ;;  %v851_v46 = vld [vmem:[#allocation2 + $0x18d0] sm:$0xff] }
 0x1a4   :  { %4517 = vmatprep.subr.mxu1 %v817_v48  ;;  %4483 = vmatpush3.msra.mxu0 %v769_v49  ;;  %v868_v45 = vld [vmem:[#allocation2 + $0x1958] sm:$0xff]  ;;  %v883_v47 = vld [vmem:[#allocation2 + $0x19d0] sm:$0xff] }
 0x1a5   :  { %4518 = vmatpush3.msra.mxu1 %v801_v50  ;;  %4484 = vmatprep.subr.mxu0 %v784_v52  ;;  %v835_v48 = vld [vmem:[#allocation2 + $0x1850] sm:$0xff]  ;;  %v850_v50 = vld [vmem:[#allocation2 + $0x18c8] sm:$0xff] }
 0x1a6   :  { %4519 = vmatprep.subr.mxu1 %v816_v53  ;;  %4485 = vmatpush3.msra.mxu0 %v768_v54  ;;  %v867_v49 = vld [vmem:[#allocation2 + $0x1950] sm:$0xff]  ;;  %v882_v52 = vld [vmem:[#allocation2 + $0x19c8] sm:$0xff] }
 0x1a7   :  { %4520 = vmatpush3.msra.mxu1 %v800_v55  ;;  %4486 = vmatprep.subr.mxu0 %v783_v56  ;;  %v834_v53 = vld [vmem:[#allocation2 + $0x1848] sm:$0xff]  ;;  %v849_v55 = vld [vmem:[#allocation2 + $0x18c0] sm:$0xff] }
 0x1a8   :  { %4521 = vmatprep.subr.mxu1 %v815_v57  ;;  %4487 = vmatpush3.msra.mxu0 %v767_v58  ;;  %v866_v54 = vld [vmem:[#allocation2 + $0x1948] sm:$0xff]  ;;  %v881_v56 = vld [vmem:[#allocation2 + $0x19c0] sm:$0xff] }
 0x1a9   :  { %4522 = vmatpush3.msra.mxu1 %v799_v59  ;;  %4488 = vmatprep.subr.mxu0 %v782_v60  ;;  %v833_v57 = vld [vmem:[#allocation2 + $0x1840] sm:$0xff]  ;;  %v848_v59 = vld [vmem:[#allocation2 + $0x18b8] sm:$0xff] }
 0x1aa   :  { %4523 = vmatprep.subr.mxu1 %v814_v61  ;;  %4489 = vmatpush3.msra.mxu0 %v766_v62  ;;  %v865_v58 = vld [vmem:[#allocation2 + $0x1940] sm:$0xff]  ;;  %v880_v60 = vld [vmem:[#allocation2 + $0x19b8] sm:$0xff] }
 0x1ab   :  { %4524 = vmatpush3.msra.mxu1 %v798_v63  ;;  %4490 = vmatprep.subr.mxu0 %v781_v1  ;;  %v832_v61 = vld [vmem:[#allocation2 + $0x1838] sm:$0xff]  ;;  %v847_v63 = vld [vmem:[#allocation2 + $0x18b0] sm:$0xff] }
 0x1ac   :  { %4525 = vmatprep.subr.mxu1 %v813_v2  ;;  %4491 = vmatpush3.msra.mxu0 %v765_v3  ;;  %v864_v62 = vld [vmem:[#allocation2 + $0x1938] sm:$0xff]  ;;  %v831_v1 = vld [vmem:[#allocation2 + $0x1830] sm:$0xff]  ;;  %v846_v3 = vld [vmem:[#allocation2 + $0x18a8] sm:$0xff] }
 0x1ad   :  { %4526 = vmatpush3.msra.mxu1 %v797_v4  ;;  %4492 = vmatprep.subr.mxu0 %v780_v5  ;;  %v863_v2 = vld [vmem:[#allocation2 + $0x1930] sm:$0xff]  ;;  %v878_v4 = vld [vmem:[#allocation2 + $0x19a8] sm:$0xff] }
 0x1ae   :  { %4527 = vmatprep.subr.mxu1 %v812_v6  ;;  %4493 = vmatpush3.msra.mxu0 %v764_v8  ;;  %v830_v5 = vld [vmem:[#allocation2 + $0x1828] sm:$0xff]  ;;  %v845_v8 = vld [vmem:[#allocation2 + $0x18a0] sm:$0xff] }
 0x1af   :  { %4528 = vmatpush3.msra.mxu1 %v796_v9  ;;  %4494 = vmatprep.subr.mxu0 %v779_v10  ;;  %v862_v6 = vld [vmem:[#allocation2 + $0x1928] sm:$0xff]  ;;  %v877_v9 = vld [vmem:[#allocation2 + $0x19a0] sm:$0xff] }
 0x1b0   :  { %4529 = vmatprep.subr.mxu1 %v811_v11  ;;  %4495 = vmatpush3.msra.mxu0 %v763_v13  ;;  %v829_v10 = vld [vmem:[#allocation2 + $0x1820] sm:$0xff]  ;;  %v876_v13 = vld [vmem:[#allocation2 + $0x1998] sm:$0xff] }
 0x1b1   :  { %4530 = vmatpush3.msra.mxu1 %v795_v14  ;;  %4496 = vmatprep.subr.mxu0 %v778_v15  ;;  %v861_v11 = vld [vmem:[#allocation2 + $0x1920] sm:$0xff]  ;;  %v1308_v14 = vcombine.high %v53_v7, %v53_v7  ;;  %v828_v15 = vld [vmem:[#allocation2 + $0x1818] sm:$0xff] }
 0x1b2   :  { %4531 = vmatprep.subr.mxu1 %v810_v16  ;;  %4497 = vmatpush3.msra.mxu0 %v762_v18  ;;  %v860_v16 = vld [vmem:[#allocation2 + $0x1918] sm:$0xff]  ;;  %v875_v18 = vld [vmem:[#allocation2 + $0x1990] sm:$0xff] }
 0x1b3   :  { %4532 = vmatpush3.msra.mxu1 %v794_v19  ;;  %4498 = vmatprep.subr.mxu0 %v777_v20  ;;  %v1315_v19 = vrot.slane %v53_v7, %v4938_v51  ;;  %v827_v20 = vld [vmem:[#allocation2 + $0x1810] sm:$0xff] }
 0x1b4   :  { %4533 = vmatprep.subr.mxu1 %v809_v21  ;;  %4499 = vmatpush3.msra.mxu0 %v761_v23  ;;  %v859_v21 = vld [vmem:[#allocation2 + $0x1910] sm:$0xff]  ;;  %v874_v23 = vld [vmem:[#allocation2 + $0x1988] sm:$0xff] }
 0x1b5   :  { %3044 = vmatprep.mubr.f32.mxu0 %v1306_v22  ;;  %4534 = vmatpush3.msra.mxu1 %v793_v24  ;;  %v842_v22 = vld [vmem:[#allocation2 + $0x1888] sm:$0xff]  ;;  %v1322_v24 = vrot.slane %v1308_v14, %v4938_v51  ;;  %v943_v7 = vld [vmem:[#allocation2 + $0x1bb0] sm:$0xff] }
 0x1b6   :  { %3045 = vmatmul.mubr.f32.vlgmr.msra.gmra.mxu0 %v1298_v12  ;;  %3114 = vmatprep.mubr.f32.mxu1 %v1307_v25  ;;  %v844_v12 = vld [vmem:[#allocation2 + $0x1898] sm:$0xff]  ;;  %v826_v25 = vld [vmem:[#allocation2 + $0x1808] sm:$0xff] }
 0x1b7   :  { %4538 = vmatprep.subr.mxu0 %v856_v26  ;;  %4573 = vmatprep.subr.mxu1 %v888_v27  ;;  %v858_v26 = vld [vmem:[#allocation2 + $0x1908] sm:$0xff]  ;;  %v841_v27 = vld [vmem:[#allocation2 + $0x1880] sm:$0xff] }
 0x1b8   :  { %3115 = vmatmul.mubr.f32.vlgmr.msra.gmra.mxu1 %v1305_v17  ;;  %4539 = vmatpush3.msra.mxu0 %v840_v28  ;;  %v843_v17 = vld [vmem:[#allocation2 + $0x1890] sm:$0xff]  ;;  %v873_v28 = vld [vmem:[#allocation2 + $0x1980] sm:$0xff]  ;;  %v54_v14 = vld [vmem:[%s5023_s0 + $0x68] sm:$0xff] }
 0x1b9   :  { %4574 = vmatpush3.msra.mxu1 %v872_v29  ;;  %4540 = vmatprep.subr.mxu0 %v855_v30  ;;  %v1323_v29 = vcombine.high %v1315_v19, %v1315_v19  ;;  %v825_v30 = vld [vmem:[#allocation2 + $0x1800] sm:$0xff] }
 0x1ba   :  { %4575 = vmatprep.subr.mxu1 %v887_v31  ;;  %4541 = vmatpush3.msra.mxu0 %v839_v32  ;;  %v857_v31 = vld [vmem:[#allocation2 + $0x1900] sm:$0xff]  ;;  %v1324_v32 = vcombine.high %v1322_v24, %v1322_v24 }
 0x1bb   :  { %4576 = vmatpush3.msra.mxu1 %v871_v33  ;;  %4542 = vmatprep.subr.mxu0 %v854_v34  ;;  %v920_v33 = vld [vmem:[#allocation2 + $0x1af8] sm:$0xff] }
 0x1bc   :  { %4577 = vmatprep.subr.mxu1 %v886_v35  ;;  %4543 = vmatpush3.msra.mxu0 %v838_v36  ;;  %v952_v34 = vld [vmem:[#allocation2 + $0x1bf8] sm:$0xff] }
 0x1bd   :  { %4578 = vmatpush3.msra.mxu1 %v870_v37  ;;  %4544 = vmatprep.subr.mxu0 %v853_v38  ;;  %v904_v35 = vld [vmem:[#allocation2 + $0x1a78] sm:$0xff]  ;;  %v919_v37 = vld [vmem:[#allocation2 + $0x1af0] sm:$0xff] }
 0x1be   :  { %4579 = vmatprep.subr.mxu1 %v885_v39  ;;  %4545 = vmatpush3.msra.mxu0 %v837_v40  ;;  %v936_v36 = vld [vmem:[#allocation2 + $0x1b78] sm:$0xff]  ;;  %v951_v38 = vld [vmem:[#allocation2 + $0x1bf0] sm:$0xff] }
 0x1bf   :  { %4580 = vmatpush3.msra.mxu1 %v869_v41  ;;  %4546 = vmatprep.subr.mxu0 %v852_v42  ;;  %v903_v39 = vld [vmem:[#allocation2 + $0x1a70] sm:$0xff]  ;;  %v918_v41 = vld [vmem:[#allocation2 + $0x1ae8] sm:$0xff] }
 0x1c0   :  { %4581 = vmatprep.subr.mxu1 %v884_v43  ;;  %4547 = vmatpush3.msra.mxu0 %v836_v44  ;;  %v935_v40 = vld [vmem:[#allocation2 + $0x1b70] sm:$0xff]  ;;  %v950_v42 = vld [vmem:[#allocation2 + $0x1be8] sm:$0xff] }
 0x1c1   :  { %4582 = vmatpush3.msra.mxu1 %v868_v45  ;;  %4548 = vmatprep.subr.mxu0 %v851_v46  ;;  %v902_v43 = vld [vmem:[#allocation2 + $0x1a68] sm:$0xff]  ;;  %v917_v45 = vld [vmem:[#allocation2 + $0x1ae0] sm:$0xff] }
 0x1c2   :  { %4583 = vmatprep.subr.mxu1 %v883_v47  ;;  %4549 = vmatpush3.msra.mxu0 %v835_v48  ;;  %v934_v44 = vld [vmem:[#allocation2 + $0x1b68] sm:$0xff]  ;;  %v949_v46 = vld [vmem:[#allocation2 + $0x1be0] sm:$0xff] }
 0x1c3   :  { %4584 = vmatpush3.msra.mxu1 %v867_v49  ;;  %4550 = vmatprep.subr.mxu0 %v850_v50  ;;  %v901_v47 = vld [vmem:[#allocation2 + $0x1a60] sm:$0xff]  ;;  %v916_v49 = vld [vmem:[#allocation2 + $0x1ad8] sm:$0xff] }
 0x1c4   :  { %4585 = vmatprep.subr.mxu1 %v882_v52  ;;  %4551 = vmatpush3.msra.mxu0 %v834_v53  ;;  %v933_v48 = vld [vmem:[#allocation2 + $0x1b60] sm:$0xff]  ;;  %v948_v50 = vld [vmem:[#allocation2 + $0x1bd8] sm:$0xff] }
 0x1c5   :  { %4586 = vmatpush3.msra.mxu1 %v866_v54  ;;  %4552 = vmatprep.subr.mxu0 %v849_v55  ;;  %v900_v52 = vld [vmem:[#allocation2 + $0x1a58] sm:$0xff]  ;;  %v915_v54 = vld [vmem:[#allocation2 + $0x1ad0] sm:$0xff] }
 0x1c6   :  { %4587 = vmatprep.subr.mxu1 %v881_v56  ;;  %4553 = vmatpush3.msra.mxu0 %v833_v57  ;;  %v932_v53 = vld [vmem:[#allocation2 + $0x1b58] sm:$0xff]  ;;  %v947_v55 = vld [vmem:[#allocation2 + $0x1bd0] sm:$0xff] }
 0x1c7   :  { %4588 = vmatpush3.msra.mxu1 %v865_v58  ;;  %4554 = vmatprep.subr.mxu0 %v848_v59  ;;  %v899_v56 = vld [vmem:[#allocation2 + $0x1a50] sm:$0xff]  ;;  %v914_v58 = vld [vmem:[#allocation2 + $0x1ac8] sm:$0xff] }
 0x1c8   :  { %4589 = vmatprep.subr.mxu1 %v880_v60  ;;  %4555 = vmatpush3.msra.mxu0 %v832_v61  ;;  %v931_v57 = vld [vmem:[#allocation2 + $0x1b50] sm:$0xff]  ;;  %v946_v59 = vld [vmem:[#allocation2 + $0x1bc8] sm:$0xff] }
 0x1c9   :  { %4590 = vmatpush3.msra.mxu1 %v864_v62  ;;  %4556 = vmatprep.subr.mxu0 %v847_v63  ;;  %v898_v60 = vld [vmem:[#allocation2 + $0x1a48] sm:$0xff]  ;;  %v913_v62 = vld [vmem:[#allocation2 + $0x1ac0] sm:$0xff] }
 0x1ca   :  { %4591 = vmatprep.subr.mxu1 %v879_v0  ;;  %4557 = vmatpush3.msra.mxu0 %v831_v1  ;;  %v930_v61 = vld [vmem:[#allocation2 + $0x1b48] sm:$0xff]  ;;  %v945_v63 = vld [vmem:[#allocation2 + $0x1bc0] sm:$0xff] }
 0x1cb   :  { %4592 = vmatpush3.msra.mxu1 %v863_v2  ;;  %4558 = vmatprep.subr.mxu0 %v846_v3  ;;  %v897_v0 = vld [vmem:[#allocation2 + $0x1a40] sm:$0xff]  ;;  %v912_v2 = vld [vmem:[#allocation2 + $0x1ab8] sm:$0xff] }
 0x1cc   :  { %4593 = vmatprep.subr.mxu1 %v878_v4  ;;  %4559 = vmatpush3.msra.mxu0 %v830_v5  ;;  %v929_v1 = vld [vmem:[#allocation2 + $0x1b40] sm:$0xff]  ;;  %v944_v3 = vld [vmem:[#allocation2 + $0x1bb8] sm:$0xff] }
 0x1cd   :  { %4594 = vmatpush3.msra.mxu1 %v862_v6  ;;  %4560 = vmatprep.subr.mxu0 %v845_v8  ;;  %v896_v4 = vld [vmem:[#allocation2 + $0x1a38] sm:$0xff]  ;;  %v911_v6 = vld [vmem:[#allocation2 + $0x1ab0] sm:$0xff] }
 0x1ce   :  { %4595 = vmatprep.subr.mxu1 %v877_v9  ;;  %4561 = vmatpush3.msra.mxu0 %v829_v10  ;;  %v928_v5 = vld [vmem:[#allocation2 + $0x1b38] sm:$0xff]  ;;  %v895_v8 = vld [vmem:[#allocation2 + $0x1a30] sm:$0xff]  ;;  %v910_v10 = vld [vmem:[#allocation2 + $0x1aa8] sm:$0xff] }
 0x1cf   :  { %4596 = vmatpush3.msra.mxu1 %v861_v11  ;;  %4562 = vmatprep.subr.mxu0 %v844_v12  ;;  %v927_v9 = vld [vmem:[#allocation2 + $0x1b30] sm:$0xff]  ;;  %v942_v11 = vld [vmem:[#allocation2 + $0x1ba8] sm:$0xff] }
 0x1d0   :  { %4597 = vmatprep.subr.mxu1 %v876_v13  ;;  %4563 = vmatpush3.msra.mxu0 %v828_v15  ;;  %v894_v12 = vld [vmem:[#allocation2 + $0x1a28] sm:$0xff]  ;;  %v909_v15 = vld [vmem:[#allocation2 + $0x1aa0] sm:$0xff] }
 0x1d1   :  { %4598 = vmatpush3.msra.mxu1 %v860_v16  ;;  %4564 = vmatprep.subr.mxu0 %v843_v17  ;;  %v926_v13 = vld [vmem:[#allocation2 + $0x1b28] sm:$0xff]  ;;  %v941_v16 = vld [vmem:[#allocation2 + $0x1ba0] sm:$0xff] }
 0x1d2   :  { %4599 = vmatprep.subr.mxu1 %v875_v18  ;;  %4565 = vmatpush3.msra.mxu0 %v827_v20  ;;  %v893_v17 = vld [vmem:[#allocation2 + $0x1a20] sm:$0xff]  ;;  %v940_v20 = vld [vmem:[#allocation2 + $0x1b98] sm:$0xff] }
 0x1d3   :  { %4600 = vmatpush3.msra.mxu1 %v859_v21  ;;  %4566 = vmatprep.subr.mxu0 %v842_v22  ;;  %v925_v18 = vld [vmem:[#allocation2 + $0x1b20] sm:$0xff]  ;;  %v1325_v21 = vcombine.high %v54_v14, %v54_v14  ;;  %v892_v22 = vld [vmem:[#allocation2 + $0x1a18] sm:$0xff] }
 0x1d4   :  { %4601 = vmatprep.subr.mxu1 %v874_v23  ;;  %4567 = vmatpush3.msra.mxu0 %v826_v25  ;;  %v924_v23 = vld [vmem:[#allocation2 + $0x1b18] sm:$0xff]  ;;  %v939_v25 = vld [vmem:[#allocation2 + $0x1b90] sm:$0xff] }
 0x1d5   :  { %4602 = vmatpush3.msra.mxu1 %v858_v26  ;;  %4568 = vmatprep.subr.mxu0 %v841_v27  ;;  %v1332_v26 = vrot.slane %v54_v14, %v4938_v51  ;;  %v891_v27 = vld [vmem:[#allocation2 + $0x1a10] sm:$0xff] }
 0x1d6   :  { %4603 = vmatprep.subr.mxu1 %v873_v28  ;;  %4569 = vmatpush3.msra.mxu0 %v825_v30  ;;  %v923_v28 = vld [vmem:[#allocation2 + $0x1b10] sm:$0xff]  ;;  %v938_v30 = vld [vmem:[#allocation2 + $0x1b88] sm:$0xff] }
 0x1d7   :  { %3184 = vmatprep.mubr.f32.mxu0 %v1323_v29  ;;  %4604 = vmatpush3.msra.mxu1 %v857_v31  ;;  %v906_v29 = vld [vmem:[#allocation2 + $0x1a88] sm:$0xff]  ;;  %v1339_v31 = vrot.slane %v1325_v21, %v4938_v51  ;;  %v1007_v14 = vld [vmem:[#allocation2 + $0x1db0] sm:$0xff] }
 0x1d8   :  { %3185 = vmatmul.mubr.f32.vlgmr.msra.gmra.mxu0 %v1315_v19  ;;  %3254 = vmatprep.mubr.f32.mxu1 %v1324_v32  ;;  %v908_v19 = vld [vmem:[#allocation2 + $0x1a98] sm:$0xff]  ;;  %v890_v32 = vld [vmem:[#allocation2 + $0x1a08] sm:$0xff]  ;;  %v55_v21 = vld [vmem:[%s5023_s0 + $0x70] sm:$0xff] }
 0x1d9   :  { %4608 = vmatprep.subr.mxu0 %v920_v33  ;;  %4643 = vmatprep.subr.mxu1 %v952_v34  ;;  %v922_v33 = vld [vmem:[#allocation2 + $0x1b08] sm:$0xff]  ;;  %v905_v34 = vld [vmem:[#allocation2 + $0x1a80] sm:$0xff] }
 0x1da   :  { %3255 = vmatmul.mubr.f32.vlgmr.msra.gmra.mxu1 %v1322_v24  ;;  %4609 = vmatpush3.msra.mxu0 %v904_v35  ;;  %v907_v24 = vld [vmem:[#allocation2 + $0x1a90] sm:$0xff]  ;;  %v937_v35 = vld [vmem:[#allocation2 + $0x1b80] sm:$0xff] }
 0x1db   :  { %4644 = vmatpush3.msra.mxu1 %v936_v36  ;;  %4610 = vmatprep.subr.mxu0 %v919_v37  ;;  %v1340_v36 = vcombine.high %v1332_v26, %v1332_v26  ;;  %v889_v37 = vld [vmem:[#allocation2 + $0x1a00] sm:$0xff] }
 0x1dc   :  { %4645 = vmatprep.subr.mxu1 %v951_v38  ;;  %4611 = vmatpush3.msra.mxu0 %v903_v39  ;;  %v921_v38 = vld [vmem:[#allocation2 + $0x1b00] sm:$0xff]  ;;  %v1341_v39 = vcombine.high %v1339_v31, %v1339_v31 }
 0x1dd   :  { %4646 = vmatpush3.msra.mxu1 %v935_v40  ;;  %4612 = vmatprep.subr.mxu0 %v918_v41  ;;  %v984_v40 = vld [vmem:[#allocation2 + $0x1cf8] sm:$0xff] }
 0x1de   :  { %4647 = vmatprep.subr.mxu1 %v950_v42  ;;  %4613 = vmatpush3.msra.mxu0 %v902_v43  ;;  %v1016_v41 = vld [vmem:[#allocation2 + $0x1df8] sm:$0xff] }
 0x1df   :  { %4648 = vmatpush3.msra.mxu1 %v934_v44  ;;  %4614 = vmatprep.subr.mxu0 %v917_v45  ;;  %v968_v42 = vld [vmem:[#allocation2 + $0x1c78] sm:$0xff]  ;;  %v983_v44 = vld [vmem:[#allocation2 + $0x1cf0] sm:$0xff] }
 0x1e0   :  { %4649 = vmatprep.subr.mxu1 %v949_v46  ;;  %4615 = vmatpush3.msra.mxu0 %v901_v47  ;;  %v1000_v43 = vld [vmem:[#allocation2 + $0x1d78] sm:$0xff]  ;;  %v1015_v45 = vld [vmem:[#allocation2 + $0x1df0] sm:$0xff] }
 0x1e1   :  { %4650 = vmatpush3.msra.mxu1 %v933_v48  ;;  %4616 = vmatprep.subr.mxu0 %v916_v49  ;;  %v967_v46 = vld [vmem:[#allocation2 + $0x1c70] sm:$0xff]  ;;  %v982_v48 = vld [vmem:[#allocation2 + $0x1ce8] sm:$0xff] }
 0x1e2   :  { %4651 = vmatprep.subr.mxu1 %v948_v50  ;;  %4617 = vmatpush3.msra.mxu0 %v900_v52  ;;  %v999_v47 = vld [vmem:[#allocation2 + $0x1d70] sm:$0xff]  ;;  %v1014_v49 = vld [vmem:[#allocation2 + $0x1de8] sm:$0xff] }
 0x1e3   :  { %4652 = vmatpush3.msra.mxu1 %v932_v53  ;;  %4618 = vmatprep.subr.mxu0 %v915_v54  ;;  %v966_v50 = vld [vmem:[#allocation2 + $0x1c68] sm:$0xff]  ;;  %v981_v53 = vld [vmem:[#allocation2 + $0x1ce0] sm:$0xff] }
 0x1e4   :  { %4653 = vmatprep.subr.mxu1 %v947_v55  ;;  %4619 = vmatpush3.msra.mxu0 %v899_v56  ;;  %v998_v52 = vld [vmem:[#allocation2 + $0x1d68] sm:$0xff]  ;;  %v1013_v54 = vld [vmem:[#allocation2 + $0x1de0] sm:$0xff] }
 0x1e5   :  { %4654 = vmatpush3.msra.mxu1 %v931_v57  ;;  %4620 = vmatprep.subr.mxu0 %v914_v58  ;;  %v965_v55 = vld [vmem:[#allocation2 + $0x1c60] sm:$0xff]  ;;  %v980_v57 = vld [vmem:[#allocation2 + $0x1cd8] sm:$0xff] }
 0x1e6   :  { %4655 = vmatprep.subr.mxu1 %v946_v59  ;;  %4621 = vmatpush3.msra.mxu0 %v898_v60  ;;  %v997_v56 = vld [vmem:[#allocation2 + $0x1d60] sm:$0xff]  ;;  %v1012_v58 = vld [vmem:[#allocation2 + $0x1dd8] sm:$0xff] }
 0x1e7   :  { %4656 = vmatpush3.msra.mxu1 %v930_v61  ;;  %4622 = vmatprep.subr.mxu0 %v913_v62  ;;  %v964_v59 = vld [vmem:[#allocation2 + $0x1c58] sm:$0xff]  ;;  %v979_v61 = vld [vmem:[#allocation2 + $0x1cd0] sm:$0xff] }
 0x1e8   :  { %4657 = vmatprep.subr.mxu1 %v945_v63  ;;  %4623 = vmatpush3.msra.mxu0 %v897_v0  ;;  %v996_v60 = vld [vmem:[#allocation2 + $0x1d58] sm:$0xff]  ;;  %v1011_v62 = vld [vmem:[#allocation2 + $0x1dd0] sm:$0xff] }
 0x1e9   :  { %4658 = vmatpush3.msra.mxu1 %v929_v1  ;;  %4624 = vmatprep.subr.mxu0 %v912_v2  ;;  %v963_v63 = vld [vmem:[#allocation2 + $0x1c50] sm:$0xff]  ;;  %v978_v1 = vld [vmem:[#allocation2 + $0x1cc8] sm:$0xff] }
 0x1ea   :  { %4659 = vmatprep.subr.mxu1 %v944_v3  ;;  %4625 = vmatpush3.msra.mxu0 %v896_v4  ;;  %v995_v0 = vld [vmem:[#allocation2 + $0x1d50] sm:$0xff]  ;;  %v1010_v2 = vld [vmem:[#allocation2 + $0x1dc8] sm:$0xff] }
 0x1eb   :  { %4660 = vmatpush3.msra.mxu1 %v928_v5  ;;  %4626 = vmatprep.subr.mxu0 %v911_v6  ;;  %v962_v3 = vld [vmem:[#allocation2 + $0x1c48] sm:$0xff]  ;;  %v977_v5 = vld [vmem:[#allocation2 + $0x1cc0] sm:$0xff] }
 0x1ec   :  { %4661 = vmatprep.subr.mxu1 %v943_v7  ;;  %4627 = vmatpush3.msra.mxu0 %v895_v8  ;;  %v994_v4 = vld [vmem:[#allocation2 + $0x1d48] sm:$0xff]  ;;  %v1009_v6 = vld [vmem:[#allocation2 + $0x1dc0] sm:$0xff] }
 0x1ed   :  { %4662 = vmatpush3.msra.mxu1 %v927_v9  ;;  %4628 = vmatprep.subr.mxu0 %v910_v10  ;;  %v961_v7 = vld [vmem:[#allocation2 + $0x1c40] sm:$0xff]  ;;  %v976_v9 = vld [vmem:[#allocation2 + $0x1cb8] sm:$0xff] }
 0x1ee   :  { %4663 = vmatprep.subr.mxu1 %v942_v11  ;;  %4629 = vmatpush3.msra.mxu0 %v894_v12  ;;  %v993_v8 = vld [vmem:[#allocation2 + $0x1d40] sm:$0xff]  ;;  %v1008_v10 = vld [vmem:[#allocation2 + $0x1db8] sm:$0xff] }
 0x1ef   :  { %4664 = vmatpush3.msra.mxu1 %v926_v13  ;;  %4630 = vmatprep.subr.mxu0 %v909_v15  ;;  %v960_v11 = vld [vmem:[#allocation2 + $0x1c38] sm:$0xff]  ;;  %v975_v13 = vld [vmem:[#allocation2 + $0x1cb0] sm:$0xff] }
 0x1f0   :  { %4665 = vmatprep.subr.mxu1 %v941_v16  ;;  %4631 = vmatpush3.msra.mxu0 %v893_v17  ;;  %v992_v12 = vld [vmem:[#allocation2 + $0x1d38] sm:$0xff]  ;;  %v959_v15 = vld [vmem:[#allocation2 + $0x1c30] sm:$0xff]  ;;  %v974_v17 = vld [vmem:[#allocation2 + $0x1ca8] sm:$0xff] }
 0x1f1   :  { %4666 = vmatpush3.msra.mxu1 %v925_v18  ;;  %4632 = vmatprep.subr.mxu0 %v908_v19  ;;  %v991_v16 = vld [vmem:[#allocation2 + $0x1d30] sm:$0xff]  ;;  %v1006_v18 = vld [vmem:[#allocation2 + $0x1da8] sm:$0xff] }
 0x1f2   :  { %4667 = vmatprep.subr.mxu1 %v940_v20  ;;  %4633 = vmatpush3.msra.mxu0 %v892_v22  ;;  %v958_v19 = vld [vmem:[#allocation2 + $0x1c28] sm:$0xff]  ;;  %v973_v22 = vld [vmem:[#allocation2 + $0x1ca0] sm:$0xff] }
 0x1f3   :  { %4668 = vmatpush3.msra.mxu1 %v924_v23  ;;  %4634 = vmatprep.subr.mxu0 %v907_v24  ;;  %v990_v20 = vld [vmem:[#allocation2 + $0x1d28] sm:$0xff]  ;;  %v1005_v23 = vld [vmem:[#allocation2 + $0x1da0] sm:$0xff] }
 0x1f4   :  { %4669 = vmatprep.subr.mxu1 %v939_v25  ;;  %4635 = vmatpush3.msra.mxu0 %v891_v27  ;;  %v957_v24 = vld [vmem:[#allocation2 + $0x1c20] sm:$0xff]  ;;  %v1004_v27 = vld [vmem:[#allocation2 + $0x1d98] sm:$0xff] }
 0x1f5   :  { %4670 = vmatpush3.msra.mxu1 %v923_v28  ;;  %4636 = vmatprep.subr.mxu0 %v906_v29  ;;  %v989_v25 = vld [vmem:[#allocation2 + $0x1d20] sm:$0xff]  ;;  %v1342_v28 = vcombine.high %v55_v21, %v55_v21  ;;  %v956_v29 = vld [vmem:[#allocation2 + $0x1c18] sm:$0xff] }
 0x1f6   :  { %4671 = vmatprep.subr.mxu1 %v938_v30  ;;  %4637 = vmatpush3.msra.mxu0 %v890_v32  ;;  %v988_v30 = vld [vmem:[#allocation2 + $0x1d18] sm:$0xff]  ;;  %v1003_v32 = vld [vmem:[#allocation2 + $0x1d90] sm:$0xff] }
 0x1f7   :  { %4672 = vmatpush3.msra.mxu1 %v922_v33  ;;  %4638 = vmatprep.subr.mxu0 %v905_v34  ;;  %v1349_v33 = vrot.slane %v55_v21, %v4938_v51  ;;  %v955_v34 = vld [vmem:[#allocation2 + $0x1c10] sm:$0xff] }
 0x1f8   :  { %4673 = vmatprep.subr.mxu1 %v937_v35  ;;  %4639 = vmatpush3.msra.mxu0 %v889_v37  ;;  %v987_v35 = vld [vmem:[#allocation2 + $0x1d10] sm:$0xff]  ;;  %v1002_v37 = vld [vmem:[#allocation2 + $0x1d88] sm:$0xff] }
 0x1f9   :  { %3324 = vmatprep.mubr.f32.mxu0 %v1340_v36  ;;  %4674 = vmatpush3.msra.mxu1 %v921_v38  ;;  %v970_v36 = vld [vmem:[#allocation2 + $0x1c88] sm:$0xff]  ;;  %v1356_v38 = vrot.slane %v1342_v28, %v4938_v51  ;;  %v1071_v21 = vld [vmem:[#allocation2 + $0x1fb0] sm:$0xff] }
 0x1fa   :  { %3325 = vmatmul.mubr.f32.vlgmr.msra.gmra.mxu0 %v1332_v26  ;;  %3394 = vmatprep.mubr.f32.mxu1 %v1341_v39  ;;  %v972_v26 = vld [vmem:[#allocation2 + $0x1c98] sm:$0xff]  ;;  %v954_v39 = vld [vmem:[#allocation2 + $0x1c08] sm:$0xff] }
 0x1fb   :  { %4678 = vmatprep.subr.mxu0 %v984_v40  ;;  %4713 = vmatprep.subr.mxu1 %v1016_v41  ;;  %v986_v40 = vld [vmem:[#allocation2 + $0x1d08] sm:$0xff]  ;;  %v969_v41 = vld [vmem:[#allocation2 + $0x1c80] sm:$0xff] }
 0x1fc   :  { %3395 = vmatmul.mubr.f32.vlgmr.msra.gmra.mxu1 %v1339_v31  ;;  %4679 = vmatpush3.msra.mxu0 %v968_v42  ;;  %v971_v31 = vld [vmem:[#allocation2 + $0x1c90] sm:$0xff]  ;;  %v1001_v42 = vld [vmem:[#allocation2 + $0x1d80] sm:$0xff]  ;;  %v1054_v28 = vld [vmem:[#allocation2 + $0x1f28] sm:$0xff] }
 0x1fd   :  { %4714 = vmatpush3.msra.mxu1 %v1000_v43  ;;  %4680 = vmatprep.subr.mxu0 %v983_v44  ;;  %v1357_v43 = vcombine.high %v1349_v33, %v1349_v33  ;;  %v953_v44 = vld [vmem:[#allocation2 + $0x1c00] sm:$0xff] }
 0x1fe   :  { %4715 = vmatprep.subr.mxu1 %v1015_v45  ;;  %4681 = vmatpush3.msra.mxu0 %v967_v46  ;;  %v985_v45 = vld [vmem:[#allocation2 + $0x1d00] sm:$0xff]  ;;  %v1358_v46 = vcombine.high %v1356_v38, %v1356_v38 }
 0x1ff   :  { %4716 = vmatpush3.msra.mxu1 %v999_v47  ;;  %4682 = vmatprep.subr.mxu0 %v982_v48  ;;  %v1048_v47 = vld [vmem:[#allocation2 + $0x1ef8] sm:$0xff] }
 0x200   :  { %4717 = vmatprep.subr.mxu1 %v1014_v49  ;;  %4683 = vmatpush3.msra.mxu0 %v966_v50  ;;  %v1080_v48 = vld [vmem:[#allocation2 + $0x1ff8] sm:$0xff] }
 0x201   :  { %4718 = vmatpush3.msra.mxu1 %v998_v52  ;;  %4684 = vmatprep.subr.mxu0 %v981_v53  ;;  %v1032_v49 = vld [vmem:[#allocation2 + $0x1e78] sm:$0xff]  ;;  %v1047_v52 = vld [vmem:[#allocation2 + $0x1ef0] sm:$0xff] }
 0x202   :  { %4719 = vmatprep.subr.mxu1 %v1013_v54  ;;  %4685 = vmatpush3.msra.mxu0 %v965_v55  ;;  %v1064_v50 = vld [vmem:[#allocation2 + $0x1f78] sm:$0xff]  ;;  %v1079_v53 = vld [vmem:[#allocation2 + $0x1ff0] sm:$0xff] }
 0x203   :  { %4720 = vmatpush3.msra.mxu1 %v997_v56  ;;  %4686 = vmatprep.subr.mxu0 %v980_v57  ;;  %v1031_v54 = vld [vmem:[#allocation2 + $0x1e70] sm:$0xff]  ;;  %v1046_v56 = vld [vmem:[#allocation2 + $0x1ee8] sm:$0xff] }
 0x204   :  { %4721 = vmatprep.subr.mxu1 %v1012_v58  ;;  %4687 = vmatpush3.msra.mxu0 %v964_v59  ;;  %v1063_v55 = vld [vmem:[#allocation2 + $0x1f70] sm:$0xff]  ;;  %v1078_v57 = vld [vmem:[#allocation2 + $0x1fe8] sm:$0xff] }
 0x205   :  { %4722 = vmatpush3.msra.mxu1 %v996_v60  ;;  %4688 = vmatprep.subr.mxu0 %v979_v61  ;;  %v1030_v58 = vld [vmem:[#allocation2 + $0x1e68] sm:$0xff]  ;;  %v1045_v60 = vld [vmem:[#allocation2 + $0x1ee0] sm:$0xff] }
 0x206   :  { %4723 = vmatprep.subr.mxu1 %v1011_v62  ;;  %4689 = vmatpush3.msra.mxu0 %v963_v63  ;;  %v1062_v59 = vld [vmem:[#allocation2 + $0x1f68] sm:$0xff]  ;;  %v1077_v61 = vld [vmem:[#allocation2 + $0x1fe0] sm:$0xff] }
 0x207   :  { %4724 = vmatpush3.msra.mxu1 %v995_v0  ;;  %4690 = vmatprep.subr.mxu0 %v978_v1  ;;  %v1029_v62 = vld [vmem:[#allocation2 + $0x1e60] sm:$0xff]  ;;  %v1044_v0 = vld [vmem:[#allocation2 + $0x1ed8] sm:$0xff] }
 0x208   :  { %4725 = vmatprep.subr.mxu1 %v1010_v2  ;;  %4691 = vmatpush3.msra.mxu0 %v962_v3  ;;  %v1061_v63 = vld [vmem:[#allocation2 + $0x1f60] sm:$0xff]  ;;  %v1076_v1 = vld [vmem:[#allocation2 + $0x1fd8] sm:$0xff] }
 0x209   :  { %4726 = vmatpush3.msra.mxu1 %v994_v4  ;;  %4692 = vmatprep.subr.mxu0 %v977_v5  ;;  %v1028_v2 = vld [vmem:[#allocation2 + $0x1e58] sm:$0xff]  ;;  %v1043_v4 = vld [vmem:[#allocation2 + $0x1ed0] sm:$0xff] }
 0x20a   :  { %4727 = vmatprep.subr.mxu1 %v1009_v6  ;;  %4693 = vmatpush3.msra.mxu0 %v961_v7  ;;  %v1060_v3 = vld [vmem:[#allocation2 + $0x1f58] sm:$0xff]  ;;  %v1075_v5 = vld [vmem:[#allocation2 + $0x1fd0] sm:$0xff] }
 0x20b   :  { %4728 = vmatpush3.msra.mxu1 %v993_v8  ;;  %4694 = vmatprep.subr.mxu0 %v976_v9  ;;  %v1027_v6 = vld [vmem:[#allocation2 + $0x1e50] sm:$0xff]  ;;  %v1042_v8 = vld [vmem:[#allocation2 + $0x1ec8] sm:$0xff] }
 0x20c   :  { %4729 = vmatprep.subr.mxu1 %v1008_v10  ;;  %4695 = vmatpush3.msra.mxu0 %v960_v11  ;;  %v1059_v7 = vld [vmem:[#allocation2 + $0x1f50] sm:$0xff]  ;;  %v1074_v9 = vld [vmem:[#allocation2 + $0x1fc8] sm:$0xff] }
 0x20d   :  { %4730 = vmatpush3.msra.mxu1 %v992_v12  ;;  %4696 = vmatprep.subr.mxu0 %v975_v13  ;;  %v1026_v10 = vld [vmem:[#allocation2 + $0x1e48] sm:$0xff]  ;;  %v1041_v12 = vld [vmem:[#allocation2 + $0x1ec0] sm:$0xff] }
 0x20e   :  { %4731 = vmatprep.subr.mxu1 %v1007_v14  ;;  %4697 = vmatpush3.msra.mxu0 %v959_v15  ;;  %v1058_v11 = vld [vmem:[#allocation2 + $0x1f48] sm:$0xff]  ;;  %v1073_v13 = vld [vmem:[#allocation2 + $0x1fc0] sm:$0xff] }
 0x20f   :  { %4732 = vmatpush3.msra.mxu1 %v991_v16  ;;  %4698 = vmatprep.subr.mxu0 %v974_v17  ;;  %v1025_v14 = vld [vmem:[#allocation2 + $0x1e40] sm:$0xff]  ;;  %v1040_v16 = vld [vmem:[#allocation2 + $0x1eb8] sm:$0xff] }
 0x210   :  { %4733 = vmatprep.subr.mxu1 %v1006_v18  ;;  %4699 = vmatpush3.msra.mxu0 %v958_v19  ;;  %v1057_v15 = vld [vmem:[#allocation2 + $0x1f40] sm:$0xff]  ;;  %v1072_v17 = vld [vmem:[#allocation2 + $0x1fb8] sm:$0xff] }
 0x211   :  { %4734 = vmatpush3.msra.mxu1 %v990_v20  ;;  %4700 = vmatprep.subr.mxu0 %v973_v22  ;;  %v1024_v18 = vld [vmem:[#allocation2 + $0x1e38] sm:$0xff]  ;;  %v1039_v20 = vld [vmem:[#allocation2 + $0x1eb0] sm:$0xff] }
 0x212   :  { %4735 = vmatprep.subr.mxu1 %v1005_v23  ;;  %4701 = vmatpush3.msra.mxu0 %v957_v24  ;;  %v1056_v19 = vld [vmem:[#allocation2 + $0x1f38] sm:$0xff]  ;;  %v1023_v22 = vld [vmem:[#allocation2 + $0x1e30] sm:$0xff]  ;;  %v1038_v24 = vld [vmem:[#allocation2 + $0x1ea8] sm:$0xff] }
 0x213   :  { %4736 = vmatpush3.msra.mxu1 %v989_v25  ;;  %4702 = vmatprep.subr.mxu0 %v972_v26  ;;  %v1055_v23 = vld [vmem:[#allocation2 + $0x1f30] sm:$0xff]  ;;  %v1070_v25 = vld [vmem:[#allocation2 + $0x1fa8] sm:$0xff]  ;;  %v56_v26 = vld [vmem:[%s5023_s0 + $0x78] sm:$0xff]  ;;  %s4911_s0 = smov [#allocation7]  }
 0x214   :  { %4737 = vmatprep.subr.mxu1 %v1004_v27  ;;  %4703 = vmatpush3.msra.mxu0 %v956_v29  ;;  %v1022_v27 = vld [vmem:[#allocation2 + $0x1e28] sm:$0xff]  ;;  %v1037_v29 = vld [vmem:[#allocation2 + $0x1ea0] sm:$0xff]  ;;  %s3687_s26 = sshll.u32 %s4911_s0, 4  ;;  %s3688_s26 = int_to_ptr.vmem [resolvable:$true] %s3687_s26 }
 0x215   :  { %4738 = vmatpush3.msra.mxu1 %v988_v30  ;;  %4704 = vmatprep.subr.mxu0 %v971_v31  ;;  %v1069_v30 = vld [vmem:[#allocation2 + $0x1fa0] sm:$0xff]  ;;  %s4880_s27 = scalar_lea.vmem %s3688_s26, 32  ;;  %p4885_p11 = scmp.lt.s32.totalorder %s3688_s26, %s3688_s26 }
 0x216   :  { %4739 = vmatprep.subr.mxu1 %v1003_v32  ;;  %4705 = vmatpush3.msra.mxu0 %v955_v34  ;;  %v1021_v31 = vld [vmem:[#allocation2 + $0x1e20] sm:$0xff]  ;;  %v1036_v34 = vld [vmem:[#allocation2 + $0x1e98] sm:$0xff]  ;;  %p4881_p10 = scmp.ne.s32.totalorder %s3688_s26, %s4880_s27  ;;  %p4886_p12 = scmp.lt.s32.totalorder %s4880_s27, %s4880_s27 }
 0x217   :  { %4740 = vmatpush3.msra.mxu1 %v987_v35  ;;  %4706 = vmatprep.subr.mxu0 %v970_v36  ;;  %v1053_v32 = vld [vmem:[#allocation2 + $0x1f20] sm:$0xff]  ;;  %v1068_v35 = vld [vmem:[#allocation2 + $0x1f98] sm:$0xff] }
 0x218   :  { %4741 = vmatprep.subr.mxu1 %v1002_v37  ;;  %4707 = vmatpush3.msra.mxu0 %v954_v39  ;;  %v1020_v36 = vld [vmem:[#allocation2 + $0x1e18] sm:$0xff]  ;;  %v1067_v39 = vld [vmem:[#allocation2 + $0x1f90] sm:$0xff]  ;;  %p4887_p13 = por %p4886_p12, %p4885_p11 }
 0x219   :  { %4742 = vmatpush3.msra.mxu1 %v986_v40  ;;  %4708 = vmatprep.subr.mxu0 %v969_v41  ;;  %v1052_v37 = vld [vmem:[#allocation2 + $0x1f18] sm:$0xff]  ;;  %v1366_v40 = vrot.slane %v56_v26, %v4938_v51  ;;  %v1019_v41 = vld [vmem:[#allocation2 + $0x1e10] sm:$0xff] }
 0x21a   :  { %4743 = vmatprep.subr.mxu1 %v1001_v42  ;;  %4709 = vmatpush3.msra.mxu0 %v953_v44  ;;  %v1051_v42 = vld [vmem:[#allocation2 + $0x1f10] sm:$0xff]  ;;  %v1034_v44 = vld [vmem:[#allocation2 + $0x1e88] sm:$0xff]  ;;  %p4888_p0 = pnand %p4887_p13, %p4881_p10 }
 0x21b   :  { %3464 = vmatprep.mubr.f32.mxu0 %v1357_v43  ;;  %4744 = vmatpush3.msra.mxu1 %v985_v45  ;;  %v1066_v45 = vld [vmem:[#allocation2 + $0x1f88] sm:$0xff] }
 0x21c   :  { %3465 = vmatmul.mubr.f32.vlgmr.msra.gmra.mxu0 %v1349_v33  ;;  %3534 = vmatprep.mubr.f32.mxu1 %v1358_v46  ;;  %v1359_v33 = vcombine.high %v56_v26, %v56_v26  ;;  %v1018_v46 = vld [vmem:[#allocation2 + $0x1e08] sm:$0xff] }
 0x21d   :  { %4748 = vmatprep.subr.mxu0 %v1048_v47  ;;  %4783 = vmatprep.subr.mxu1 %v1080_v48  ;;  %v1050_v47 = vld [vmem:[#allocation2 + $0x1f08] sm:$0xff]  ;;  %v1033_v48 = vld [vmem:[#allocation2 + $0x1e80] sm:$0xff] }
 0x21e   :  { %3535 = vmatmul.mubr.f32.vlgmr.msra.gmra.mxu1 %v1356_v38  ;;  %4749 = vmatpush3.msra.mxu0 %v1032_v49  ;;  %v1035_v38 = vld [vmem:[#allocation2 + $0x1e90] sm:$0xff]  ;;  %v1373_v43 = vrot.slane %v1359_v33, %v4938_v51  ;;  %v1065_v49 = vld [vmem:[#allocation2 + $0x1f80] sm:$0xff] }
 0x21f   :  { %4784 = vmatpush3.msra.mxu1 %v1064_v50  ;;  %4750 = vmatprep.subr.mxu0 %v1047_v52  ;;  %v1374_v50 = vcombine.high %v1366_v40, %v1366_v40  ;;  %v1017_v52 = vld [vmem:[#allocation2 + $0x1e00] sm:$0xff] }
 0x220   :  { %4785 = vmatprep.subr.mxu1 %v1079_v53  ;;  %4751 = vmatpush3.msra.mxu0 %v1031_v54  ;;  %v1375_v53 = vcombine.high %v1373_v43, %v1373_v43  ;;  %v1049_v51 = vld [vmem:[#allocation2 + $0x1f00] sm:$0xff]  ;;  %v3730_v54 = vpop.f32.mrf.mxu0 }
 0x221   :  { %4786 = vmatpush3.msra.mxu1 %v1063_v55  ;;  %4752 = vmatprep.subr.mxu0 %v1046_v56  ;;  %v3765_v55 = vpop.f32.mrf.mxu1 }
 0x222   :  { %4787 = vmatprep.subr.mxu1 %v1078_v57  ;;  %4753 = vmatpush3.msra.mxu0 %v1030_v58  ;;  %v3731_v56 = vpop.f32.mrf.mxu0 }
 0x223   :  { %4788 = vmatpush3.msra.mxu1 %v1062_v59  ;;  %4754 = vmatprep.subr.mxu0 %v1045_v60  ;;  %v3732_v58 = vadd.f32 %v3731_v56, %v3730_v54  ;;  %v3697_v59 = vld [vmem:[#allocation5] ss:$0 sm:$0xff]  ;;  %v3766_v60 = vpop.f32.mrf.mxu1 }
 0x224   :  { %4789 = vmatprep.subr.mxu1 %v1077_v61  ;;  %4755 = vmatpush3.msra.mxu0 %v1029_v62  ;;  %v3800_v57 = vpop.f32.mrf.mxu0 }
 0x225   :  { %4790 = vmatpush3.msra.mxu1 %v1061_v63  ;;  %4756 = vmatprep.subr.mxu0 %v1044_v0  ;;  %v3835_v61 = vpop.f32.mrf.mxu1  ;;  %v1507_v63 = vadd.f32 %v3732_v58, %v3697_v59  ;;  %v3767_v0 = vadd.f32 %v3766_v60, %v3765_v55 }
 0x226   :  { %4791 = vmatprep.subr.mxu1 %v1076_v1  ;;  %4757 = vmatpush3.msra.mxu0 %v1028_v2  ;;  %v3801_v62 = vpop.f32.mrf.mxu0 }
 0x227   :  { %4792 = vmatpush3.msra.mxu1 %v1060_v3  ;;  %4758 = vmatprep.subr.mxu0 %v1043_v4  ;;  %v3802_v2 = vadd.f32 %v3801_v62, %v3800_v57  ;;  %v3836_v3 = vpop.f32.mrf.mxu1  ;;  %v1577_v4 = vadd.f32 %v3767_v0, %v1507_v63 }
 0x228   :  { %4793 = vmatprep.subr.mxu1 %v1075_v5  ;;  %4759 = vmatpush3.msra.mxu0 %v1027_v6  ;;  %v3870_v1 = vpop.f32.mrf.mxu0 }
 0x229   :  { %4794 = vmatpush3.msra.mxu1 %v1059_v7  ;;  %4760 = vmatprep.subr.mxu0 %v1042_v8  ;;  %v3905_v5 = vpop.f32.mrf.mxu1  ;;  %v1647_v7 = vadd.f32 %v3802_v2, %v1577_v4  ;;  %v3837_v8 = vadd.f32 %v3836_v3, %v3835_v61 }
 0x22a   :  { %4795 = vmatprep.subr.mxu1 %v1074_v9  ;;  %4761 = vmatpush3.msra.mxu0 %v1026_v10  ;;  %v3871_v6 = vpop.f32.mrf.mxu0 }
 0x22b   :  { %4796 = vmatpush3.msra.mxu1 %v1058_v11  ;;  %4762 = vmatprep.subr.mxu0 %v1041_v12  ;;  %v3872_v10 = vadd.f32 %v3871_v6, %v3870_v1  ;;  %v3906_v11 = vpop.f32.mrf.mxu1  ;;  %v1717_v12 = vadd.f32 %v3837_v8, %v1647_v7 }
 0x22c   :  { %4797 = vmatprep.subr.mxu1 %v1073_v13  ;;  %4763 = vmatpush3.msra.mxu0 %v1025_v14  ;;  %v3940_v9 = vpop.f32.mrf.mxu0 }
 0x22d   :  { %4798 = vmatpush3.msra.mxu1 %v1057_v15  ;;  %4764 = vmatprep.subr.mxu0 %v1040_v16  ;;  %v3975_v13 = vpop.f32.mrf.mxu1  ;;  %v1787_v15 = vadd.f32 %v3872_v10, %v1717_v12  ;;  %v3907_v16 = vadd.f32 %v3906_v11, %v3905_v5 }
 0x22e   :  { %4799 = vmatprep.subr.mxu1 %v1072_v17  ;;  %4765 = vmatpush3.msra.mxu0 %v1024_v18  ;;  %v3941_v14 = vpop.f32.mrf.mxu0 }
 0x22f   :  { %4800 = vmatpush3.msra.mxu1 %v1056_v19  ;;  %4766 = vmatprep.subr.mxu0 %v1039_v20  ;;  %v3942_v18 = vadd.f32 %v3941_v14, %v3940_v9  ;;  %v3976_v19 = vpop.f32.mrf.mxu1  ;;  %v1857_v20 = vadd.f32 %v3907_v16, %v1787_v15 }
 0x230   :  { %4801 = vmatprep.subr.mxu1 %v1071_v21  ;;  %4767 = vmatpush3.msra.mxu0 %v1023_v22  ;;  %v4010_v17 = vpop.f32.mrf.mxu0 }
 0x231   :  { %4802 = vmatpush3.msra.mxu1 %v1055_v23  ;;  %4768 = vmatprep.subr.mxu0 %v1038_v24  ;;  %v4045_v21 = vpop.f32.mrf.mxu1  ;;  %v1927_v23 = vadd.f32 %v3942_v18, %v1857_v20  ;;  %v3977_v24 = vadd.f32 %v3976_v19, %v3975_v13 }
 0x232   :  { %4803 = vmatprep.subr.mxu1 %v1070_v25  ;;  %4769 = vmatpush3.msra.mxu0 %v1022_v27  ;;  %v4011_v22 = vpop.f32.mrf.mxu0 }
 0x233   :  { %4804 = vmatpush3.msra.mxu1 %v1054_v28  ;;  %4770 = vmatprep.subr.mxu0 %v1037_v29  ;;  %v4012_v26 = vadd.f32 %v4011_v22, %v4010_v17  ;;  %v4046_v27 = vpop.f32.mrf.mxu1  ;;  %v1997_v28 = vadd.f32 %v3977_v24, %v1927_v23 }
 0x234   :  { %4805 = vmatprep.subr.mxu1 %v1069_v30  ;;  %4771 = vmatpush3.msra.mxu0 %v1021_v31  ;;  %v4080_v25 = vpop.f32.mrf.mxu0 }
 0x235   :  { %4806 = vmatpush3.msra.mxu1 %v1053_v32  ;;  %4772 = vmatprep.subr.mxu0 %v1036_v34  ;;  %v4115_v29 = vpop.f32.mrf.mxu1  ;;  %v2067_v31 = vadd.f32 %v4012_v26, %v1997_v28  ;;  %v4047_v32 = vadd.f32 %v4046_v27, %v4045_v21 }
 0x236   :  { %4807 = vmatprep.subr.mxu1 %v1068_v35  ;;  %4773 = vmatpush3.msra.mxu0 %v1020_v36  ;;  %v4081_v30 = vpop.f32.mrf.mxu0 }
 0x237   :  { %4808 = vmatpush3.msra.mxu1 %v1052_v37  ;;  %4774 = vmatprep.subr.mxu0 %v1035_v38  ;;  %v4082_v34 = vadd.f32 %v4081_v30, %v4080_v25  ;;  %v4116_v35 = vpop.f32.mrf.mxu1  ;;  %v2137_v36 = vadd.f32 %v4047_v32, %v2067_v31 }
 0x238   :  { %4809 = vmatprep.subr.mxu1 %v1067_v39  ;;  %4775 = vmatpush3.msra.mxu0 %v1019_v41  ;;  %v4150_v33 = vpop.f32.mrf.mxu0 }
 0x239   :  { %4810 = vmatpush3.msra.mxu1 %v1051_v42  ;;  %4776 = vmatprep.subr.mxu0 %v1034_v44  ;;  %v4185_v37 = vpop.f32.mrf.mxu1  ;;  %v2207_v39 = vadd.f32 %v4082_v34, %v2137_v36 }
 0x23a   :  { %4811 = vmatprep.subr.mxu1 %v1066_v45  ;;  %4777 = vmatpush3.msra.mxu0 %v1018_v46  ;;  %v4151_v38 = vpop.f32.mrf.mxu0 }
 0x23b   :  { %4812 = vmatpush3.msra.mxu1 %v1050_v47  ;;  %4778 = vmatprep.subr.mxu0 %v1033_v48  ;;  %v4152_v42 = vadd.f32 %v4151_v38, %v4150_v33 }
 0x23c   :  { %4813 = vmatprep.subr.mxu1 %v1065_v49  ;;  %4779 = vmatpush3.msra.mxu0 %v1017_v52  ;;  %v4220_v41 = vpop.f32.mrf.mxu0 }
 0x23d   :  { %3604 = vmatprep.mubr.f32.mxu0 %v1374_v50  ;;  %4814 = vmatpush3.msra.mxu1 %v1049_v51 }
 0x23e   :  { %3674 = vmatprep.mubr.f32.mxu1 %v1375_v53  ;;  %3605 = vmatmul.mubr.f32.vlgmr.msra.gmra.mxu0 %v1366_v40  ;;  %v4117_v40 = vadd.f32 %v4116_v35, %v4115_v29  ;;  %v4221_v46 = vpop.f32.mrf.mxu0 }
 0x23f   :  { %3675 = vmatmul.mubr.f32.vlgmr.msra.gmra.mxu1 %v1373_v43  ;;  %v4186_v43 = vpop.f32.mrf.mxu1  ;;  %v4222_v50 = vadd.f32 %v4221_v46, %v4220_v41 }
 0x240   :  { %v2277_v44 = vadd.f32 %v4117_v40, %v2207_v39  ;;  %v4187_v48 = vadd.f32 %v4186_v43, %v4185_v37  ;;  %v4290_v49 = vpop.f32.mrf.mxu0 }
 0x241   :  { %v4255_v45 = vpop.f32.mrf.mxu1 }
 0x242   :  { %v2347_v47 = vadd.f32 %v4152_v42, %v2277_v44  ;;  %v4291_v54 = vpop.f32.mrf.mxu0 }
 0x243   :  { %v4256_v52 = vpop.f32.mrf.mxu1  ;;  %v4292_v58 = vadd.f32 %v4291_v54, %v4290_v49 }
 0x244   :  { %v2417_v53 = vadd.f32 %v4187_v48, %v2347_v47  ;;  %v4257_v56 = vadd.f32 %v4256_v52, %v4255_v45  ;;  %v4360_v57 = vpop.f32.mrf.mxu0 }
 0x245   :  { %v4325_v51 = vpop.f32.mrf.mxu1 }
 0x246   :  { %v2487_v55 = vadd.f32 %v4222_v50, %v2417_v53  ;;  %v4361_v62 = vpop.f32.mrf.mxu0 }
 0x247   :  { %v4326_v59 = vpop.f32.mrf.mxu1  ;;  %v4362_v2 = vadd.f32 %v4361_v62, %v4360_v57 }
 0x248   :  { %v2557_v60 = vadd.f32 %v4257_v56, %v2487_v55  ;;  %v4327_v0 = vadd.f32 %v4326_v59, %v4325_v51 }
 0x249   :  { %v4395_v61 = vpop.f32.mrf.mxu1 }
 0x24a   :  { %v2627_v63 = vadd.f32 %v4292_v58, %v2557_v60 }
 0x24b   :  { %v4396_v3 = vpop.f32.mrf.mxu1 }
 0x24c   :  { %v2697_v4 = vadd.f32 %v4327_v0, %v2627_v63  ;;  %v4397_v8 = vadd.f32 %v4396_v3, %v4395_v61 }
 0x24e   :  { %v2767_v7 = vadd.f32 %v4362_v2, %v2697_v4 }
 0x250   :  { %v2837_v12 = vadd.f32 %v4397_v8, %v2767_v7 }
 0x254   :  { %v4430_v1 = vpop.f32.mrf.mxu0 }
 0x256   :  { %v4465_v5 = vpop.f32.mrf.mxu1  ;;  %v4431_v6 = vpop.f32.mrf.mxu0 }
 0x257   :  { %v4432_v10 = vadd.f32 %v4431_v6, %v4430_v1 }
 0x258   :  { %v4466_v11 = vpop.f32.mrf.mxu1 }
 0x259   :  { %v2907_v15 = vadd.f32 %v4432_v10, %v2837_v12  ;;  %v4467_v16 = vadd.f32 %v4466_v11, %v4465_v5 }
 0x25b   :  { %v2977_v20 = vadd.f32 %v4467_v16, %v2907_v15 }
 0x276   :  { %v4500_v9 = vpop.f32.mrf.mxu0 }
 0x278   :  { %v4535_v13 = vpop.f32.mrf.mxu1  ;;  %v4501_v14 = vpop.f32.mrf.mxu0 }
 0x279   :  { %v4502_v18 = vadd.f32 %v4501_v14, %v4500_v9 }
 0x27a   :  { %v4536_v19 = vpop.f32.mrf.mxu1 }
 0x27b   :  { %v3047_v23 = vadd.f32 %v4502_v18, %v2977_v20  ;;  %v4537_v24 = vadd.f32 %v4536_v19, %v4535_v13 }
 0x27d   :  { %v3117_v28 = vadd.f32 %v4537_v24, %v3047_v23 }
 0x298   :  { %v4570_v17 = vpop.f32.mrf.mxu0 }
 0x29a   :  { %v4605_v21 = vpop.f32.mrf.mxu1  ;;  %v4571_v22 = vpop.f32.mrf.mxu0 }
 0x29b   :  { %v4572_v26 = vadd.f32 %v4571_v22, %v4570_v17 }
 0x29c   :  { %v4606_v27 = vpop.f32.mrf.mxu1 }
 0x29d   :  { %v3187_v31 = vadd.f32 %v4572_v26, %v3117_v28  ;;  %v4607_v32 = vadd.f32 %v4606_v27, %v4605_v21 }
 0x29f   :  { %v3257_v36 = vadd.f32 %v4607_v32, %v3187_v31 }
 0x2ba   :  { %v4640_v25 = vpop.f32.mrf.mxu0 }
 0x2bc   :  { %v4675_v29 = vpop.f32.mrf.mxu1  ;;  %v4641_v30 = vpop.f32.mrf.mxu0 }
 0x2bd   :  { %v4642_v34 = vadd.f32 %v4641_v30, %v4640_v25 }
 0x2be   :  { %v4676_v35 = vpop.f32.mrf.mxu1 }
 0x2bf   :  { %v3327_v39 = vadd.f32 %v4642_v34, %v3257_v36  ;;  %v4677_v40 = vadd.f32 %v4676_v35, %v4675_v29 }
 0x2c1   :  { %v3397_v43 = vadd.f32 %v4677_v40, %v3327_v39 }
 0x2dc   :  { %v4710_v33 = vpop.f32.mrf.mxu0 }
 0x2de   :  { %v4745_v37 = vpop.f32.mrf.mxu1  ;;  %v4711_v38 = vpop.f32.mrf.mxu0 }
 0x2df   :  { %v4712_v41 = vadd.f32 %v4711_v38, %v4710_v33 }
 0x2e0   :  { %v4746_v42 = vpop.f32.mrf.mxu1 }
 0x2e1   :  { %v3467_v44 = vadd.f32 %v4712_v41, %v3397_v43  ;;  %v4747_v45 = vadd.f32 %v4746_v42, %v4745_v37 }
 0x2e3   :  { %v3537_v50 = vadd.f32 %v4747_v45, %v3467_v44 }
 0x2fe   :  { %v4780_v46 = vpop.f32.mrf.mxu0 }
 0x2ff   :  { %v4815_v47 = vpop.f32.mrf.mxu1 }
 0x300   :  { %v4781_v48 = vpop.f32.mrf.mxu0 }
 0x301   :  { %v4816_v49 = vpop.f32.mrf.mxu1  ;;  %v4782_v52 = vadd.f32 %v4781_v48, %v4780_v46 }
 0x302   :  { %v4817_v51 = vadd.f32 %v4816_v49, %v4815_v47 }
 0x303   :  { %v3607_v53 = vadd.f32 %v4782_v52, %v3537_v50 }
 0x305   :  { %v3677_v54 = vadd.f32 %v4817_v51, %v3607_v53 }
 0x307   :  { %3680 = vst [vmem:[#allocation7] sm:$0x3] %v3677_v54 }
 0x308   :  { %4891 = shalt.err (!%p4888_p0)
}
 0x309   :  { %3690 = dma.vmem_to_hbm [thread:$0]  %s3688_s26, 32, %s5026_s3, [#allocation4]  }
 0x30a   :  { %4904 = dma.done.wait [#allocation4], 32  }
 0x30b   :  { %4905 = vsyncadd [#allocation4], 4294967264 }
 0x30c   :  { %3694 = vsyncpa [#allocation3], 1 }
 0x30d   :  { %3695 = vsyncpa [#allocation6], 1 }
 0x30e   :  { %3696 = vsyncpa [#allocation4], 1 }

</bundles_post_ra>
